<compile_context>
chip_gen: v7x
topology: tpu7x:2x2x1
jax: 0.10.0
libtpu: 0.0.40
codegen_flags: <defaults>
</compile_context>

<pallas_src>
import functools

import jax
import jax.numpy as jnp
from jax.experimental import pallas as pl
from jax.experimental.pallas import tpu as pltpu

NEG_INF = -1e9
LN_EPS = 1e-5  # torch.nn.LayerNorm default


# ----------------------------- in-kernel helpers -----------------------------

def _matmul(x, w):
    # x: (N, Din) f32/bf16; w: (Din, Dout) bf16, pre-transposed in the wrapper so this is a
    # plain A@B for the MXU (no in-kernel weight transpose). f32 accumulate.
    return jnp.dot(x.astype(jnp.bfloat16), w, preferred_element_type=jnp.float32)


def _layernorm(x, w, b):
    mu = jnp.mean(x, axis=-1, keepdims=True)
    var = jnp.mean((x - mu) ** 2, axis=-1, keepdims=True)
    return (x - mu) * jax.lax.rsqrt(var + LN_EPS) * w + b


def _attn(q_in, kv_in, wq, wkv, bq, bkv, wo, bo, mask, n_head):
    # q_in: (Lq, D); kv_in: (Lk, D). PyTorch MultiheadAttention, eval mode, batched heads.
    Lq, D = q_in.shape
    Lk = kv_in.shape[0]
    Dh = D // n_head
    scale = 1.0 / (Dh ** 0.5)

    q = _matmul(q_in, wq) + bq                    # (Lq, D)   f32
    kv = _matmul(kv_in, wkv) + bkv                # (Lk, 2D)  f32  (fused K/V projection)
    k, v = kv[:, :D], kv[:, D:]

    # head-major layout (transposes done in f32; last dim unchanged -> cheap relayout)
    qh = jnp.swapaxes(q.reshape(Lq, n_head, Dh), 0, 1)    # (H, Lq, Dh)
    kh = jnp.swapaxes(k.reshape(Lk, n_head, Dh), 0, 1)    # (H, Lk, Dh)
    vh = jnp.swapaxes(v.reshape(Lk, n_head, Dh), 0, 1)    # (H, Lk, Dh)

    s = jnp.einsum('hqd,hkd->hqk',
                   qh.astype(jnp.bfloat16), kh.astype(jnp.bfloat16),
                   preferred_element_type=jnp.float32) * scale      # (H, Lq, Lk) f32
    if mask is not None:
        s = s + mask[None, :, :]
    s_max = jnp.max(s, axis=-1, keepdims=True)
    p = jnp.exp(s - s_max)
    p = p * pl.reciprocal(jnp.sum(p, axis=-1, keepdims=True), approx=True)
    o = jnp.einsum('hqk,hkd->hqd',
                   p.astype(jnp.bfloat16), vh.astype(jnp.bfloat16),
                   preferred_element_type=jnp.float32)               # (H, Lq, Dh) f32
    o = jnp.swapaxes(o, 0, 1).reshape(Lq, D)
    return _matmul(o, wo) + bo


# ------------------------------- Pallas kernels -------------------------------

def decoder_layer_kernel(n_head,
                         xq_ref, xkv_ref, mem_ref, mask_ref,
                         sa_wq, sa_wkv, sa_bq, sa_bkv, sa_wo, sa_bo,
                         ca_wq, ca_wkv, ca_bq, ca_bkv, ca_wo, ca_bo,
                         w1, b1, w2, b2,
                         ln1w, ln1b, ln2w, ln2b, ln3w, ln3b,
                         o_ref):
    _, TQ, D = xq_ref.shape
    S = xkv_ref.shape[1]
    M = mem_ref.shape[1]

    x = xq_ref[...].reshape(TQ, D)        # query tile of the residual stream (f32)
    xkv = xkv_ref[...].reshape(S, D)      # full sequence for this batch -> self-attn K/V source
    mem = mem_ref[...].reshape(M, D)      # encoder memory (bf16)
    mask = mask_ref[...]                  # (TQ, S) additive causal mask (f32)

    # --- self attention block (post-norm) ---
    sa = _attn(x, xkv, sa_wq[...], sa_wkv[...], sa_bq[...], sa_bkv[...],
               sa_wo[...], sa_bo[...], mask, n_head)
    x = _layernorm(x + sa, ln1w[...], ln1b[...])

    # --- cross attention block ---
    ca = _attn(x, mem, ca_wq[...], ca_wkv[...], ca_bq[...], ca_bkv[...],
               ca_wo[...], ca_bo[...], None, n_head)
    x = _layernorm(x + ca, ln2w[...], ln2b[...])

    # --- feed forward block (Linear -> ReLU -> Linear), dropout = identity ---
    h = jnp.maximum(_matmul(x, w1[...]) + b1[...], 0.0)
    ff = _matmul(h, w2[...]) + b2[...]
    x = _layernorm(x + ff, ln3w[...], ln3b[...])

    o_ref[...] = x.reshape(1, TQ, D)


def out_head_kernel(x_ref, w_ref, b_ref, o_ref):
    # row tile: x (TN, D) f32; w (D, V) bf16; b (1, V) f32; out (TN, V) log-softmax over V.
    logits = _matmul(x_ref[...], w_ref[...]) + b_ref[...]
    z = logits - jnp.max(logits, axis=-1, keepdims=True)
    o_ref[...] = z - jnp.log(jnp.sum(jnp.exp(z), axis=-1, keepdims=True))


# ------------------------------- pallas_call glue -------------------------------

def _full_spec(shape):
    ndim = len(shape)
    return pl.BlockSpec(shape, lambda *_: (0,) * ndim)   # whole-array resident block


def decoder_layer(x, mem, mask, layer_params, n_head, tile_q=128):
    B, S, D = x.shape
    M = mem.shape[1]
    TQ = min(tile_q, S)
    assert S % TQ == 0, (S, TQ)
    grid = (B, S // TQ)

    in_specs = [
        pl.BlockSpec((1, TQ, D), lambda b, q: (b, q, 0)),   # residual-stream query tile
        pl.BlockSpec((1, S, D), lambda b, q: (b, 0, 0)),    # full sequence (self-attn K/V)
        pl.BlockSpec((1, M, D), lambda b, q: (b, 0, 0)),    # encoder memory
        pl.BlockSpec((TQ, S), lambda b, q: (q, 0)),         # causal-mask tile
    ] + [_full_spec(p.shape) for p in layer_params]

    return pl.pallas_call(
        functools.partial(decoder_layer_kernel, n_head),
        out_shape=jax.ShapeDtypeStruct((B, S, D), jnp.float32),
        grid=grid,
        in_specs=in_specs,
        out_specs=pl.BlockSpec((1, TQ, D), lambda b, q: (b, q, 0)),
        compiler_params=pltpu.CompilerParams(
            dimension_semantics=("parallel", "parallel"),
            vmem_limit_bytes=48 * 1024 * 1024),   # fits v7x's 64 MiB physical VMEM
    )(x, x, mem, mask, *layer_params)


def out_head(x2d, w, b, tile_n=256):
    N, D = x2d.shape
    V = w.shape[1]
    TN = min(tile_n, N)
    assert N % TN == 0, (N, TN)
    # TODO(synk): for very large V, add a V-tile reduction axis with an online logsumexp
    # accumulator + pl.when finalize; here the full (D, V) bf16 weight stays VMEM-resident.
    return pl.pallas_call(
        out_head_kernel,
        out_shape=jax.ShapeDtypeStruct((N, V), jnp.float32),
        grid=(N // TN,),
        in_specs=[
            pl.BlockSpec((TN, D), lambda i: (i, 0)),
            pl.BlockSpec((D, V), lambda i: (0, 0)),
            pl.BlockSpec((1, V), lambda i: (0, 0)),
        ],
        out_specs=pl.BlockSpec((TN, V), lambda i: (i, 0)),
        compiler_params=pltpu.CompilerParams(
            dimension_semantics=("parallel",),
            vmem_limit_bytes=48 * 1024 * 1024),
    )(x2d, w, b)


def transformer_dec_forward(tgt_tokens, memory, tgt_mask, params, n_head):
    """tgt_tokens: (S, B) int32; memory: (M, B, D) f32; tgt_mask: (S, S) additive f32 mask.
    Returns (S, B, V) log-probs — identical layout to the PyTorch module (batch_first=False)."""
    # Embedding gather kept as JAX glue (table lookup, not the hot path).
    emb = jnp.take(params['embedding'], tgt_tokens, axis=0)        # (S, B, D)
    # .squeeze() in the reference is a no-op for batch > 1 — keep the batched path.
    x = jnp.transpose(emb, (1, 0, 2)).astype(jnp.float32)          # (B, S, D) residual stream
    mem = jnp.transpose(memory, (1, 0, 2)).astype(jnp.bfloat16)    # (B, M, D) bf16 for the MXU

    for layer_params in params['layers']:
        x = decoder_layer(x, mem, tgt_mask, layer_params, n_head)

    B, S, D = x.shape
    logp = out_head(x.reshape(B * S, D), params['out_w'], params['out_b'])
    return jnp.transpose(logp.reshape(B, S, -1), (1, 0, 2))        # (S, B, V)


# ------------------------------- parameter init -------------------------------

def init_params(key, vocab_size, d_hidden, n_head, n_layers, dim_ff=2048):
    D = d_hidden

    def wmat(k, din, dout, scale=0.02):
        # Pre-transposed (Din, Dout), bf16: plain A@B on the MXU, half the weight DMA bytes.
        return (scale * jax.random.normal(k, (din, dout))).astype(jnp.bfloat16)

    def zeros(shape):
        return jnp.zeros(shape, jnp.float32)

    def ones(shape):
        return jnp.ones(shape, jnp.float32)

    keys = iter(jax.random.split(key, 2 + 8 * n_layers))
    params = {'embedding': jax.random.normal(next(keys), (vocab_size, D)).astype(jnp.float32)}

    layers = []
    for _ in range(n_layers):
        lp = [
            # self-attn: fused q / kv projections (split of in_proj_weight), out proj
            wmat(next(keys), D, D), wmat(next(keys), D, 2 * D),
            zeros((1, D)), zeros((1, 2 * D)),
            wmat(next(keys), D, D), zeros((1, D)),
            # cross-attn
            wmat(next(keys), D, D), wmat(next(keys), D, 2 * D),
            zeros((1, D)), zeros((1, 2 * D)),
            wmat(next(keys), D, D), zeros((1, D)),
            # feed-forward (PyTorch default dim_feedforward=2048)
            wmat(next(keys), D, dim_ff), zeros((1, dim_ff)),
            wmat(next(keys), dim_ff, D), zeros((1, D)),
            # layer norms 1/2/3
            ones((1, D)), zeros((1, D)),
            ones((1, D)), zeros((1, D)),
            ones((1, D)), zeros((1, D)),
        ]
        layers.append(lp)
    params['layers'] = layers
    params['out_w'] = wmat(next(keys), D, vocab_size)
    params['out_b'] = zeros((1, vocab_size))
    return params


# ------------------------------------ main ------------------------------------

if __name__ == "__main__":
    # lane-friendly toy config: D, dim_ff, V are multiples of 128 -> full vregs, unmasked stores
    vocab_size, d_hidden, n_head, n_layers = 256, 128, 4, 2
    S, B, M = 16, 2, 16

    key = jax.random.PRNGKey(0)
    kp, kt, km = jax.random.split(key, 3)

    params = init_params(kp, vocab_size, d_hidden, n_head, n_layers)
    tgt = jax.random.randint(kt, (S, B), 0, vocab_size, dtype=jnp.int32)
    memory = jax.random.normal(km, (M, B, d_hidden), dtype=jnp.float32)

    # standard causal tgt_mask (additive float mask, -inf -> -1e9 for numerical safety)
    idx = jnp.arange(S)
    tgt_mask = jnp.where(idx[:, None] >= idx[None, :], 0.0, NEG_INF).astype(jnp.float32)

    out = transformer_dec_forward(tgt, memory, tgt_mask, params, n_head)
    out = jax.block_until_ready(out)

    assert out.shape == (S, B, vocab_size), out.shape
    assert bool(jnp.all(jnp.isfinite(out)))
    # log-softmax rows should sum to ~1 in prob space
    assert bool(jnp.allclose(jnp.sum(jnp.exp(out), axis=2), 1.0, atol=1e-3))
    print("KERNEL_OK")
</pallas_src>

<mosaic_0001>
module attributes {stable_mosaic.version = 11 : i64} {
  func.func @decoder_layer_kernel(%arg0: i32, %arg1: i32, %arg2: memref<1x16x128xf32, #tpu.memory_space<vmem>>, %arg3: memref<1x16x128xf32, #tpu.memory_space<vmem>>, %arg4: memref<1x16x128xbf16, #tpu.memory_space<vmem>>, %arg5: memref<16x16xf32, #tpu.memory_space<vmem>>, %arg6: memref<128x128xbf16, #tpu.memory_space<vmem>>, %arg7: memref<128x256xbf16, #tpu.memory_space<vmem>>, %arg8: memref<1x128xf32, #tpu.memory_space<vmem>>, %arg9: memref<1x256xf32, #tpu.memory_space<vmem>>, %arg10: memref<128x128xbf16, #tpu.memory_space<vmem>>, %arg11: memref<1x128xf32, #tpu.memory_space<vmem>>, %arg12: memref<128x128xbf16, #tpu.memory_space<vmem>>, %arg13: memref<128x256xbf16, #tpu.memory_space<vmem>>, %arg14: memref<1x128xf32, #tpu.memory_space<vmem>>, %arg15: memref<1x256xf32, #tpu.memory_space<vmem>>, %arg16: memref<128x128xbf16, #tpu.memory_space<vmem>>, %arg17: memref<1x128xf32, #tpu.memory_space<vmem>>, %arg18: memref<128x2048xbf16, #tpu.memory_space<vmem>>, %arg19: memref<1x2048xf32, #tpu.memory_space<vmem>>, %arg20: memref<2048x128xbf16, #tpu.memory_space<vmem>>, %arg21: memref<1x128xf32, #tpu.memory_space<vmem>>, %arg22: memref<1x128xf32, #tpu.memory_space<vmem>>, %arg23: memref<1x128xf32, #tpu.memory_space<vmem>>, %arg24: memref<1x128xf32, #tpu.memory_space<vmem>>, %arg25: memref<1x128xf32, #tpu.memory_space<vmem>>, %arg26: memref<1x128xf32, #tpu.memory_space<vmem>>, %arg27: memref<1x128xf32, #tpu.memory_space<vmem>>, %arg28: memref<1x16x128xf32, #tpu.memory_space<vmem>>) attributes {dimension_semantics = [#tpu.dimension_semantics<parallel>, #tpu.dimension_semantics<parallel>], iteration_bounds = array<i64: 2, 1>, scalar_prefetch = 0 : i64, scratch_operands = 0 : i64, tpu.core_type = #tpu.core_type<tc>, window_params = [{transform_indices = @transform_0, window_bounds = array<i64: 1, 16, 128>}, {transform_indices = @transform_1, window_bounds = array<i64: 1, 16, 128>}, {transform_indices = @transform_2, window_bounds = array<i64: 1, 16, 128>}, {transform_indices = @transform_3, window_bounds = array<i64: 16, 16>}, {pipeline_mode = #tpu.pipeline_mode<synchronous>, transform_indices = @transform_4, window_bounds = array<i64: 128, 128>}, {pipeline_mode = #tpu.pipeline_mode<synchronous>, transform_indices = @transform_5, window_bounds = array<i64: 128, 256>}, {pipeline_mode = #tpu.pipeline_mode<synchronous>, transform_indices = @transform_6, window_bounds = array<i64: 1, 128>}, {pipeline_mode = #tpu.pipeline_mode<synchronous>, transform_indices = @transform_7, window_bounds = array<i64: 1, 256>}, {pipeline_mode = #tpu.pipeline_mode<synchronous>, transform_indices = @transform_8, window_bounds = array<i64: 128, 128>}, {pipeline_mode = #tpu.pipeline_mode<synchronous>, transform_indices = @transform_9, window_bounds = array<i64: 1, 128>}, {pipeline_mode = #tpu.pipeline_mode<synchronous>, transform_indices = @transform_10, window_bounds = array<i64: 128, 128>}, {pipeline_mode = #tpu.pipeline_mode<synchronous>, transform_indices = @transform_11, window_bounds = array<i64: 128, 256>}, {pipeline_mode = #tpu.pipeline_mode<synchronous>, transform_indices = @transform_12, window_bounds = array<i64: 1, 128>}, {pipeline_mode = #tpu.pipeline_mode<synchronous>, transform_indices = @transform_13, window_bounds = array<i64: 1, 256>}, {pipeline_mode = #tpu.pipeline_mode<synchronous>, transform_indices = @transform_14, window_bounds = array<i64: 128, 128>}, {pipeline_mode = #tpu.pipeline_mode<synchronous>, transform_indices = @transform_15, window_bounds = array<i64: 1, 128>}, {pipeline_mode = #tpu.pipeline_mode<synchronous>, transform_indices = @transform_16, window_bounds = array<i64: 128, 2048>}, {pipeline_mode = #tpu.pipeline_mode<synchronous>, transform_indices = @transform_17, window_bounds = array<i64: 1, 2048>}, {pipeline_mode = #tpu.pipeline_mode<synchronous>, transform_indices = @transform_18, window_bounds = array<i64: 2048, 128>}, {pipeline_mode = #tpu.pipeline_mode<synchronous>, transform_indices = @transform_19, window_bounds = array<i64: 1, 128>}, {pipeline_mode = #tpu.pipeline_mode<synchronous>, transform_indices = @transform_20, window_bounds = array<i64: 1, 128>}, {pipeline_mode = #tpu.pipeline_mode<synchronous>, transform_indices = @transform_21, window_bounds = array<i64: 1, 128>}, {pipeline_mode = #tpu.pipeline_mode<synchronous>, transform_indices = @transform_22, window_bounds = array<i64: 1, 128>}, {pipeline_mode = #tpu.pipeline_mode<synchronous>, transform_indices = @transform_23, window_bounds = array<i64: 1, 128>}, {pipeline_mode = #tpu.pipeline_mode<synchronous>, transform_indices = @transform_24, window_bounds = array<i64: 1, 128>}, {pipeline_mode = #tpu.pipeline_mode<synchronous>, transform_indices = @transform_25, window_bounds = array<i64: 1, 128>}, {transform_indices = @transform_26, window_bounds = array<i64: 1, 16, 128>}]} {
    %c0 = arith.constant 0 : index
    %c0_0 = arith.constant 0 : index
    %c0_1 = arith.constant 0 : index
    %0 = vector.load %arg2[%c0, %c0_0, %c0_1] : memref<1x16x128xf32, #tpu.memory_space<vmem>>, vector<1x16x128xf32>
    %1 = vector.shape_cast %0 : vector<1x16x128xf32> to vector<16x128xf32>
    %c0_2 = arith.constant 0 : index
    %c0_3 = arith.constant 0 : index
    %c0_4 = arith.constant 0 : index
    %2 = vector.load %arg3[%c0_2, %c0_3, %c0_4] : memref<1x16x128xf32, #tpu.memory_space<vmem>>, vector<1x16x128xf32>
    %3 = vector.shape_cast %2 : vector<1x16x128xf32> to vector<16x128xf32>
    %c0_5 = arith.constant 0 : index
    %c0_6 = arith.constant 0 : index
    %c0_7 = arith.constant 0 : index
    %4 = vector.load %arg4[%c0_5, %c0_6, %c0_7] : memref<1x16x128xbf16, #tpu.memory_space<vmem>>, vector<1x16x128xbf16>
    %5 = vector.shape_cast %4 : vector<1x16x128xbf16> to vector<16x128xbf16>
    %c0_8 = arith.constant 0 : index
    %c0_9 = arith.constant 0 : index
    %6 = vector.load %arg5[%c0_8, %c0_9] : memref<16x16xf32, #tpu.memory_space<vmem>>, vector<16x16xf32>
    %c0_10 = arith.constant 0 : index
    %c0_11 = arith.constant 0 : index
    %7 = vector.load %arg6[%c0_10, %c0_11] : memref<128x128xbf16, #tpu.memory_space<vmem>>, vector<128x128xbf16>
    %c0_12 = arith.constant 0 : index
    %c0_13 = arith.constant 0 : index
    %8 = vector.load %arg7[%c0_12, %c0_13] : memref<128x256xbf16, #tpu.memory_space<vmem>>, vector<128x256xbf16>
    %c0_14 = arith.constant 0 : index
    %c0_15 = arith.constant 0 : index
    %9 = vector.load %arg8[%c0_14, %c0_15] : memref<1x128xf32, #tpu.memory_space<vmem>>, vector<1x128xf32>
    %c0_16 = arith.constant 0 : index
    %c0_17 = arith.constant 0 : index
    %10 = vector.load %arg9[%c0_16, %c0_17] : memref<1x256xf32, #tpu.memory_space<vmem>>, vector<1x256xf32>
    %c0_18 = arith.constant 0 : index
    %c0_19 = arith.constant 0 : index
    %11 = vector.load %arg10[%c0_18, %c0_19] : memref<128x128xbf16, #tpu.memory_space<vmem>>, vector<128x128xbf16>
    %c0_20 = arith.constant 0 : index
    %c0_21 = arith.constant 0 : index
    %12 = vector.load %arg11[%c0_20, %c0_21] : memref<1x128xf32, #tpu.memory_space<vmem>>, vector<1x128xf32>
    %13 = arith.truncf %1 : vector<16x128xf32> to vector<16x128xbf16>
    %cst = arith.constant dense<0.000000e+00> : vector<16x128xf32>
    %14 = tpu.matmul %13, %7, %cst {dimension_numbers = #tpu.dot_dimension_numbers<[1], [0], [0], [1], [0, 0, 1, 1], [], []>} : vector<16x128xbf16>, vector<128x128xbf16>, vector<16x128xf32> -> vector<16x128xf32>
    %15 = vector.broadcast %9 : vector<1x128xf32> to vector<16x128xf32>
    %16 = arith.addf %14, %15 : vector<16x128xf32>
    %17 = arith.truncf %3 : vector<16x128xf32> to vector<16x128xbf16>
    %cst_22 = arith.constant dense<0.000000e+00> : vector<16x256xf32>
    %18 = tpu.matmul %17, %8, %cst_22 {dimension_numbers = #tpu.dot_dimension_numbers<[1], [0], [0], [1], [0, 0, 1, 1], [], []>} : vector<16x128xbf16>, vector<128x256xbf16>, vector<16x256xf32> -> vector<16x256xf32>
    %19 = vector.broadcast %10 : vector<1x256xf32> to vector<16x256xf32>
    %20 = arith.addf %18, %19 : vector<16x256xf32>
    %21 = vector.extract_strided_slice %20 {offsets = [0, 0], sizes = [16, 128], strides = [1, 1]} : vector<16x256xf32> to vector<16x128xf32>
    %22 = vector.extract_strided_slice %20 {offsets = [0, 128], sizes = [16, 128], strides = [1, 1]} : vector<16x256xf32> to vector<16x128xf32>
    %23 = vector.shape_cast %16 : vector<16x128xf32> to vector<16x4x32xf32>
    %24 = tpu.transpose %23, [1, 0, 2] : vector<16x4x32xf32> -> vector<4x16x32xf32>
    %25 = vector.shape_cast %21 : vector<16x128xf32> to vector<16x4x32xf32>
    %26 = tpu.transpose %25, [1, 0, 2] : vector<16x4x32xf32> -> vector<4x16x32xf32>
    %27 = vector.shape_cast %22 : vector<16x128xf32> to vector<16x4x32xf32>
    %28 = tpu.transpose %27, [1, 0, 2] : vector<16x4x32xf32> -> vector<4x16x32xf32>
    %29 = arith.truncf %24 : vector<4x16x32xf32> to vector<4x16x32xbf16>
    %30 = arith.truncf %26 : vector<4x16x32xf32> to vector<4x16x32xbf16>
    "tpu.trace_start"() <{level = 10 : i32, message = "hqd,hkd->hqk"}> : () -> ()
    %cst_23 = arith.constant dense<0.000000e+00> : vector<4x16x16xf32>
    %31 = tpu.matmul %29, %30, %cst_23 {dimension_numbers = #tpu.dot_dimension_numbers<[2], [2], [1], [1], [0, 0, 0, 1, 1, 1], [0], [0]>} : vector<4x16x32xbf16>, vector<4x16x32xbf16>, vector<4x16x16xf32> -> vector<4x16x16xf32>
    "tpu.trace_stop"() : () -> ()
    %cst_24 = arith.constant 0.176776692 : f32
    %32 = vector.broadcast %cst_24 : f32 to vector<4x16x16xf32>
    %33 = arith.mulf %31, %32 : vector<4x16x16xf32>
    %34 = vector.shape_cast %6 : vector<16x16xf32> to vector<1x16x16xf32>
    %35 = vector.broadcast %34 : vector<1x16x16xf32> to vector<4x16x16xf32>
    %36 = arith.addf %33, %35 : vector<4x16x16xf32>
    %cst_25 = arith.constant dense<0xFF800000> : vector<4x16xf32>
    %37 = vector.multi_reduction <maximumf>, %36, %cst_25 [2] : vector<4x16x16xf32> to vector<4x16xf32>
    %38 = vector.shape_cast %37 : vector<4x16xf32> to vector<4x16x1xf32>
    %39 = vector.broadcast %38 : vector<4x16x1xf32> to vector<4x16x16xf32>
    %40 = arith.subf %36, %39 : vector<4x16x16xf32>
    %41 = math.exp %40 : vector<4x16x16xf32>
    %cst_26 = arith.constant dense<0.000000e+00> : vector<4x16xf32>
    %42 = vector.multi_reduction <add>, %41, %cst_26 [2] : vector<4x16x16xf32> to vector<4x16xf32>
    %43 = vector.shape_cast %42 : vector<4x16xf32> to vector<4x16x1xf32>
    %44 = tpu.reciprocal %43 {approx = true} : vector<4x16x1xf32> -> vector<4x16x1xf32>
    %45 = vector.broadcast %44 : vector<4x16x1xf32> to vector<4x16x16xf32>
    %46 = arith.mulf %41, %45 : vector<4x16x16xf32>
    %47 = arith.truncf %46 : vector<4x16x16xf32> to vector<4x16x16xbf16>
    %48 = arith.truncf %28 : vector<4x16x32xf32> to vector<4x16x32xbf16>
    "tpu.trace_start"() <{level = 10 : i32, message = "hqk,hkd->hqd"}> : () -> ()
    %cst_27 = arith.constant dense<0.000000e+00> : vector<4x16x32xf32>
    %49 = tpu.matmul %47, %48, %cst_27 {dimension_numbers = #tpu.dot_dimension_numbers<[2], [1], [1], [2], [0, 0, 0, 1, 1, 2], [0], [0]>} : vector<4x16x16xbf16>, vector<4x16x32xbf16>, vector<4x16x32xf32> -> vector<4x16x32xf32>
    "tpu.trace_stop"() : () -> ()
    %50 = tpu.transpose %49, [1, 0, 2] : vector<4x16x32xf32> -> vector<16x4x32xf32>
    %51 = vector.shape_cast %50 : vector<16x4x32xf32> to vector<16x128xf32>
    %52 = arith.truncf %51 : vector<16x128xf32> to vector<16x128xbf16>
    %cst_28 = arith.constant dense<0.000000e+00> : vector<16x128xf32>
    %53 = tpu.matmul %52, %11, %cst_28 {dimension_numbers = #tpu.dot_dimension_numbers<[1], [0], [0], [1], [0, 0, 1, 1], [], []>} : vector<16x128xbf16>, vector<128x128xbf16>, vector<16x128xf32> -> vector<16x128xf32>
    %54 = vector.broadcast %12 : vector<1x128xf32> to vector<16x128xf32>
    %55 = arith.addf %53, %54 : vector<16x128xf32>
    %56 = arith.addf %1, %55 : vector<16x128xf32>
    %c0_29 = arith.constant 0 : index
    %c0_30 = arith.constant 0 : index
    %57 = vector.load %arg22[%c0_29, %c0_30] : memref<1x128xf32, #tpu.memory_space<vmem>>, vector<1x128xf32>
    %c0_31 = arith.constant 0 : index
    %c0_32 = arith.constant 0 : index
    %58 = vector.load %arg23[%c0_31, %c0_32] : memref<1x128xf32, #tpu.memory_space<vmem>>, vector<1x128xf32>
    %cst_33 = arith.constant dense<0.000000e+00> : vector<16xf32>
    %59 = vector.multi_reduction <add>, %56, %cst_33 [1] : vector<16x128xf32> to vector<16xf32>
    %60 = vector.shape_cast %59 : vector<16xf32> to vector<16x1xf32>
    %cst_34 = arith.constant 1.280000e+02 : f32
    %61 = vector.broadcast %cst_34 : f32 to vector<16x1xf32>
    %62 = arith.divf %60, %61 : vector<16x1xf32>
    %63 = vector.broadcast %62 : vector<16x1xf32> to vector<16x128xf32>
    %64 = arith.subf %56, %63 : vector<16x128xf32>
    %65 = arith.mulf %64, %64 : vector<16x128xf32>
    %cst_35 = arith.constant dense<0.000000e+00> : vector<16xf32>
    %66 = vector.multi_reduction <add>, %65, %cst_35 [1] : vector<16x128xf32> to vector<16xf32>
    %67 = vector.shape_cast %66 : vector<16xf32> to vector<16x1xf32>
    %cst_36 = arith.constant 1.280000e+02 : f32
    %68 = vector.broadcast %cst_36 : f32 to vector<16x1xf32>
    %69 = arith.divf %67, %68 : vector<16x1xf32>
    %70 = vector.broadcast %62 : vector<16x1xf32> to vector<16x128xf32>
    %71 = arith.subf %56, %70 : vector<16x128xf32>
    %cst_37 = arith.constant 9.99999974E-6 : f32
    %72 = vector.broadcast %cst_37 : f32 to vector<16x1xf32>
    %73 = arith.addf %69, %72 : vector<16x1xf32>
    %74 = math.rsqrt %73 : vector<16x1xf32>
    %75 = vector.broadcast %74 : vector<16x1xf32> to vector<16x128xf32>
    %76 = arith.mulf %71, %75 : vector<16x128xf32>
    %77 = vector.broadcast %57 : vector<1x128xf32> to vector<16x128xf32>
    %78 = arith.mulf %76, %77 : vector<16x128xf32>
    %79 = vector.broadcast %58 : vector<1x128xf32> to vector<16x128xf32>
    %80 = arith.addf %78, %79 : vector<16x128xf32>
    %c0_38 = arith.constant 0 : index
    %c0_39 = arith.constant 0 : index
    %81 = vector.load %arg12[%c0_38, %c0_39] : memref<128x128xbf16, #tpu.memory_space<vmem>>, vector<128x128xbf16>
    %c0_40 = arith.constant 0 : index
    %c0_41 = arith.constant 0 : index
    %82 = vector.load %arg13[%c0_40, %c0_41] : memref<128x256xbf16, #tpu.memory_space<vmem>>, vector<128x256xbf16>
    %c0_42 = arith.constant 0 : index
    %c0_43 = arith.constant 0 : index
    %83 = vector.load %arg14[%c0_42, %c0_43] : memref<1x128xf32, #tpu.memory_space<vmem>>, vector<1x128xf32>
    %c0_44 = arith.constant 0 : index
    %c0_45 = arith.constant 0 : index
    %84 = vector.load %arg15[%c0_44, %c0_45] : memref<1x256xf32, #tpu.memory_space<vmem>>, vector<1x256xf32>
    %c0_46 = arith.constant 0 : index
    %c0_47 = arith.constant 0 : index
    %85 = vector.load %arg16[%c0_46, %c0_47] : memref<128x128xbf16, #tpu.memory_space<vmem>>, vector<128x128xbf16>
    %c0_48 = arith.constant 0 : index
    %c0_49 = arith.constant 0 : index
    %86 = vector.load %arg17[%c0_48, %c0_49] : memref<1x128xf32, #tpu.memory_space<vmem>>, vector<1x128xf32>
    %87 = arith.truncf %80 : vector<16x128xf32> to vector<16x128xbf16>
    %cst_50 = arith.constant dense<0.000000e+00> : vector<16x128xf32>
    %88 = tpu.matmul %87, %81, %cst_50 {dimension_numbers = #tpu.dot_dimension_numbers<[1], [0], [0], [1], [0, 0, 1, 1], [], []>} : vector<16x128xbf16>, vector<128x128xbf16>, vector<16x128xf32> -> vector<16x128xf32>
    %89 = vector.broadcast %83 : vector<1x128xf32> to vector<16x128xf32>
    %90 = arith.addf %88, %89 : vector<16x128xf32>
    %cst_51 = arith.constant dense<0.000000e+00> : vector<16x256xf32>
    %91 = tpu.matmul %5, %82, %cst_51 {dimension_numbers = #tpu.dot_dimension_numbers<[1], [0], [0], [1], [0, 0, 1, 1], [], []>} : vector<16x128xbf16>, vector<128x256xbf16>, vector<16x256xf32> -> vector<16x256xf32>
    %92 = vector.broadcast %84 : vector<1x256xf32> to vector<16x256xf32>
    %93 = arith.addf %91, %92 : vector<16x256xf32>
    %94 = vector.extract_strided_slice %93 {offsets = [0, 0], sizes = [16, 128], strides = [1, 1]} : vector<16x256xf32> to vector<16x128xf32>
    %95 = vector.extract_strided_slice %93 {offsets = [0, 128], sizes = [16, 128], strides = [1, 1]} : vector<16x256xf32> to vector<16x128xf32>
    %96 = vector.shape_cast %90 : vector<16x128xf32> to vector<16x4x32xf32>
    %97 = tpu.transpose %96, [1, 0, 2] : vector<16x4x32xf32> -> vector<4x16x32xf32>
    %98 = vector.shape_cast %94 : vector<16x128xf32> to vector<16x4x32xf32>
    %99 = tpu.transpose %98, [1, 0, 2] : vector<16x4x32xf32> -> vector<4x16x32xf32>
    %100 = vector.shape_cast %95 : vector<16x128xf32> to vector<16x4x32xf32>
    %101 = tpu.transpose %100, [1, 0, 2] : vector<16x4x32xf32> -> vector<4x16x32xf32>
    %102 = arith.truncf %97 : vector<4x16x32xf32> to vector<4x16x32xbf16>
    %103 = arith.truncf %99 : vector<4x16x32xf32> to vector<4x16x32xbf16>
    "tpu.trace_start"() <{level = 10 : i32, message = "hqd,hkd->hqk"}> : () -> ()
    %cst_52 = arith.constant dense<0.000000e+00> : vector<4x16x16xf32>
    %104 = tpu.matmul %102, %103, %cst_52 {dimension_numbers = #tpu.dot_dimension_numbers<[2], [2], [1], [1], [0, 0, 0, 1, 1, 1], [0], [0]>} : vector<4x16x32xbf16>, vector<4x16x32xbf16>, vector<4x16x16xf32> -> vector<4x16x16xf32>
    "tpu.trace_stop"() : () -> ()
    %cst_53 = arith.constant 0.176776692 : f32
    %105 = vector.broadcast %cst_53 : f32 to vector<4x16x16xf32>
    %106 = arith.mulf %104, %105 : vector<4x16x16xf32>
    %cst_54 = arith.constant dense<0xFF800000> : vector<4x16xf32>
    %107 = vector.multi_reduction <maximumf>, %106, %cst_54 [2] : vector<4x16x16xf32> to vector<4x16xf32>
    %108 = vector.shape_cast %107 : vector<4x16xf32> to vector<4x16x1xf32>
    %109 = vector.broadcast %108 : vector<4x16x1xf32> to vector<4x16x16xf32>
    %110 = arith.subf %106, %109 : vector<4x16x16xf32>
    %111 = math.exp %110 : vector<4x16x16xf32>
    %cst_55 = arith.constant dense<0.000000e+00> : vector<4x16xf32>
    %112 = vector.multi_reduction <add>, %111, %cst_55 [2] : vector<4x16x16xf32> to vector<4x16xf32>
    %113 = vector.shape_cast %112 : vector<4x16xf32> to vector<4x16x1xf32>
    %114 = tpu.reciprocal %113 {approx = true} : vector<4x16x1xf32> -> vector<4x16x1xf32>
    %115 = vector.broadcast %114 : vector<4x16x1xf32> to vector<4x16x16xf32>
    %116 = arith.mulf %111, %115 : vector<4x16x16xf32>
    %117 = arith.truncf %116 : vector<4x16x16xf32> to vector<4x16x16xbf16>
    %118 = arith.truncf %101 : vector<4x16x32xf32> to vector<4x16x32xbf16>
    "tpu.trace_start"() <{level = 10 : i32, message = "hqk,hkd->hqd"}> : () -> ()
    %cst_56 = arith.constant dense<0.000000e+00> : vector<4x16x32xf32>
    %119 = tpu.matmul %117, %118, %cst_56 {dimension_numbers = #tpu.dot_dimension_numbers<[2], [1], [1], [2], [0, 0, 0, 1, 1, 2], [0], [0]>} : vector<4x16x16xbf16>, vector<4x16x32xbf16>, vector<4x16x32xf32> -> vector<4x16x32xf32>
    "tpu.trace_stop"() : () -> ()
    %120 = tpu.transpose %119, [1, 0, 2] : vector<4x16x32xf32> -> vector<16x4x32xf32>
    %121 = vector.shape_cast %120 : vector<16x4x32xf32> to vector<16x128xf32>
    %122 = arith.truncf %121 : vector<16x128xf32> to vector<16x128xbf16>
    %cst_57 = arith.constant dense<0.000000e+00> : vector<16x128xf32>
    %123 = tpu.matmul %122, %85, %cst_57 {dimension_numbers = #tpu.dot_dimension_numbers<[1], [0], [0], [1], [0, 0, 1, 1], [], []>} : vector<16x128xbf16>, vector<128x128xbf16>, vector<16x128xf32> -> vector<16x128xf32>
    %124 = vector.broadcast %86 : vector<1x128xf32> to vector<16x128xf32>
    %125 = arith.addf %123, %124 : vector<16x128xf32>
    %126 = arith.addf %80, %125 : vector<16x128xf32>
    %c0_58 = arith.constant 0 : index
    %c0_59 = arith.constant 0 : index
    %127 = vector.load %arg24[%c0_58, %c0_59] : memref<1x128xf32, #tpu.memory_space<vmem>>, vector<1x128xf32>
    %c0_60 = arith.constant 0 : index
    %c0_61 = arith.constant 0 : index
    %128 = vector.load %arg25[%c0_60, %c0_61] : memref<1x128xf32, #tpu.memory_space<vmem>>, vector<1x128xf32>
    %cst_62 = arith.constant dense<0.000000e+00> : vector<16xf32>
    %129 = vector.multi_reduction <add>, %126, %cst_62 [1] : vector<16x128xf32> to vector<16xf32>
    %130 = vector.shape_cast %129 : vector<16xf32> to vector<16x1xf32>
    %cst_63 = arith.constant 1.280000e+02 : f32
    %131 = vector.broadcast %cst_63 : f32 to vector<16x1xf32>
    %132 = arith.divf %130, %131 : vector<16x1xf32>
    %133 = vector.broadcast %132 : vector<16x1xf32> to vector<16x128xf32>
    %134 = arith.subf %126, %133 : vector<16x128xf32>
    %135 = arith.mulf %134, %134 : vector<16x128xf32>
    %cst_64 = arith.constant dense<0.000000e+00> : vector<16xf32>
    %136 = vector.multi_reduction <add>, %135, %cst_64 [1] : vector<16x128xf32> to vector<16xf32>
    %137 = vector.shape_cast %136 : vector<16xf32> to vector<16x1xf32>
    %cst_65 = arith.constant 1.280000e+02 : f32
    %138 = vector.broadcast %cst_65 : f32 to vector<16x1xf32>
    %139 = arith.divf %137, %138 : vector<16x1xf32>
    %140 = vector.broadcast %132 : vector<16x1xf32> to vector<16x128xf32>
    %141 = arith.subf %126, %140 : vector<16x128xf32>
    %cst_66 = arith.constant 9.99999974E-6 : f32
    %142 = vector.broadcast %cst_66 : f32 to vector<16x1xf32>
    %143 = arith.addf %139, %142 : vector<16x1xf32>
    %144 = math.rsqrt %143 : vector<16x1xf32>
    %145 = vector.broadcast %144 : vector<16x1xf32> to vector<16x128xf32>
    %146 = arith.mulf %141, %145 : vector<16x128xf32>
    %147 = vector.broadcast %127 : vector<1x128xf32> to vector<16x128xf32>
    %148 = arith.mulf %146, %147 : vector<16x128xf32>
    %149 = vector.broadcast %128 : vector<1x128xf32> to vector<16x128xf32>
    %150 = arith.addf %148, %149 : vector<16x128xf32>
    %c0_67 = arith.constant 0 : index
    %c0_68 = arith.constant 0 : index
    %151 = vector.load %arg18[%c0_67, %c0_68] : memref<128x2048xbf16, #tpu.memory_space<vmem>>, vector<128x2048xbf16>
    %152 = arith.truncf %150 : vector<16x128xf32> to vector<16x128xbf16>
    %cst_69 = arith.constant dense<0.000000e+00> : vector<16x2048xf32>
    %153 = tpu.matmul %152, %151, %cst_69 {dimension_numbers = #tpu.dot_dimension_numbers<[1], [0], [0], [1], [0, 0, 1, 1], [], []>} : vector<16x128xbf16>, vector<128x2048xbf16>, vector<16x2048xf32> -> vector<16x2048xf32>
    %c0_70 = arith.constant 0 : index
    %c0_71 = arith.constant 0 : index
    %154 = vector.load %arg19[%c0_70, %c0_71] : memref<1x2048xf32, #tpu.memory_space<vmem>>, vector<1x2048xf32>
    %155 = vector.broadcast %154 : vector<1x2048xf32> to vector<16x2048xf32>
    %156 = arith.addf %153, %155 : vector<16x2048xf32>
    %cst_72 = arith.constant 0.000000e+00 : f32
    %157 = vector.broadcast %cst_72 : f32 to vector<16x2048xf32>
    %158 = arith.maximumf %156, %157 : vector<16x2048xf32>
    %c0_73 = arith.constant 0 : index
    %c0_74 = arith.constant 0 : index
    %159 = vector.load %arg20[%c0_73, %c0_74] : memref<2048x128xbf16, #tpu.memory_space<vmem>>, vector<2048x128xbf16>
    %160 = arith.truncf %158 : vector<16x2048xf32> to vector<16x2048xbf16>
    %cst_75 = arith.constant dense<0.000000e+00> : vector<16x128xf32>
    %161 = tpu.matmul %160, %159, %cst_75 {dimension_numbers = #tpu.dot_dimension_numbers<[1], [0], [0], [1], [0, 0, 1, 1], [], []>} : vector<16x2048xbf16>, vector<2048x128xbf16>, vector<16x128xf32> -> vector<16x128xf32>
    %c0_76 = arith.constant 0 : index
    %c0_77 = arith.constant 0 : index
    %162 = vector.load %arg21[%c0_76, %c0_77] : memref<1x128xf32, #tpu.memory_space<vmem>>, vector<1x128xf32>
    %163 = vector.broadcast %162 : vector<1x128xf32> to vector<16x128xf32>
    %164 = arith.addf %161, %163 : vector<16x128xf32>
    %165 = arith.addf %150, %164 : vector<16x128xf32>
    %c0_78 = arith.constant 0 : index
    %c0_79 = arith.constant 0 : index
    %166 = vector.load %arg26[%c0_78, %c0_79] : memref<1x128xf32, #tpu.memory_space<vmem>>, vector<1x128xf32>
    %c0_80 = arith.constant 0 : index
    %c0_81 = arith.constant 0 : index
    %167 = vector.load %arg27[%c0_80, %c0_81] : memref<1x128xf32, #tpu.memory_space<vmem>>, vector<1x128xf32>
    %cst_82 = arith.constant dense<0.000000e+00> : vector<16xf32>
    %168 = vector.multi_reduction <add>, %165, %cst_82 [1] : vector<16x128xf32> to vector<16xf32>
    %169 = vector.shape_cast %168 : vector<16xf32> to vector<16x1xf32>
    %cst_83 = arith.constant 1.280000e+02 : f32
    %170 = vector.broadcast %cst_83 : f32 to vector<16x1xf32>
    %171 = arith.divf %169, %170 : vector<16x1xf32>
    %172 = vector.broadcast %171 : vector<16x1xf32> to vector<16x128xf32>
    %173 = arith.subf %165, %172 : vector<16x128xf32>
    %174 = arith.mulf %173, %173 : vector<16x128xf32>
    %cst_84 = arith.constant dense<0.000000e+00> : vector<16xf32>
    %175 = vector.multi_reduction <add>, %174, %cst_84 [1] : vector<16x128xf32> to vector<16xf32>
    %176 = vector.shape_cast %175 : vector<16xf32> to vector<16x1xf32>
    %cst_85 = arith.constant 1.280000e+02 : f32
    %177 = vector.broadcast %cst_85 : f32 to vector<16x1xf32>
    %178 = arith.divf %176, %177 : vector<16x1xf32>
    %179 = vector.broadcast %171 : vector<16x1xf32> to vector<16x128xf32>
    %180 = arith.subf %165, %179 : vector<16x128xf32>
    %cst_86 = arith.constant 9.99999974E-6 : f32
    %181 = vector.broadcast %cst_86 : f32 to vector<16x1xf32>
    %182 = arith.addf %178, %181 : vector<16x1xf32>
    %183 = math.rsqrt %182 : vector<16x1xf32>
    %184 = vector.broadcast %183 : vector<16x1xf32> to vector<16x128xf32>
    %185 = arith.mulf %180, %184 : vector<16x128xf32>
    %186 = vector.broadcast %166 : vector<1x128xf32> to vector<16x128xf32>
    %187 = arith.mulf %185, %186 : vector<16x128xf32>
    %188 = vector.broadcast %167 : vector<1x128xf32> to vector<16x128xf32>
    %189 = arith.addf %187, %188 : vector<16x128xf32>
    %190 = vector.shape_cast %189 : vector<16x128xf32> to vector<1x16x128xf32>
    %c0_87 = arith.constant 0 : index
    %c0_88 = arith.constant 0 : index
    %c0_89 = arith.constant 0 : index
    %191 = vector.load %arg28[%c0_87, %c0_88, %c0_89] : memref<1x16x128xf32, #tpu.memory_space<vmem>>, vector<1x16x128xf32>
    tpu.vector_store %arg28[%c0_87, %c0_88, %c0_89], %190 {strides = array<i32>} : memref<1x16x128xf32, #tpu.memory_space<vmem>>, vector<1x16x128xf32>,
    return
  }
  func.func @transform_0(%arg0: i32, %arg1: i32) -> (i32, i32, i32) {
    %c0_i32 = arith.constant 0 : i32
    %c0_i32_0 = arith.constant 0 : i32
    return %arg0, %arg1, %c0_i32 : i32, i32, i32
  }
  func.func @transform_1(%arg0: i32, %arg1: i32) -> (i32, i32, i32) {
    %c0_i32 = arith.constant 0 : i32
    %c0_i32_0 = arith.constant 0 : i32
    %c0_i32_1 = arith.constant 0 : i32
    return %arg0, %c0_i32, %c0_i32_0 : i32, i32, i32
  }
  func.func @transform_2(%arg0: i32, %arg1: i32) -> (i32, i32, i32) {
    %c0_i32 = arith.constant 0 : i32
    %c0_i32_0 = arith.constant 0 : i32
    %c0_i32_1 = arith.constant 0 : i32
    return %arg0, %c0_i32, %c0_i32_0 : i32, i32, i32
  }
  func.func @transform_3(%arg0: i32, %arg1: i32) -> (i32, i32) {
    %c0_i32 = arith.constant 0 : i32
    %c0_i32_0 = arith.constant 0 : i32
    return %arg1, %c0_i32 : i32, i32
  }
  func.func @transform_4(%arg0: i32, %arg1: i32) -> (i32, i32) {
    %c0_i32 = arith.constant 0 : i32
    %c0_i32_0 = arith.constant 0 : i32
    %c0_i32_1 = arith.constant 0 : i32
    return %c0_i32, %c0_i32_0 : i32, i32
  }
  func.func @transform_5(%arg0: i32, %arg1: i32) -> (i32, i32) {
    %c0_i32 = arith.constant 0 : i32
    %c0_i32_0 = arith.constant 0 : i32
    %c0_i32_1 = arith.constant 0 : i32
    return %c0_i32, %c0_i32_0 : i32, i32
  }
  func.func @transform_6(%arg0: i32, %arg1: i32) -> (i32, i32) {
    %c0_i32 = arith.constant 0 : i32
    %c0_i32_0 = arith.constant 0 : i32
    %c0_i32_1 = arith.constant 0 : i32
    return %c0_i32, %c0_i32_0 : i32, i32
  }
  func.func @transform_7(%arg0: i32, %arg1: i32) -> (i32, i32) {
    %c0_i32 = arith.constant 0 : i32
    %c0_i32_0 = arith.constant 0 : i32
    %c0_i32_1 = arith.constant 0 : i32
    return %c0_i32, %c0_i32_0 : i32, i32
  }
  func.func @transform_8(%arg0: i32, %arg1: i32) -> (i32, i32) {
    %c0_i32 = arith.constant 0 : i32
    %c0_i32_0 = arith.constant 0 : i32
    %c0_i32_1 = arith.constant 0 : i32
    return %c0_i32, %c0_i32_0 : i32, i32
  }
  func.func @transform_9(%arg0: i32, %arg1: i32) -> (i32, i32) {
    %c0_i32 = arith.constant 0 : i32
    %c0_i32_0 = arith.constant 0 : i32
    %c0_i32_1 = arith.constant 0 : i32
    return %c0_i32, %c0_i32_0 : i32, i32
  }
  func.func @transform_10(%arg0: i32, %arg1: i32) -> (i32, i32) {
    %c0_i32 = arith.constant 0 : i32
    %c0_i32_0 = arith.constant 0 : i32
    %c0_i32_1 = arith.constant 0 : i32
    return %c0_i32, %c0_i32_0 : i32, i32
  }
  func.func @transform_11(%arg0: i32, %arg1: i32) -> (i32, i32) {
    %c0_i32 = arith.constant 0 : i32
    %c0_i32_0 = arith.constant 0 : i32
    %c0_i32_1 = arith.constant 0 : i32
    return %c0_i32, %c0_i32_0 : i32, i32
  }
  func.func @transform_12(%arg0: i32, %arg1: i32) -> (i32, i32) {
    %c0_i32 = arith.constant 0 : i32
    %c0_i32_0 = arith.constant 0 : i32
    %c0_i32_1 = arith.constant 0 : i32
    return %c0_i32, %c0_i32_0 : i32, i32
  }
  func.func @transform_13(%arg0: i32, %arg1: i32) -> (i32, i32) {
    %c0_i32 = arith.constant 0 : i32
    %c0_i32_0 = arith.constant 0 : i32
    %c0_i32_1 = arith.constant 0 : i32
    return %c0_i32, %c0_i32_0 : i32, i32
  }
  func.func @transform_14(%arg0: i32, %arg1: i32) -> (i32, i32) {
    %c0_i32 = arith.constant 0 : i32
    %c0_i32_0 = arith.constant 0 : i32
    %c0_i32_1 = arith.constant 0 : i32
    return %c0_i32, %c0_i32_0 : i32, i32
  }
  func.func @transform_15(%arg0: i32, %arg1: i32) -> (i32, i32) {
    %c0_i32 = arith.constant 0 : i32
    %c0_i32_0 = arith.constant 0 : i32
    %c0_i32_1 = arith.constant 0 : i32
    return %c0_i32, %c0_i32_0 : i32, i32
  }
  func.func @transform_16(%arg0: i32, %arg1: i32) -> (i32, i32) {
    %c0_i32 = arith.constant 0 : i32
    %c0_i32_0 = arith.constant 0 : i32
    %c0_i32_1 = arith.constant 0 : i32
    return %c0_i32, %c0_i32_0 : i32, i32
  }
  func.func @transform_17(%arg0: i32, %arg1: i32) -> (i32, i32) {
    %c0_i32 = arith.constant 0 : i32
    %c0_i32_0 = arith.constant 0 : i32
    %c0_i32_1 = arith.constant 0 : i32
    return %c0_i32, %c0_i32_0 : i32, i32
  }
  func.func @transform_18(%arg0: i32, %arg1: i32) -> (i32, i32) {
    %c0_i32 = arith.constant 0 : i32
    %c0_i32_0 = arith.constant 0 : i32
    %c0_i32_1 = arith.constant 0 : i32
    return %c0_i32, %c0_i32_0 : i32, i32
  }
  func.func @transform_19(%arg0: i32, %arg1: i32) -> (i32, i32) {
    %c0_i32 = arith.constant 0 : i32
    %c0_i32_0 = arith.constant 0 : i32
    %c0_i32_1 = arith.constant 0 : i32
    return %c0_i32, %c0_i32_0 : i32, i32
  }
  func.func @transform_20(%arg0: i32, %arg1: i32) -> (i32, i32) {
    %c0_i32 = arith.constant 0 : i32
    %c0_i32_0 = arith.constant 0 : i32
    %c0_i32_1 = arith.constant 0 : i32
    return %c0_i32, %c0_i32_0 : i32, i32
  }
  func.func @transform_21(%arg0: i32, %arg1: i32) -> (i32, i32) {
    %c0_i32 = arith.constant 0 : i32
    %c0_i32_0 = arith.constant 0 : i32
    %c0_i32_1 = arith.constant 0 : i32
    return %c0_i32, %c0_i32_0 : i32, i32
  }
  func.func @transform_22(%arg0: i32, %arg1: i32) -> (i32, i32) {
    %c0_i32 = arith.constant 0 : i32
    %c0_i32_0 = arith.constant 0 : i32
    %c0_i32_1 = arith.constant 0 : i32
    return %c0_i32, %c0_i32_0 : i32, i32
  }
  func.func @transform_23(%arg0: i32, %arg1: i32) -> (i32, i32) {
    %c0_i32 = arith.constant 0 : i32
    %c0_i32_0 = arith.constant 0 : i32
    %c0_i32_1 = arith.constant 0 : i32
    return %c0_i32, %c0_i32_0 : i32, i32
  }
  func.func @transform_24(%arg0: i32, %arg1: i32) -> (i32, i32) {
    %c0_i32 = arith.constant 0 : i32
    %c0_i32_0 = arith.constant 0 : i32
    %c0_i32_1 = arith.constant 0 : i32
    return %c0_i32, %c0_i32_0 : i32, i32
  }
  func.func @transform_25(%arg0: i32, %arg1: i32) -> (i32, i32) {
    %c0_i32 = arith.constant 0 : i32
    %c0_i32_0 = arith.constant 0 : i32
    %c0_i32_1 = arith.constant 0 : i32
    return %c0_i32, %c0_i32_0 : i32, i32
  }
  func.func @transform_26(%arg0: i32, %arg1: i32) -> (i32, i32, i32) {
    %c0_i32 = arith.constant 0 : i32
    %c0_i32_0 = arith.constant 0 : i32
    return %arg0, %arg1, %c0_i32 : i32, i32, i32
  }
}

</mosaic_0001>

<bundles_post_ra>
// kernel: tpu_custom_call.1
= control target key start
LH: loop header
LB: loop body
LE: loop exit
PB: predicated region body
PF: predicated region fallthrough
CT: control target
= control target key end

     0   :  { %s11382_s0 = inlined_call_operand.hbm [shape: f32[2,16,128], index: 0, kind: input, shape index: {}]   ;;  %s11383_s1 = inlined_call_operand.hbm [shape: f32[2,16,128], index: 1, kind: input, shape index: {}]   ;;  %s11384_s2 = inlined_call_operand.hbm [shape: bf16[2,16,128], index: 2, kind: input, shape index: {}]   ;;  %s11385_s3 = inlined_call_operand.hbm [shape: f32[16,16], index: 3, kind: input, shape index: {}]   ;;  %s11386_s4 = inlined_call_operand.hbm [shape: bf16[128,128], index: 4, kind: input, shape index: {}]   ;;  %s11387_s5 = inlined_call_operand.hbm [shape: bf16[128,256], index: 5, kind: input, shape index: {}]   ;;  %s11388_s6 = inlined_call_operand.vmem [shape: f32[1,128], index: 6, kind: input, shape index: {}]   ;;  %s11389_s7 = inlined_call_operand.vmem [shape: f32[1,256], index: 7, kind: input, shape index: {}]   ;;  %s11390_s8 = inlined_call_operand.hbm [shape: bf16[128,128], index: 8, kind: input, shape index: {}]   ;;  %s11391_s9 = inlined_call_operand.vmem [shape: f32[1,128], index: 9, kind: input, shape index: {}]   ;;  %s11392_s10 = inlined_call_operand.hbm [shape: bf16[128,128], index: 10, kind: input, shape index: {}]   ;;  %s11393_s11 = inlined_call_operand.hbm [shape: bf16[128,256], index: 11, kind: input, shape index: {}]   ;;  %s11394_s12 = inlined_call_operand.vmem [shape: f32[1,128], index: 12, kind: input, shape index: {}]   ;;  %s11395_s13 = inlined_call_operand.vmem [shape: f32[1,256], index: 13, kind: input, shape index: {}]   ;;  %s11396_s14 = inlined_call_operand.hbm [shape: bf16[128,128], index: 14, kind: input, shape index: {}]   ;;  %s11397_s15 = inlined_call_operand.vmem [shape: f32[1,128], index: 15, kind: input, shape index: {}]   ;;  %s11398_s16 = inlined_call_operand.hbm [shape: bf16[128,2048], index: 16, kind: input, shape index: {}]   ;;  %s11399_s17 = inlined_call_operand.vmem [shape: f32[1,2048], index: 17, kind: input, shape index: {}]   ;;  %s11400_s18 = inlined_call_operand.hbm [shape: bf16[2048,128], index: 18, kind: input, shape index: {}]   ;;  %s11401_s19 = inlined_call_operand.vmem [shape: f32[1,128], index: 19, kind: input, shape index: {}]   ;;  %s11402_s20 = inlined_call_operand.vmem [shape: f32[1,128], index: 20, kind: input, shape index: {}]   ;;  %s11403_s21 = inlined_call_operand.vmem [shape: f32[1,128], index: 21, kind: input, shape index: {}]   ;;  %s11404_s22 = inlined_call_operand.vmem [shape: f32[1,128], index: 22, kind: input, shape index: {}]   ;;  %s11405_s23 = inlined_call_operand.vmem [shape: f32[1,128], index: 23, kind: input, shape index: {}]   ;;  %s11406_s24 = inlined_call_operand.vmem [shape: f32[1,128], index: 24, kind: input, shape index: {}]   ;;  %s11407_s25 = inlined_call_operand.vmem [shape: f32[1,128], index: 25, kind: input, shape index: {}]   ;;  %s11408_s26 = inlined_call_operand.hbm [shape: f32[2,16,128], index: 26, kind: output, shape index: {}]  }
   0x1   :  { %11459 = sst [smem:[#allocation41_spill]] %s11382_s0 }
   0x2   :  { %11460 = sst [smem:[#allocation42_spill]] %s11383_s1 }
   0x3   :  { %11461 = sst [smem:[#allocation43_spill]] %s11384_s2 }
   0x4   :  { %11462 = sst [smem:[#allocation44_spill]] %s11385_s3 }
   0x5   :  { %11463 = sst [smem:[#allocation45_spill]] %s11386_s4 }
   0x6   :  { %11464 = sst [smem:[#allocation46_spill]] %s11387_s5 }
   0x7   :  { %11465 = sst [smem:[#allocation47_spill]] %s11388_s6 }
   0x8   :  { %11466 = sst [smem:[#allocation48_spill]] %s11389_s7 }
   0x9   :  { %11467 = sst [smem:[#allocation49_spill]] %s11390_s8 }
   0xa   :  { %11468 = sst [smem:[#allocation50_spill]] %s11391_s9 }
   0xb   :  { %11469 = sst [smem:[#allocation51_spill]] %s11392_s10 }
   0xc   :  { %11470 = sst [smem:[#allocation52_spill]] %s11393_s11 }
   0xd   :  { %11471 = sst [smem:[#allocation53_spill]] %s11394_s12 }
   0xe   :  { %11472 = sst [smem:[#allocation54_spill]] %s11395_s13 }
   0xf   :  { %11473 = sst [smem:[#allocation55_spill]] %s11396_s14 }
  0x10   :  { %11474 = sst [smem:[#allocation56_spill]] %s11397_s15 }
  0x11   :  { %11475 = sst [smem:[#allocation57_spill]] %s11399_s17 }
  0x12   :  { %11476 = sst [smem:[#allocation58_spill]] %s11401_s19 }
  0x13   :  { %11477 = sst [smem:[#allocation59_spill]] %s11402_s20 }
  0x14   :  { %11478 = sst [smem:[#allocation60_spill]] %s11403_s21 }
  0x15   :  { %11479 = sst [smem:[#allocation61_spill]] %s11404_s22 }
  0x16   :  { %11480 = sst [smem:[#allocation62_spill]] %s11405_s23 }
  0x17   :  { %11481 = sst [smem:[#allocation63_spill]] %s11406_s24 }
  0x18   :  { %11482 = sst [smem:[#allocation64_spill]] %s11407_s25 }
  0x19   :  { %11483 = sst [smem:[#allocation65_spill]] %s11408_s26 }
  0x1a   :  { %31 = vsyncpa [#allocation3], 0 }
  0x1b   :  { %33 = vsyncpa [#allocation3 + $0x1], 0 }
  0x1c   :  { %34 = vsyncpa [#allocation6], 0 }
  0x1d   :  { %36 = vsyncpa [#allocation6 + $0x1], 0 }
  0x1e   :  { %37 = vsyncpa [#allocation9], 0 }
  0x1f   :  { %38 = vsyncpa [#allocation12], 0 }
  0x20   :  { %39 = vsyncpa [#allocation15], 0 }
  0x21   :  { %40 = vsyncpa [#allocation18], 0 }
  0x22   :  { %41 = vsyncpa [#allocation21], 0 }
  0x23   :  { %42 = vsyncpa [#allocation4], 0 }
  0x24   :  { %44 = vsyncpa [#allocation4 + $0x1], 0  ;;  %s10057_s27 = smov 0   ;;  %s10059_s3 = smov 0  }
  0x25   :  { %s10061_s7 = smov 0   ;;  %s10063_s28 = smov 0  }
  0x26   :  { %s10065_s8 = smov 0   ;;  %s10067_s4 = smov 0  }
  0x27 LB: > { %11484 = sst [smem:[#allocation31_spill]] %s9872_s27  ;;  %s10088_s29 = sadd.s32 4294967295, %s9892_s4   ;;  %s9892_s4 = sphi %s10067_s4, %s50_s4   ;;  %s9888_s8 = sphi %s10065_s8, %s11567_s8   ;;  %s9884_s28 = sphi %s10063_s28, %s11566_s28   ;;  %s9880_s7 = sphi %s10061_s7, %s11562_s7   ;;  %s9876_s3 = sphi %s10059_s3, %s11565_s3   ;;  %s9872_s27 = sphi %s10057_s27, %s11564_s27  }
  0x28   : > { %11485 = sst [smem:[#allocation32_spill]] %s9880_s7  ;;  %p8106_p0 = scmp.ge.s32.totalorder %s9892_s4, 1 }
  0x29   : > { %11486 = sst [smem:[#allocation33_spill]] %s9884_s28  ;;  %p11420_p1 = scmp.eq.s32.totalorder %s10088_s29, 0 }
  0x2a   : > { %11487 = sst [smem:[#allocation34_spill]] %s9892_s4  ;;  %p663_p2 = scmp.lt.s32.totalorder %s9892_s4, 3 }
  0x2b   : > { %11488 = sst [smem:[#allocation35_spill]] %s10088_s29  ;;  %s9894_s9 = smov [#allocation8]  }
  0x2c   : > { %p10093_p3 = pnand %p8106_p0, %p663_p2  ;;  %s678_s30 = sshll.u32 %s9894_s9, 4  ;;  %s10097_s30 = int_to_ptr.vmem [resolvable:$true] %s678_s30 }
  0x2d   : > { %s9895_s5 = smov [#allocation11]   ;;  %s11491_s26 = sld [smem:[#allocation44_spill]] }
  0x2e   : > { %s11489_s0 = scalar_select %p10093_p3, 1, 0 }
  0x2f   : > { %p8993_p4 = pneg %p10093_p3  ;;  %s704_s10 = sshll.u32 %s9895_s5, 4  ;;  %s10108_s10 = int_to_ptr.vmem [resolvable:$true] %s704_s10 }
  0x31   : > { %p10104_p6 = pnand %p8993_p4, %p11420_p1 }
  0x33   : > { %s11490_s2 = scalar_select %p10104_p6, 1, 0 }
  0x34   : > { %s9444_s25 = scalar_lea.hbm %s11491_s26, 256  ;;  %p10118_p8 = pneg %p10104_p6 }
  0x35   : > { %p9445_p7 = scmp.ne.s32.totalorder %s11491_s26, %s9444_s25  ;;  %p9451_p11 = scmp.lt.u32.totalorder %s9444_s25, %s11491_s26 }
  0x36   : > { %s11492_s28 = scalar_select %p10118_p8, 1, 0 }
  0x37   : > { %p9447_p9 = pnand %p10118_p8, %p9445_p7 }
  0x39   : > { %p9448_p10 = pneg %p9447_p9 }
  0x3b   : > { %p9453_p12 = pnand %p9451_p11, %p9448_p10 }
  0x3d   : > { %9456 = shalt.err (!%p9453_p12)
}
  0x3e   : > { %s9457_s24 = scalar_lea.vmem %s10097_s30, 256  ;;  %p9465_p4 = scmp.lt.s32.totalorder %s10097_s30, %s10097_s30 }
  0x3f   : > { %p9458_p13 = scmp.ne.s32.totalorder %s10097_s30, %s9457_s24  ;;  %p9466_p5 = scmp.lt.s32.totalorder %s9457_s24, %s9457_s24 }
  0x41   : > { %p9460_p0 = pnand %p9458_p13, %p10118_p8  ;;  %p9467_p7 = por %p9466_p5, %p9465_p4 }
  0x43   : > { %p9461_p2 = pneg %p9460_p0 }
  0x45   : > { %p9468_p9 = pnand %p9467_p7, %p9461_p2 }
  0x47   : > { %9471 = shalt.err (!%p9468_p9)
}
  0x48   : > { %s11422_s6 = smov 128   ;;  %s11428_s19 = smov 8  }
  0x49   : > { %8996 = dma.hbm_to_vmem [thread:$0]  (!%p10104_p6), %s11491_s26, 256, %s10097_s30, [#allocation9], %s11422_s6, %s11422_s6, %s11428_s19  }
  0x4a   : > { %s11493_s17 = sld [smem:[#allocation46_spill]] }
  0x50   : > { %s9472_s24 = scalar_lea.hbm %s11493_s17, 2048 }
  0x51   : > { %p9473_p5 = scmp.ne.s32.totalorder %s11493_s17, %s9472_s24  ;;  %p9479_p12 = scmp.lt.u32.totalorder %s9472_s24, %s11493_s17 }
  0x53   : > { %p9475_p10 = pnand %p9473_p5, %p10118_p8 }
  0x55   : > { %p9476_p11 = pneg %p9475_p10 }
  0x57   : > { %p9481_p13 = pnand %p9479_p12, %p9476_p11 }
  0x59   : > { %9484 = shalt.err (!%p9481_p13)
}
  0x5a   : > { %s9485_s30 = scalar_lea.vmem %s10108_s10, 2048  ;;  %p9493_p7 = scmp.lt.s32.totalorder %s10108_s10, %s10108_s10 }
  0x5b   : > { %p9486_p0 = scmp.ne.s32.totalorder %s10108_s10, %s9485_s30  ;;  %p9494_p9 = scmp.lt.s32.totalorder %s9485_s30, %s9485_s30 }
  0x5d   : > { %p9488_p2 = pnand %p9486_p0, %p10118_p8  ;;  %p9495_p5 = por %p9494_p9, %p9493_p7 }
  0x5f   : > { %p9489_p4 = pneg %p9488_p2 }
  0x61   : > { %p9496_p10 = pnand %p9495_p5, %p9489_p4 }
  0x63   : > { %9499 = shalt.err (!%p9496_p10)
}
  0x64   : > { %9002 = dma.hbm_to_vmem [thread:$0]  (!%p10104_p6), %s11493_s17, 2048, %s10108_s10, [#allocation12], %s11422_s6, %s11422_s6, %s11428_s19  }
  0x65   : > { %s9898_s22 = smov [#allocation14]   ;;  %s9899_s25 = smov [#allocation17]  }
  0x66   : > { %s739_s23 = sshll.u32 %s9898_s22, 4  ;;  %s771_s1 = sshll.u32 %s9899_s25, 4  ;;  %s740_s23 = int_to_ptr.vmem [resolvable:$true] %s739_s23  ;;  %s10168_s1 = int_to_ptr.vmem [resolvable:$true] %s771_s1 }
  0x67   : > { %s11494_s24 = sld [smem:[#allocation51_spill]] }
  0x6d   : > { %s9500_s30 = scalar_lea.hbm %s11494_s24, 1024 }
  0x6e   : > { %p9501_p11 = scmp.ne.s32.totalorder %s11494_s24, %s9500_s30  ;;  %p9507_p0 = scmp.lt.u32.totalorder %s9500_s30, %s11494_s24 }
  0x70   : > { %p9503_p12 = pnand %p9501_p11, %p10118_p8 }
  0x72   : > { %p9504_p13 = pneg %p9503_p12 }
  0x74   : > { %p9509_p2 = pnand %p9507_p0, %p9504_p13 }
  0x76   : > { %9512 = shalt.err (!%p9509_p2)
}
  0x77   : > { %s9513_s15 = scalar_lea.vmem %s740_s23, 1024  ;;  %p9521_p5 = scmp.lt.s32.totalorder %s740_s23, %s740_s23 }
  0x78   : > { %p9514_p4 = scmp.ne.s32.totalorder %s740_s23, %s9513_s15  ;;  %p9522_p10 = scmp.lt.s32.totalorder %s9513_s15, %s9513_s15 }
  0x7a   : > { %p9516_p7 = pnand %p9514_p4, %p10118_p8  ;;  %p9523_p1 = por %p9522_p10, %p9521_p5 }
  0x7c   : > { %p9517_p9 = pneg %p9516_p7 }
  0x7e   : > { %p9524_p3 = pnand %p9523_p1, %p9517_p9 }
  0x80   : > { %9527 = shalt.err (!%p9524_p3)
}
  0x81   : > { %s11424_s21 = smov 64   ;;  %s11426_s26 = smov 4  }
  0x82   : > { %9008 = dma.hbm_to_vmem [thread:$0]  (!%p10104_p6), %s11494_s24, 1024, %s740_s23, [#allocation15], %s11424_s21, %s11424_s21, %s11426_s26  }
  0x83   : > { %s11495_s14 = sld [smem:[#allocation55_spill]] }
  0x89   : > { %s9528_s30 = scalar_lea.hbm %s11495_s14, 1024 }
  0x8a   : > { %p9529_p1 = scmp.ne.s32.totalorder %s11495_s14, %s9528_s30  ;;  %p9535_p12 = scmp.lt.u32.totalorder %s9528_s30, %s11495_s14 }
  0x8c   : > { %p9531_p3 = pnand %p9529_p1, %p10118_p8 }
  0x8e   : > { %p9532_p11 = pneg %p9531_p3 }
  0x90   : > { %p9537_p13 = pnand %p9535_p12, %p9532_p11 }
  0x92   : > { %9540 = shalt.err (!%p9537_p13)
}
  0x93   : > { %s9541_s23 = scalar_lea.vmem %s10168_s1, 1024  ;;  %p9549_p7 = scmp.lt.s32.totalorder %s10168_s1, %s10168_s1 }
  0x94   : > { %p9542_p0 = scmp.ne.s32.totalorder %s10168_s1, %s9541_s23  ;;  %p9550_p9 = scmp.lt.s32.totalorder %s9541_s23, %s9541_s23 }
  0x96   : > { %p9544_p2 = pnand %p9542_p0, %p10118_p8  ;;  %p9551_p5 = por %p9550_p9, %p9549_p7 }
  0x98   : > { %p9545_p4 = pneg %p9544_p2 }
  0x9a   : > { %p9552_p10 = pnand %p9551_p5, %p9545_p4 }
  0x9c   : > { %9555 = shalt.err (!%p9552_p10)
}
  0x9d   : > { %9014 = dma.hbm_to_vmem [thread:$0]  (!%p10104_p6), %s11495_s14, 1024, %s10168_s1, [#allocation18], %s11424_s21, %s11424_s21, %s11426_s26  }
  0x9e   : > { %s8105_s25 = sadd.s32 4294967294, %s9892_s4   ;;  %s62_s9 = sadd.s32 1, %s9888_s8 }
  0x9f   : > { %p64_p1 = scmp.ge.s32.totalorder %s62_s9, 2  ;;  %s71_s5 = sadd.s32 1, %s9880_s7 }
  0xa0   : > { %p78_p3 = scmp.ne.s32.totalorder %s9880_s7, %s9876_s3  ;;  %p79_p11 = scmp.eq.s32.totalorder %s9892_s4, 0 }
  0xa1   : > { %s11569_s9 = smov (%p64_p1, %s62_s9), 0  ;;  %p84_p13 = scmp.ne.s32.totalorder %s9876_s3, %s9872_s27 }
  0xa2   : > { %11496 = sst [smem:[#allocation36_spill]] %s11569_s9  ;;  %p10225_p12 = por %p79_p11, %p78_p3 }
  0xa3   : > { %s66_s1 = ssub.s32 %s9888_s8, %s11569_s9  ;;  %p650_p0 = scmp.eq.s32.totalorder %s10088_s29, 1 }
  0xa4   : > { %p69_p2 = scmp.eq.s32.totalorder %s66_s1, 0  ;;  %p11498_p4 = scmp.eq.s32.totalorder %s10088_s29, 0 }
  0xa5   : > { %p10240_p9 = por %p650_p0, %p78_p3  ;;  %p656_p5 = scmp.eq.s32.totalorder %s8105_s25, 1 }
  0xa6   : > { %p10236_p7 = por %p11498_p4, %p84_p13  ;;  %p9044_p1 = scmp.lt.s32.totalorder %s9892_s4, 2 }
  0xa7   : > { %s11501_s10 = scalar_select %p10240_p9, 1, 0 }
  0xa8   : > { %s11499_s12 = scalar_select %p10236_p7, 1, 0 }
  0xa9   : > { %11502 = sst [smem:[#allocation38_spill]] %s11501_s10  ;;  %p10247_p10 = por %p656_p5, %p84_p13 }
  0xaa   : > { %11500 = sst [smem:[#allocation37_spill]] %s11499_s12  ;;  %s10253_s6 = sand.u32 1, %s9880_s7  }
  0xab   : > { %s10245_s15 = scalar_select %p69_p2, %s9880_s7, %s71_s5  }
  0xac   : > { %s11504_s23 = scalar_select %p10247_p10, 1, 0 }
  0xad   : > { %11503 = sst [smem:[#allocation39_spill]] %s10245_s15  ;;  %s11434_s22 = sshll.u32 %s9888_s8, 8 }
  0xae   : > { %11505 = sst [smem:[#allocation40_spill]] %s11504_s23  ;;  %s11433_s1 = sshll.u32 %s10253_s6, 4 }
  0xaf   : > { %p10259_p11 = pnand %p9044_p1, %p10225_p12  ;;  %s861_s25 = sand.u32 1, %s9892_s4  }
  0xb0   : > { %s11507_s19 = sld [smem:[#allocation42_spill]]  ;;  %s865_s17 = scalar_lea.vmem [#allocation5], %s11433_s1 }
  0xb1   : > { %s11506_s21 = scalar_select %p10259_p11, 1, 0 }
  0xb2   : > { %s872_s24 = sshll.u32 %s865_s17, 4  ;;  %s10275_s30 = scalar_lea.sflag [#allocation6], %s861_s25  ;;  %s10273_s24 = int_to_ptr.vmem [resolvable:$true] %s872_s24 }
  0xb3   : > { %p10281_p12 = pneg %p10259_p11 }
  0xb5   : > { %s11508_s15 = scalar_select %p10281_p12, 1, 0 }
  0xb6   : > { %s10269_s14 = scalar_lea.hbm %s11507_s19, %s11434_s22  ;;  %s9561_s1 = scalar_lea.hbm %s11507_s19, 512 }
  0xb7   : > { %s9556_s9 = scalar_lea.hbm %s10269_s14, 256  ;;  %p9562_p2 = scmp.lt.u32.totalorder %s10269_s14, %s11507_s19 }
  0xb8   : > { %p9557_p3 = scmp.ne.s32.totalorder %s10269_s14, %s9556_s9  ;;  %p9563_p4 = scmp.lt.u32.totalorder %s9561_s1, %s9556_s9 }
  0xb9   : > { %p9565_p1 = scmp.lt.u32.totalorder %s9556_s9, %s10269_s14 }
  0xba   : > { %p9559_p13 = pnand %p10281_p12, %p9557_p3  ;;  %p9564_p5 = por %p9563_p4, %p9562_p2 }
  0xbc   : > { %p9560_p0 = pneg %p9559_p13  ;;  %p9566_p10 = por %p9565_p1, %p9564_p5 }
  0xbe   : > { %p9567_p9 = pnand %p9566_p10, %p9560_p0 }
  0xc0   : > { %9570 = shalt.err (!%p9567_p9)
}
  0xc1   : > { %s9571_s25 = scalar_lea.vmem %s10273_s24, 256  ;;  %s9902_s26 = smov [#allocation5]  }
  0xc2   : > { %p9572_p3 = scmp.ne.s32.totalorder %s10273_s24, %s9571_s25  ;;  %s9576_s5 = sshll.u32 %s9902_s26, 4  ;;  %s9577_s5 = int_to_ptr.vmem [resolvable:$false] %s9576_s5 }
  0xc3   : > { %s9578_s22 = scalar_lea.vmem %s9577_s5, 512  ;;  %p9579_p6 = scmp.lt.s32.totalorder %s10273_s24, %s9577_s5 }
  0xc4   : > { %p9574_p13 = pnand %p9572_p3, %p10281_p12  ;;  %p9580_p8 = scmp.lt.s32.totalorder %s9578_s22, %s9571_s25 }
  0xc6   : > { %p9575_p7 = pneg %p9574_p13  ;;  %p9581_p2 = por %p9580_p8, %p9579_p6 }
  0xc8   : > { %p9582_p4 = pnand %p9581_p2, %p9575_p7 }
  0xca   : > { %9585 = shalt.err (!%p9582_p4)
}
  0xcb   : > { %s11509_s9 = smov 8   ;;  %s11510_s1 = smov 128  }
  0xcc   : > { %9027 = dma.hbm_to_vmem [thread:$0]  (!%p10259_p11), %s10269_s14, 256, %s10273_s24, %s10275_s30, %s11510_s1, %s11510_s1, %s11509_s9  }
  0xcd   : > { %s9903_s17 = smov [#allocation10]   ;;  %s9904_s26 = smov [#allocation13]  }
  0xce   : > { %s691_s19 = sshll.u32 %s9903_s17, 4  ;;  %s723_s7 = sshll.u32 %s9904_s26, 4  ;;  %s692_s19 = int_to_ptr.vmem [resolvable:$true] %s691_s19  ;;  %s724_s7 = int_to_ptr.vmem [resolvable:$true] %s723_s7 }
  0xcf   : > { %s11511_s22 = sld [smem:[#allocation45_spill]]  ;;  %p11512_p8 = scmp.ne.s32.totalorder %s11492_s28, 0 }
  0xd5   : > { %s9586_s4 = scalar_lea.hbm %s11511_s22, 1024 }
  0xd6   : > { %p9587_p6 = scmp.ne.s32.totalorder %s11511_s22, %s9586_s4  ;;  %p9593_p10 = scmp.lt.u32.totalorder %s9586_s4, %s11511_s22 }
  0xd8   : > { %p9589_p7 = pnand %p9587_p6, %p11512_p8 }
  0xda   : > { %p9590_p9 = pneg %p9589_p7 }
  0xdc   : > { %p9595_p0 = pnand %p9593_p10, %p9590_p9 }
  0xde   : > { %9598 = shalt.err (!%p9595_p0)
}
  0xdf   : > { %s9599_s14 = scalar_lea.vmem %s692_s19, 1024  ;;  %p9607_p13 = scmp.lt.s32.totalorder %s692_s19, %s692_s19 }
  0xe0   : > { %p9600_p5 = scmp.ne.s32.totalorder %s692_s19, %s9599_s14  ;;  %p9608_p2 = scmp.lt.s32.totalorder %s9599_s14, %s9599_s14 }
  0xe2   : > { %p9602_p1 = pnand %p9600_p5, %p11512_p8  ;;  %p9609_p4 = por %p9608_p2, %p9607_p13 }
  0xe4   : > { %p9603_p3 = pneg %p9602_p1 }
  0xe6   : > { %p9610_p11 = pnand %p9609_p4, %p9603_p3 }
  0xe8   : > { %9613 = shalt.err (!%p9610_p11)
}
  0xe9   : > { %p11513_p6 = scmp.ne.s32.totalorder %s11490_s2, 0  ;;  %s11514_s27 = smov 4  }
  0xea   : > { %s11515_s24 = smov 64   ;;  %s11516_s17 = sld [smem:[#allocation49_spill]] }
  0xeb   : > { %8999 = dma.hbm_to_vmem [thread:$0]  (!%p11513_p6), %s11511_s22, 1024, %s692_s19, [#allocation9], %s11515_s24, %s11515_s24, %s11514_s27  }
  0xf0   : > { %s9614_s26 = scalar_lea.hbm %s11516_s17, 1024 }
  0xf1   : > { %p9615_p7 = scmp.ne.s32.totalorder %s11516_s17, %s9614_s26  ;;  %p9621_p10 = scmp.lt.u32.totalorder %s9614_s26, %s11516_s17 }
  0xf3   : > { %p9617_p11 = pnand %p9615_p7, %p11512_p8 }
  0xf5   : > { %p9618_p9 = pneg %p9617_p11 }
  0xf7   : > { %p9623_p0 = pnand %p9621_p10, %p9618_p9 }
  0xf9   : > { %9626 = shalt.err (!%p9623_p0)
}
  0xfa   : > { %s9627_s20 = scalar_lea.vmem %s724_s7, 1024  ;;  %p9635_p13 = scmp.lt.s32.totalorder %s724_s7, %s724_s7 }
  0xfb   : > { %p9628_p5 = scmp.ne.s32.totalorder %s724_s7, %s9627_s20  ;;  %p9636_p2 = scmp.lt.s32.totalorder %s9627_s20, %s9627_s20 }
  0xfd   : > { %p9630_p1 = pnand %p9628_p5, %p11512_p8  ;;  %p9637_p4 = por %p9636_p2, %p9635_p13 }
  0xff   : > { %p9631_p3 = pneg %p9630_p1 }
 0x101   : > { %p9638_p12 = pnand %p9637_p4, %p9631_p3 }
 0x103   : > { %9641 = shalt.err (!%p9638_p12)
}
 0x104   : > { %9005 = dma.hbm_to_vmem [thread:$0]  (!%p11513_p6), %s11516_s17, 1024, %s724_s7, [#allocation12], %s11515_s24, %s11515_s24, %s11514_s27  }
 0x105   : > { %s9905_s4 = smov [#allocation16]   ;;  %s9906_s23 = smov [#allocation19]  }
 0x106   : > { %s752_s10 = sshll.u32 %s9905_s4, 4  ;;  %s787_s26 = sshll.u32 %s9906_s23, 4  ;;  %s753_s10 = int_to_ptr.vmem [resolvable:$true] %s752_s10  ;;  %s788_s26 = int_to_ptr.vmem [resolvable:$true] %s787_s26 }
 0x107   : > { %s11517_s11 = sld [smem:[#allocation52_spill]] }
 0x10d   : > { %s9642_s14 = scalar_lea.hbm %s11517_s11, 2048 }
 0x10e   : > { %p9643_p12 = scmp.ne.s32.totalorder %s11517_s11, %s9642_s14  ;;  %p9649_p9 = scmp.lt.u32.totalorder %s9642_s14, %s11517_s11 }
 0x110   : > { %p9645_p7 = pnand %p9643_p12, %p11512_p8 }
 0x112   : > { %p9646_p11 = pneg %p9645_p7 }
 0x114   : > { %p9651_p10 = pnand %p9649_p9, %p9646_p11 }
 0x116   : > { %9654 = shalt.err (!%p9651_p10)
}
 0x117   : > { %s9655_s7 = scalar_lea.vmem %s753_s10, 2048  ;;  %p9663_p3 = scmp.lt.s32.totalorder %s753_s10, %s753_s10 }
 0x118   : > { %p9656_p0 = scmp.ne.s32.totalorder %s753_s10, %s9655_s7  ;;  %p9664_p13 = scmp.lt.s32.totalorder %s9655_s7, %s9655_s7 }
 0x11a   : > { %p9658_p5 = pnand %p9656_p0, %p11512_p8  ;;  %p9665_p2 = por %p9664_p13, %p9663_p3 }
 0x11c   : > { %p9659_p1 = pneg %p9658_p5 }
 0x11e   : > { %p9666_p4 = pnand %p9665_p2, %p9659_p1 }
 0x120   : > { %9669 = shalt.err (!%p9666_p4)
}
 0x121   : > { %9011 = dma.hbm_to_vmem [thread:$0]  (!%p11513_p6), %s11517_s11, 2048, %s753_s10, [#allocation15], %s11510_s1, %s11510_s1, %s11509_s9  }
 0x122   : > { %s9670_s23 = scalar_lea.hbm %s11398_s16, 16384 }
 0x123   : > { %p9671_p12 = scmp.ne.s32.totalorder %s11398_s16, %s9670_s23  ;;  %p9677_p9 = scmp.lt.u32.totalorder %s9670_s23, %s11398_s16 }
 0x125   : > { %p9673_p7 = pnand %p9671_p12, %p11512_p8 }
 0x127   : > { %p9674_p11 = pneg %p9673_p7 }
 0x129   : > { %p9679_p10 = pnand %p9677_p9, %p9674_p11 }
 0x12b   : > { %9682 = shalt.err (!%p9679_p10)
}
 0x12c   : > { %s9683_s13 = scalar_lea.vmem %s788_s26, 16384  ;;  %p9691_p3 = scmp.lt.s32.totalorder %s788_s26, %s788_s26 }
 0x12d   : > { %p9684_p0 = scmp.ne.s32.totalorder %s788_s26, %s9683_s13  ;;  %p9692_p13 = scmp.lt.s32.totalorder %s9683_s13, %s9683_s13 }
 0x12f   : > { %p9686_p5 = pnand %p9684_p0, %p11512_p8  ;;  %p9693_p2 = por %p9692_p13, %p9691_p3 }
 0x131   : > { %p9687_p1 = pneg %p9686_p5 }
 0x133   : > { %p9694_p4 = pnand %p9693_p2, %p9687_p1 }
 0x135   : > { %9697 = shalt.err (!%p9694_p4)
}
 0x136   : > { %s9907_s10 = smov 1024   ;;  %s9908_s22 = smov [#allocation20]  }
 0x137   : > { %9017 = dma.hbm_to_vmem [thread:$0]  (!%p11513_p6), %s11398_s16, 16384, %s788_s26, [#allocation18], %s9907_s10, %s9907_s10, %s11515_s24  }
 0x138   : > { %s803_s19 = sshll.u32 %s9908_s22, 4  ;;  %s11518_s4 = sshll.u32 %s9888_s8, 8  ;;  %s804_s19 = int_to_ptr.vmem [resolvable:$true] %s803_s19 }
 0x139   : > { %s11519_s25 = sld [smem:[#allocation41_spill]]  ;;  %s9698_s11 = scalar_lea.hbm %s11400_s18, 16384 }
 0x13a   : > { %p9699_p12 = scmp.ne.s32.totalorder %s11400_s18, %s9698_s11  ;;  %p9705_p9 = scmp.lt.u32.totalorder %s9698_s11, %s11400_s18 }
 0x13c   : > { %p9701_p7 = pnand %p9699_p12, %p11512_p8 }
 0x13e   : > { %p9702_p11 = pneg %p9701_p7 }
 0x13f   : > { %s10395_s14 = scalar_lea.hbm %s11519_s25, %s11518_s4 }
 0x140   : > { %p9707_p10 = pnand %p9705_p9, %p9702_p11 }
 0x142   : > { %9710 = shalt.err (!%p9707_p10)
}
 0x143   : > { %s9711_s7 = scalar_lea.vmem %s804_s19, 16384  ;;  %p9719_p3 = scmp.lt.s32.totalorder %s804_s19, %s804_s19 }
 0x144   : > { %p9712_p0 = scmp.ne.s32.totalorder %s804_s19, %s9711_s7  ;;  %p9720_p13 = scmp.lt.s32.totalorder %s9711_s7, %s9711_s7 }
 0x146   : > { %p9714_p5 = pnand %p9712_p0, %p11512_p8  ;;  %p9721_p2 = por %p9720_p13, %p9719_p3 }
 0x148   : > { %p9715_p1 = pneg %p9714_p5 }
 0x14a   : > { %p9722_p4 = pnand %p9721_p2, %p9715_p1 }
 0x14c   : > { %9725 = shalt.err (!%p9722_p4)
}
 0x14d   : > { %9020 = dma.hbm_to_vmem [thread:$0]  (!%p11513_p6), %s11400_s18, 16384, %s804_s19, [#allocation21], %s11515_s24, %s11515_s24, %s11514_s27  }
 0x14e   : > { %s11520_s28 = sshll.u32 %s10253_s6, 4  ;;  %s8123_s22 = sshll.u32 %s10253_s6, 3 }
 0x14f   : > { %s842_s17 = scalar_lea.vmem [#allocation2], %s11520_s28  ;;  %s839_s2 = scalar_lea.sflag [#allocation3], %s10253_s6 }
 0x150   : > { %s851_s29 = sshll.u32 %s842_s17, 4  ;;  %s9726_s4 = scalar_lea.hbm %s10395_s14, 256  ;;  %s10421_s29 = int_to_ptr.vmem [resolvable:$true] %s851_s29 }
 0x151   : > { %p9727_p8 = scmp.ne.s32.totalorder %s10395_s14, %s9726_s4  ;;  %p11521_p12 = scmp.ne.s32.totalorder %s11508_s15, 0 }
 0x152   : > { %s9731_s20 = scalar_lea.hbm %s11519_s25, 512  ;;  %p9732_p6 = scmp.lt.u32.totalorder %s10395_s14, %s11519_s25 }
 0x153   : > { %p9729_p7 = pnand %p9727_p8, %p11521_p12  ;;  %p9733_p9 = scmp.lt.u32.totalorder %s9731_s20, %s9726_s4 }
 0x154   : > { %p9735_p0 = scmp.lt.u32.totalorder %s9726_s4, %s10395_s14 }
 0x155   : > { %p9730_p11 = pneg %p9729_p7  ;;  %p9734_p10 = por %p9733_p9, %p9732_p6 }
 0x157   : > { %p9736_p5 = por %p9735_p0, %p9734_p10 }
 0x159   : > { %p9737_p1 = pnand %p9736_p5, %p9730_p11 }
 0x15b   : > { %9740 = shalt.err (!%p9737_p1)
}
 0x15c   : > { %s9741_s19 = scalar_lea.vmem %s10421_s29, 256  ;;  %s9909_s10 = smov [#allocation2]  }
 0x15d   : > { %p9742_p3 = scmp.ne.s32.totalorder %s10421_s29, %s9741_s19  ;;  %s9746_s7 = sshll.u32 %s9909_s10, 4  ;;  %s9747_s7 = int_to_ptr.vmem [resolvable:$false] %s9746_s7 }
 0x15e   : > { %s9748_s12 = scalar_lea.vmem %s9747_s7, 512  ;;  %p9749_p4 = scmp.lt.s32.totalorder %s10421_s29, %s9747_s7 }
 0x15f   : > { %p9744_p13 = pnand %p9742_p3, %p11521_p12  ;;  %p9750_p8 = scmp.lt.s32.totalorder %s9748_s12, %s9741_s19 }
 0x161   : > { %p9745_p2 = pneg %p9744_p13  ;;  %p9751_p7 = por %p9750_p8, %p9749_p4 }
 0x163   : > { %p9752_p6 = pnand %p9751_p7, %p9745_p2 }
 0x165   : > { %9755 = shalt.err (!%p9752_p6)
}
 0x166   : > { %p11522_p11 = scmp.ne.s32.totalorder %s11506_s21, 0  ;;  %s8527_s11 = sshll.u32 %s9888_s8, 7 }
 0x167   : > { %s886_s28 = scalar_lea.vmem [#allocation7], %s8123_s22  ;;  %s11523_s5 = sld [smem:[#allocation43_spill]] }
 0x168   : > { %9024 = dma.hbm_to_vmem [thread:$0]  (!%p11522_p11), %s10395_s14, 256, %s10421_s29, %s839_s2, %s11510_s1, %s11510_s1, %s11509_s9  }
 0x169   : > { %s893_s17 = sshll.u32 %s886_s28, 4  ;;  %s10458_s17 = int_to_ptr.vmem [resolvable:$true] %s893_s17 }
 0x16d   : > { %s10456_s20 = scalar_lea.hbm %s11523_s5, %s8527_s11  ;;  %s9761_s1 = scalar_lea.hbm %s11523_s5, 256 }
 0x16e   : > { %s9756_s13 = scalar_lea.hbm %s10456_s20, 128  ;;  %p9762_p5 = scmp.lt.u32.totalorder %s10456_s20, %s11523_s5 }
 0x16f   : > { %p9757_p9 = scmp.ne.s32.totalorder %s10456_s20, %s9756_s13  ;;  %p9763_p1 = scmp.lt.u32.totalorder %s9761_s1, %s9756_s13 }
 0x170   : > { %p9765_p13 = scmp.lt.u32.totalorder %s9756_s13, %s10456_s20 }
 0x171   : > { %p9759_p10 = pnand %p9757_p9, %p11521_p12  ;;  %p9764_p3 = por %p9763_p1, %p9762_p5 }
 0x173   : > { %p9760_p0 = pneg %p9759_p10  ;;  %p9766_p2 = por %p9765_p13, %p9764_p3 }
 0x175   : > { %p9767_p4 = pnand %p9766_p2, %p9760_p0 }
 0x177   : > { %9770 = shalt.err (!%p9767_p4)
}
 0x178   : > { %s9771_s22 = scalar_lea.vmem %s10458_s17, 128  ;;  %s9910_s2 = smov [#allocation7]  }
 0x179   : > { %p9772_p8 = scmp.ne.s32.totalorder %s10458_s17, %s9771_s22  ;;  %s9776_s26 = sshll.u32 %s9910_s2, 4  ;;  %s9777_s26 = int_to_ptr.vmem [resolvable:$false] %s9776_s26 }
 0x17a   : > { %s9778_s19 = scalar_lea.vmem %s9777_s26, 256  ;;  %p9779_p9 = scmp.lt.s32.totalorder %s10458_s17, %s9777_s26 }
 0x17b   : > { %p9774_p7 = pnand %p9772_p8, %p11521_p12  ;;  %p9780_p10 = scmp.lt.s32.totalorder %s9778_s19, %s9771_s22 }
 0x17d   : > { %p9775_p6 = pneg %p9774_p7  ;;  %p9781_p5 = por %p9780_p10, %p9779_p9 }
 0x17f   : > { %p9782_p1 = pnand %p9781_p5, %p9775_p6 }
 0x181   : > { %9785 = shalt.err (!%p9782_p1)
}
 0x182   : > { %9030 = dma.hbm_to_vmem [thread:$0]  (!%p11522_p11), %s10456_s20, 128, %s10458_s17, %s10275_s30, %s11515_s24, %s11515_s24, %s11514_s27  }
 0x183   : > { %p11524_p12 = scmp.ne.s32.totalorder %s11489_s0, 0 }
 0x184   : > { %s11525_s15 = sld [smem:[#allocation37_spill]] (!%p11524_p12)  ;;  %s10488_s10 = sand.u32 (!%p11524_p12), 1, %s9876_s3  }
 0x185   : > { %905 = sbr.rel (%p11524_p12) target bundleno = 4994 (0x1382), region = 124  ;;  %s10491_s7 = sshll.u32 (!%p11524_p12), %s10488_s10, 4 }
 0x186   : > { %s908_s21 = scalar_lea.sflag (!%p11524_p12), [#allocation3], %s10488_s10  ;;  %s10495_s12 = scalar_lea.vmem (!%p11524_p12), [#allocation2], %s10491_s7 }
 0x18a   : > { %p11526_p0 = scmp.ne.s32.totalorder (!%p11524_p12), %s11525_s15, 0 }
 0x18c   : > { %9839 = dma.done.wait (%p11526_p0), %s908_s21, 256  }
 0x18d   : > { %9841 = vsyncadd (%p11526_p0), %s908_s21, 4294967040  ;;  %s11527_s30 = sld [smem:[#allocation35_spill]]  ;;  %s920_s24 = scalar_lea.vmem [#allocation5], %s10491_s7 }
 0x193   : > { %s916_s0 = sand.u32 1, %s11527_s30  }
 0x194   : > { %s917_s27 = scalar_lea.sflag [#allocation6], %s916_s0 }
 0x195   : > { %9843 = dma.done.wait (%p11526_p0), %s917_s27, 384  }
 0x196   : > { %9845 = vsyncadd (%p11526_p0), %s917_s27, 4294966912  ;;  %s8129_s11 = sshll.u32 %s10488_s10, 3  ;;  %p11528_p11 = scmp.eq.s32.totalorder %s11527_s30, 0 }
 0x197   : > { %s10508_s28 = scalar_lea.vmem [#allocation7], %s8129_s11 }
 0x198   : > { %9847 = dma.done.wait (%p11528_p11), [#allocation9], 1280   ;;  %p11529_p3 = pmov %p11528_p11 }
 0x19a   : > { %9849 = vsyncadd (%p11529_p3), [#allocation9], 4294966016  ;;  %p11530_p13 = pmov %p11529_p3 }
 0x19b   : > { %p11531_p2 = pmov %p11529_p3 }
 0x19c   : > { %9851 = dma.done.wait (%p11530_p13), [#allocation12], 3072  }
 0x19d   : > { %9853 = vsyncadd (%p11531_p2), [#allocation12], 4294964224  ;;  %p11532_p4 = pmov %p11531_p2 }
 0x19e   : > { %p11533_p8 = pmov %p11531_p2 }
 0x19f   : > { %9855 = dma.done.wait (%p11532_p4), [#allocation15], 3072  }
 0x1a0   : > { %9857 = vsyncadd (%p11533_p8), [#allocation15], 4294964224  ;;  %p11534_p7 = pmov %p11531_p2 }
 0x1a1   : > { %p11535_p6 = pmov %p11531_p2 }
 0x1a2   : > { %9859 = dma.done.wait (%p11534_p7), [#allocation18], 17408  }
 0x1a3   : > { %9861 = vsyncadd (%p11535_p6), [#allocation18], 4294949888  ;;  %p11536_p9 = pmov %p11531_p2 }
 0x1a4   : > { %p11537_p10 = pmov %p11531_p2 }
 0x1a5   : > { %9863 = dma.done.wait (%p11536_p9), [#allocation21], 16384  }
 0x1a6   : > { %9865 = vsyncadd (%p11537_p10), [#allocation21], 4294950912  ;;  %v9911_v0 = vmov 0.0   ;;  %vm9912_vm0 = vmmov 0   ;;  %v9913_v1 = vmov 0   ;;  %v9157_v2 = vld [vmem:[#allocation10] sm:$0xff]   ;;  %v1205_v32 = vlaneseq }
 0x1a7   : > { %8773 = vmatprep.subr.bf16.mxu0 %v9911_v0  ;;  %8789 = vmatprep.mubr.msk.bf16.mxu0 %vm9912_vm0, %v9911_v0  ;;  %v9158_v3 = vld [vmem:[#allocation11 + $0x4] ss:$8 sps:$4 sm:$0xff]   ;;  %v9160_v4 = vld [vmem:[#allocation11] ss:$8 sps:$4 sm:$0xff]   ;;  %v9162_v6 = vld [vmem:[#allocation11 + $0x14] ss:$8 sps:$4 sm:$0xff]  }
 0x1a8   : > { %1327 = vmatprep.mubr.bf16.mxu1 %v9913_v1  ;;  %8774 = vmatpush3.bf16.msra.mxu0 %v9157_v2  ;;  %v9161_v5 = vld [vmem:[#allocation10 + $0x8] sm:$0xff]   ;;  %v9164_v7 = vld [vmem:[#allocation11 + $0x10] ss:$8 sps:$4 sm:$0xff]   ;;  %v9170_v11 = vld [vmem:[#allocation11 + $0x34] ss:$8 sps:$4 sm:$0xff]   ;;  %v10553_v33 = vshrl.u32 %v1205_v32, 7 }
 0x1a9   : > { %1295 = vmatprep.subr.bf16.mxu1 %v9158_v3  ;;  %8775 = vmatprep.subr.bf16.mxu0 %v9911_v0  ;;  %v9165_v8 = vld [vmem:[#allocation10 + $0x10] sm:$0xff]   ;;  %v9166_v9 = vld [vmem:[#allocation11 + $0x24] ss:$8 sps:$4 sm:$0xff]   ;;  %v9168_v10 = vld [vmem:[#allocation11 + $0x20] ss:$8 sps:$4 sm:$0xff]   ;;  %s11538_s23 = sld [smem:[#allocation48_spill]] }
 0x1aa   : > { %1296 = vmatpush1.bf16.msra.mxu1 %v9160_v4  ;;  %v9169_v12 = vld [vmem:[#allocation10 + $0x18] sm:$0xff]   ;;  %v9174_v14 = vld [vmem:[#allocation11 + $0x44] ss:$8 sps:$4 sm:$0xff]   ;;  %v9176_v16 = vld [vmem:[#allocation11 + $0x40] ss:$8 sps:$4 sm:$0xff]   ;;  %v10556_v34 = vsub.s32 0, %v10553_v33 }
 0x1ab   : > { %1297 = vmatprep.subr.bf16.mxu1 %v9162_v6  ;;  %v9172_v13 = vld [vmem:[#allocation11 + $0x30] ss:$8 sps:$4 sm:$0xff]   ;;  %v9173_v15 = vld [vmem:[#allocation10 + $0x20] sm:$0xff]   ;;  %v9178_v17 = vld [vmem:[#allocation11 + $0x54] ss:$8 sps:$4 sm:$0xff]   ;;  %v10562_v36 = vsub.s32 1, %v10553_v33 }
 0x1ac   : > { %8776 = vmatpush3.bf16.msra.mxu0 %v9161_v5  ;;  %v9177_v18 = vld [vmem:[#allocation10 + $0x28] sm:$0xff]   ;;  %v9180_v19 = vld [vmem:[#allocation11 + $0x50] ss:$8 sps:$4 sm:$0xff]   ;;  %v9186_v23 = vld [vmem:[#allocation11 + $0x74] ss:$8 sps:$4 sm:$0xff]   ;;  %s11539_s9 = sld [smem:[#allocation47_spill]] }
 0x1ad   : > { %8777 = vmatprep.subr.bf16.mxu0 %v9911_v0  ;;  %v9181_v20 = vld [vmem:[#allocation10 + $0x30] sm:$0xff]   ;;  %v9182_v21 = vld [vmem:[#allocation11 + $0x64] ss:$8 sps:$4 sm:$0xff]   ;;  %v9184_v22 = vld [vmem:[#allocation11 + $0x60] ss:$8 sps:$4 sm:$0xff]   ;;  %s9914_s6 = smov 96  }
 0x1ae   : > { %1298 = vmatpush1.bf16.msra.mxu1 %v9164_v7  ;;  %v9185_v24 = vld [vmem:[#allocation10 + $0x38] sm:$0xff]   ;;  %v1048_v25 = vld [vmem:[%s10495_s12] sm:$0xff]  ;;  %s9915_s1 = smov 64   ;;  %s9916_s14 = smov 32   ;;  %v9917_v54 = vmov 1983009808  }
 0x1af   : > { %1299 = vmatprep.subr.bf16.mxu1 %v9166_v9  ;;  %v1049_v26 = vld [vmem:[%s10495_s12 + $0x8] sm:$0xff]  ;;  %v1050_v28 = vld [vmem:[%s920_s24] sm:$0xff]  ;;  %v1361_v55 = vunpack.c.l.s4 %v9917_v54  ;;  %v9918_v57 = vmov 1934713408   ;;  %vm2222_vm1 = vcmask 261120   ;;  %vm2427_vm2 = vcmask 130048  }
 0x1b0   : > { %8778 = vmatpush3.bf16.msra.mxu0 %v9165_v8  ;;  %v9188_v27 = vld [vmem:[#allocation11 + $0x70] ss:$8 sps:$4 sm:$0xff]   ;;  %v1107_v30 = vpack.c.bf16 %v1049_v26, %v1048_v25  ;;  %v1089_v35 = vld [vmem:[%s11538_s23] sm:$0x3]  ;;  %v1393_v58 = vunpack.c.l.s4 %v9918_v57  ;;  %vm2998_vm3 = vcmask 523264   ;;  %vm3001_vm4 = vcmask 785408  }
 0x1b1   : > { %8779 = vmatprep.subr.bf16.mxu0 %v9911_v0  ;;  %v1051_v29 = vld [vmem:[%s920_s24 + $0x8] sm:$0xff]  ;;  %v1208_v38 = vrot.slane %v1089_v35, %v10556_v34  ;;  %v1212_v40 = vrot.slane %v1089_v35, %v10562_v36  ;;  %v1362_v60 = vunpack.c.0.s8 %v1361_v55  ;;  %s11540_s2 = sld [smem:[#allocation50_spill]]  ;;  %s11541_s15 = sld [smem:[#allocation54_spill]] }
 0x1b2   : > { %1300 = vmatpush1.bf16.msra.mxu1 %v9168_v10  ;;  %v1203_v31 = vpack.c.bf16 %v1051_v29, %v1050_v28  ;;  %v8140_v37 = vld [vmem:[%s11539_s9] ss:$0 sm:$0xff]  ;;  %v1394_v62 = vunpack.c.0.s8 %v1393_v58  ;;  %s11542_s30 = sld [smem:[#allocation59_spill]]  ;;  %s11543_s24 = sld [smem:[#allocation60_spill]] }
 0x1b3   : > { %1301 = vmatprep.subr.bf16.mxu1 %v9170_v11  ;;  %v10600_v2 = vsub.s32 %v1362_v60, %v10553_v33  ;;  %s11544_s17 = sld [smem:[#allocation53_spill]]  ;;  %s11545_s20 = sld [smem:[#allocation56_spill]] }
 0x1b4   : > { %8780 = vmatpush3.bf16.msra.mxu0 %v9169_v12  ;;  %v10603_v8 = vsub.s32 %v1394_v62, %v10553_v33  ;;  %s11547_s29 = sld [smem:[#allocation62_spill]]  ;;  %s11548_s26 = sld [smem:[#allocation57_spill]] }
 0x1b5   : > { %8781 = vmatprep.subr.bf16.mxu0 %v9911_v0  ;;  %s11550_s0 = sld [smem:[#allocation33_spill]]  ;;  %s11551_s11 = sld [smem:[#allocation63_spill]] }
 0x1b6   : > { %1302 = vmatpush1.bf16.msra.mxu1 %v9172_v13  ;;  %s11552_s4 = sld [smem:[#allocation64_spill]]  ;;  %s11553_s23 = sld [smem:[#allocation38_spill]] }
 0x1b7   : > { %1303 = vmatprep.subr.bf16.mxu1 %v9174_v14  ;;  %s1043_s13 = scalar_lea.vmem [#allocation22], %s10491_s7  ;;  %s7871_s22 = scalar_lea.sflag [#allocation4], %s10488_s10 }
 0x1b8   : > { %8782 = vmatpush3.bf16.msra.mxu0 %v9173_v15  ;;  %s7886_s9 = sshll.u32 %s1043_s13, 4  ;;  %s9919_s7 = smov [#allocation22]   ;;  %s11333_s9 = int_to_ptr.vmem [resolvable:$true] %s7886_s9 }
 0x1b9   : > { %8783 = vmatprep.subr.bf16.mxu0 %v9911_v0  ;;  %s9790_s19 = sshll.u32 %s9919_s7, 4  ;;  %s9791_s19 = int_to_ptr.vmem [resolvable:$false] %s9790_s19 }
 0x1ba   : > { %1304 = vmatpush1.bf16.msra.mxu1 %v9176_v16  ;;  %p9793_p11 = scmp.lt.s32.totalorder %s11333_s9, %s9791_s19 }
 0x1bb   : > { %1305 = vmatprep.subr.bf16.mxu1 %v9178_v17 }
 0x1bc   : > { %8784 = vmatpush3.bf16.msra.mxu0 %v9177_v18  ;;  %p11555_p1 = scmp.ne.s32.totalorder %s11553_s23, 0 }
 0x1bd   : > { %8785 = vmatprep.subr.bf16.mxu0 %v9911_v0 }
 0x1be   : > { %1306 = vmatpush1.bf16.msra.mxu1 %v9180_v19 }
 0x1bf   : > { %1307 = vmatprep.subr.bf16.mxu1 %v9182_v21 }
 0x1c0   : > { %8786 = vmatpush3.bf16.msra.mxu0 %v9181_v20 }
 0x1c1   : > { %8787 = vmatprep.subr.bf16.mxu0 %v9911_v0 }
 0x1c2   : > { %1308 = vmatpush1.bf16.msra.mxu1 %v9184_v22 }
 0x1c3   : > { %1309 = vmatprep.subr.bf16.mxu1 %v9186_v23 }
 0x1c4   : > { %8788 = vmatpush3.bf16.msra.mxu0 %v9185_v24 }
 0x1c5   : > { %8817 = vmatprep.subr.bf16.mxu0 %v9911_v0 }
 0x1c6   : > { %1310 = vmatpush1.bf16.msra.mxu1 %v9188_v27 }
 0x1c7   : > { %8790 = vmatmul.mubr.bf16.vlgmr.msra.gmra.mrb[0].mxu0 %v1107_v30  ;;  %8793 = vmatprep.subr.bf16.mxu1 %v9911_v0 }
 0x1c8   : > { %8819 = vmatprep.mubr.msk.bf16.mxu0 %vm9912_vm0, %v9911_v0 }
 0x1c9   : > { %1328 = vmatmul.mubr.bf16.vlgmr.msra.gmra.mrb[0].mxu1 %v1203_v31 }
 0x1ca   : > { %8795 = vmatprep.mubr.msk.bf16.mxu1 %vm9912_vm0, %v9911_v0 }
 0x29a   : > { %v1196_v39 = vpop.f32.mrb[0].mxu0 }
 0x29b   : > { %v10569_v41 = vadd.f32 %v8140_v37, %v1196_v39  ;;  %v8791_v42 = vpop.f32.mrb[1].mxu0 }
 0x29c   : > { %v1329_v43 = vpop.f32.mrb[0].mxu1  ;;  %v1199_v44 = vpop.f32.mrb[2].mxu0 }
 0x29d   : > { %v1330_v45 = vadd.f32 %v1329_v43, %v1208_v38  ;;  %v1331_v46 = vpop.f32.mrb[1].mxu1  ;;  %1340 = vrot.lane.b32.xlu0 %v10569_v41, %s9914_s6  ;;  %v8792_v47 = vpop.f32.mrb[3].mxu0  ;;  %v10578_v52 = vadd.f32 %v8140_v37, %v1199_v44 }
 0x29e   : > { %v10573_v48 = vadd.f32 %v1331_v46, %v1212_v40  ;;  %v1333_v49 = vpop.f32.mrb[2].mxu1 }
 0x29f   : > { %v1335_v50 = vpop.f32.mrb[3].mxu1  ;;  %1638 = vrot.lane.b32.xlu1 %v1330_v45, %s9915_s1  ;;  %v1334_v53 = vadd.f32 %v1333_v49, %v1208_v38 }
 0x2a0   : > { %v10576_v51 = vadd.f32 %v1335_v50, %v1212_v40 }
 0x2a1   : > { %1632 = vrot.lane.b32.xlu0 %v1330_v45, %s9914_s6 }
 0x2a3   : > { %1342 = vrot.lane.b32.xlu1 %v10578_v52, %s9914_s6 }
 0x2a5   : > { %1644 = vrot.lane.b32.xlu0 %v1330_v45, %s9916_s14 }
 0x2a7   : > { %1640 = vrot.lane.b32.xlu1 %v1334_v53, %s9915_s1 }
 0x2a9   : > { %1634 = vrot.lane.b32.xlu0 %v1334_v53, %s9914_s6 }
 0x2ab   : > { %1646 = vrot.lane.b32.xlu1 %v1334_v53, %s9916_s14 }
 0x2ad   : > { %1346 = vrot.lane.b32.xlu0 %v10569_v41, %s9915_s1 }
 0x2af   : > { %1348 = vrot.lane.b32.xlu1 %v10578_v52, %s9915_s1 }
 0x2b1   : > { %1352 = vrot.lane.b32.xlu0 %v10569_v41, %s9916_s14 }
 0x2b3   : > { %1354 = vrot.lane.b32.xlu1 %v10578_v52, %s9916_s14 }
 0x30f   : > { %v10595_v56 = vpop.permute.xlu0 %1340 }
 0x311   : > { %v1639_v59 = vpop.permute.xlu1 %1638 }
 0x312   : > { %v1650_v3 = vcombine.low %v1330_v45, %v1639_v59  ;;  %v1651_v4 = vcombine.high %v1330_v45, %v1639_v59 }
 0x313   : > { %v1633_v61 = vpop.permute.xlu0 %1632 }
 0x314   : > { %v1658_v10 = vrot.slane %v1650_v3, %v10600_v2  ;;  %v1665_v11 = vrot.slane %v1651_v4, %v10600_v2 }
 0x315   : > { %v10597_v63 = vpop.permute.xlu1 %1342 }
 0x317   : > { %v1645_v5 = vpop.permute.xlu0 %1644 }
 0x318   : > { %v1666_v6 = vcombine.low %v1633_v61, %v1645_v5  ;;  %v1667_v7 = vcombine.high %v1633_v61, %v1645_v5 }
 0x319   : > { %v1641_v9 = vpop.permute.xlu1 %1640 }
 0x31a   : > { %v1674_v12 = vrot.slane %v1666_v6, %v10600_v2  ;;  %v1681_v13 = vrot.slane %v1667_v7, %v10600_v2  ;;  %v1718_v19 = vcombine.low %v1334_v53, %v1641_v9  ;;  %v1719_v20 = vcombine.high %v1334_v53, %v1641_v9 }
 0x31b   : > { %v1635_v14 = vpop.permute.xlu0 %1634 }
 0x31c   : > { %v1682_v15 = vcombine.low %v1658_v10, %v1674_v12  ;;  %v1683_v16 = vcombine.high %v1658_v10, %v1674_v12  ;;  %v1698_v17 = vcombine.low %v1665_v11, %v1681_v13  ;;  %v1699_v18 = vcombine.high %v1665_v11, %v1681_v13 }
 0x31d   : > { %v1647_v21 = vpop.permute.xlu1 %1646  ;;  %v1726_v31 = vrot.slane %v1718_v19, %v10600_v2  ;;  %v1733_v32 = vrot.slane %v1719_v20, %v10600_v2 }
 0x31e   : > { %v1690_v22 = vrot.slane %v1682_v15, %v10603_v8  ;;  %v1697_v23 = vrot.slane %v1683_v16, %v10603_v8  ;;  %v1706_v24 = vrot.slane %v1698_v17, %v10603_v8  ;;  %v1713_v25 = vrot.slane %v1699_v18, %v10603_v8 }
 0x31f   : > { %v1734_v26 = vcombine.low %v1635_v14, %v1647_v21  ;;  %v1735_v27 = vcombine.high %v1635_v14, %v1647_v21  ;;  %v1347_v28 = vpop.permute.xlu0 %1346 }
 0x320   : > { %v1786_v29 = vcombine.low %v1690_v22, %v1697_v23  ;;  %v8169_v30 = vcombine.high %v1690_v22, %v1697_v23  ;;  %v1802_v39 = vcombine.low %v1706_v24, %v1713_v25  ;;  %v8170_v40 = vcombine.high %v1706_v24, %v1713_v25 }
 0x321   : > { %v1742_v35 = vrot.slane %v1734_v26, %v10600_v2  ;;  %v1749_v37 = vrot.slane %v1735_v27, %v10600_v2  ;;  %v1349_v38 = vpop.permute.xlu1 %1348  ;;  %v1358_v42 = vcombine.low %v10569_v41, %v1347_v28  ;;  %v1359_v43 = vcombine.high %v10569_v41, %v1347_v28 }
 0x322   : > { %v10620_v50 = vrot.slane %v1786_v29, %v10600_v2  ;;  %v10623_v53 = vrot.slane %v8169_v30, %v10600_v2  ;;  %v1426_v54 = vcombine.low %v10578_v52, %v1349_v38  ;;  %v1427_v55 = vcombine.high %v10578_v52, %v1349_v38 }
 0x323   : > { %v1750_v44 = vcombine.low %v1726_v31, %v1742_v35  ;;  %v1751_v45 = vcombine.high %v1726_v31, %v1742_v35  ;;  %v1766_v46 = vcombine.low %v1733_v32, %v1749_v37  ;;  %v1767_v47 = vcombine.high %v1733_v32, %v1749_v37  ;;  %v1353_v49 = vpop.permute.xlu0 %1352 }
 0x324   : > { %v10632_v61 = vrot.slane %v1802_v39, %v10600_v2  ;;  %v10635_v62 = vrot.slane %v8170_v40, %v10600_v2  ;;  %v1374_v3 = vcombine.low %v10595_v56, %v1353_v49  ;;  %v1375_v4 = vcombine.high %v10595_v56, %v1353_v49 }
 0x325   : > { %v1758_v57 = vrot.slane %v1750_v44, %v10603_v8  ;;  %v1765_v58 = vrot.slane %v1751_v45, %v10603_v8  ;;  %v1774_v41 = vrot.slane %v1766_v46, %v10603_v8  ;;  %v1781_v59 = vrot.slane %v1767_v47, %v10603_v8  ;;  %v1355_v60 = vpop.permute.xlu1 %1354 }
 0x326   : > { %v1366_v6 = vrot.slane %v1358_v42, %v10600_v2  ;;  %v1373_v7 = vrot.slane %v1359_v43, %v10600_v2  ;;  %v1382_v9 = vrot.slane %v1374_v3, %v10600_v2  ;;  %v1389_v10 = vrot.slane %v1375_v4, %v10600_v2 }
 0x327   : > { %v1854_v52 = vcombine.low %v1758_v57, %v1765_v58  ;;  %v8171_v5 = vcombine.high %v1758_v57, %v1765_v58  ;;  %v1442_v11 = vcombine.low %v10597_v63, %v1355_v60  ;;  %v1443_v12 = vcombine.high %v10597_v63, %v1355_v60 }
 0x328   : > { %v1870_v13 = vcombine.low %v1774_v41, %v1781_v59  ;;  %v8172_v14 = vcombine.high %v1774_v41, %v1781_v59  ;;  %v1434_v15 = vrot.slane %v1426_v54, %v10600_v2  ;;  %v1441_v56 = vrot.slane %v1427_v55, %v10600_v2 }
 0x329   : > { %v1390_v16 = vcombine.low %v1366_v6, %v1382_v9  ;;  %v1391_v17 = vcombine.high %v1366_v6, %v1382_v9  ;;  %v1406_v18 = vcombine.low %v1373_v7, %v1389_v10  ;;  %v1407_v19 = vcombine.high %v1373_v7, %v1389_v10 }
 0x32a   : > { %v10648_v20 = vrot.slane %v1854_v52, %v10600_v2  ;;  %v10651_v21 = vrot.slane %v8171_v5, %v10600_v2  ;;  %v1450_v22 = vrot.slane %v1442_v11, %v10600_v2  ;;  %v1457_v63 = vrot.slane %v1443_v12, %v10600_v2 }
 0x32b   : > { %v1398_v23 = vrot.slane %v1390_v16, %v10603_v8  ;;  %v1405_v24 = vrot.slane %v1391_v17, %v10603_v8  ;;  %v1414_v25 = vrot.slane %v1406_v18, %v10603_v8  ;;  %v1421_v26 = vrot.slane %v1407_v19, %v10603_v8 }
 0x32c   : > { %v1458_v27 = vcombine.low %v1434_v15, %v1450_v22  ;;  %v1459_v28 = vcombine.high %v1434_v15, %v1450_v22  ;;  %v1474_v29 = vcombine.low %v1441_v56, %v1457_v63  ;;  %v1475_v30 = vcombine.high %v1441_v56, %v1457_v63 }
 0x32d   : > { %v1494_v31 = vcombine.low %v1398_v23, %v1405_v24  ;;  %v8165_v32 = vcombine.high %v1398_v23, %v1405_v24  ;;  %v1510_v35 = vcombine.low %v1414_v25, %v1421_v26  ;;  %v8166_v37 = vcombine.high %v1414_v25, %v1421_v26 }
 0x32e   : > { %v1466_v38 = vrot.slane %v1458_v27, %v10603_v8  ;;  %v1473_v39 = vrot.slane %v1459_v28, %v10603_v8  ;;  %v1482_v40 = vrot.slane %v1474_v29, %v10603_v8  ;;  %v1489_v42 = vrot.slane %v1475_v30, %v10603_v8 }
 0x32f   : > { %v10664_v43 = vrot.slane %v1494_v31, %v10600_v2  ;;  %v10667_v44 = vrot.slane %v8165_v32, %v10600_v2  ;;  %v10670_v45 = vrot.slane %v1510_v35, %v10600_v2  ;;  %v10673_v46 = vrot.slane %v8166_v37, %v10600_v2 }
 0x330   : > { %v1562_v47 = vcombine.low %v1466_v38, %v1473_v39  ;;  %v8167_v49 = vcombine.high %v1466_v38, %v1473_v39  ;;  %v1578_v54 = vcombine.low %v1482_v40, %v1489_v42  ;;  %v8168_v55 = vcombine.high %v1482_v40, %v1489_v42 }
 0x331   : > { %v1877_v57 = vrot.slane %v1870_v13, %v10600_v2  ;;  %v1885_v58 = vrot.slane %v8172_v14, %v10600_v2  ;;  %v1818_v41 = vcombine.low %v10620_v50, %v10623_v53  ;;  %v1834_v59 = vcombine.low %v10632_v61, %v10635_v62 }
 0x332   : > { %v1569_v60 = vrot.slane %v1562_v47, %v10600_v2  ;;  %v1577_v3 = vrot.slane %v8167_v49, %v10600_v2  ;;  %v1585_v4 = vrot.slane %v1578_v54, %v10600_v2  ;;  %v1593_v52 = vrot.slane %v8168_v55, %v10600_v2 }
 0x333   : > { %v1526_v5 = vcombine.low %v10664_v43, %v10667_v44  ;;  %v1542_v6 = vcombine.low %v10670_v45, %v10673_v46  ;;  %v1826_v10 = vrot.slane %v1818_v41, %v10603_v8  ;;  %v1842_v11 = vrot.slane %v1834_v59, %v10603_v8 }
 0x334   : > { %v1594_v7 = vcombine.low %v1569_v60, %v1577_v3  ;;  %v1610_v9 = vcombine.low %v1585_v4, %v1593_v52  ;;  %v1886_v12 = vcombine.low %v10648_v20, %v10651_v21  ;;  %v1902_v13 = vcombine.low %v1877_v57, %v1885_v58 }
 0x335   : > { %v1534_v56 = vrot.slane %v1526_v5, %v10603_v8  ;;  %v1550_v16 = vrot.slane %v1542_v6, %v10603_v8  ;;  %v1850_v19 = vcombine.low %v1826_v10, %v1842_v11  ;;  %v1887_v27 = vcombine.high %v10648_v20, %v10651_v21 }
 0x336   : > { %v1894_v14 = vrot.slane %v1886_v12, %v10603_v8  ;;  %v1910_v15 = vrot.slane %v1902_v13, %v10603_v8  ;;  %v1602_v17 = vrot.slane %v1594_v7, %v10603_v8  ;;  %v1618_v18 = vrot.slane %v1610_v9, %v10603_v8 }
 0x337   : > { %v1558_v23 = vcombine.low %v1534_v56, %v1550_v16  ;;  %v1903_v28 = vcombine.high %v1877_v57, %v1885_v58  ;;  %v1851_v29 = vcombine.high %v1826_v10, %v1842_v11  ;;  %v1819_v30 = vcombine.high %v10620_v50, %v10623_v53  ;;  %v1054_v10 = vld [vmem:[#allocation8] sm:$0xff] }
 0x338   : > { %v1918_v22 = vcombine.low %v1894_v14, %v1910_v15  ;;  %v1626_v24 = vcombine.low %v1602_v17, %v1618_v18  ;;  %v1919_v26 = vcombine.high %v1894_v14, %v1910_v15  ;;  %v1835_v31 = vcombine.high %v10632_v61, %v10635_v62  ;;  %v1055_v14 = vld [vmem:[#allocation8 + $0x8] sm:$0xff] }
 0x339   : > { %v1901_v37 = vrot.slane %v1887_v27, %v10603_v8  ;;  %v1917_v38 = vrot.slane %v1903_v28, %v10603_v8  ;;  %v1833_v39 = vrot.slane %v1819_v30, %v10603_v8  ;;  %v1527_v50 = vcombine.high %v10664_v43, %v10667_v44 }
 0x33a   : > { %v2218_v63 = vpack.c.bf16 %v1918_v22, %v1850_v19  ;;  %v2214_v32 = vpack.c.bf16 %v1626_v24, %v1558_v23  ;;  %v2219_v35 = vpack.c.bf16 %v1919_v26, %v1851_v29  ;;  %v1849_v20 = vrot.slane %v1835_v31, %v10603_v8 }
 0x33b   : > { %v1920_v40 = vcombine.low %v1901_v37, %v1917_v38  ;;  %v1543_v53 = vcombine.high %v10670_v45, %v10673_v46  ;;  %v1595_v61 = vcombine.high %v1569_v60, %v1577_v3  ;;  %v1611_v62 = vcombine.high %v1585_v4, %v1593_v52 }
 0x33c   : > { %v2227_v25 = vsel %vm2222_vm1, %v2218_v63, 0  ;;  %v2274_v21 = vsel %vm2222_vm1, %v2219_v35, 0  ;;  %v1559_v42 = vcombine.high %v1534_v56, %v1550_v16  ;;  %v1627_v47 = vcombine.high %v1602_v17, %v1618_v18 }
 0x33d   : > { %8794 = vmatpush3.bf16.xpose.msra.mxu1 %v2227_v25  ;;  %v1852_v49 = vcombine.low %v1833_v39, %v1849_v20  ;;  %v1541_v55 = vrot.slane %v1527_v50, %v10603_v8  ;;  %v1557_v57 = vrot.slane %v1543_v53, %v10603_v8  ;;  %v1609_v43 = vrot.slane %v1595_v61, %v10603_v8 }
 0x33e   : > { %8799 = vmatprep.subr.bf16.mxu1 %v9911_v0  ;;  %v1625_v44 = vrot.slane %v1611_v62, %v10603_v8  ;;  %v2215_v45 = vpack.c.bf16 %v1627_v47, %v1559_v42  ;;  %v1921_v58 = vcombine.high %v1901_v37, %v1917_v38  ;;  %v1853_v60 = vcombine.high %v1833_v39, %v1849_v20 }
 0x33f   : > { %v2220_v54 = vpack.c.bf16 %v1920_v40, %v1852_v49  ;;  %v1560_v41 = vcombine.low %v1541_v55, %v1557_v57  ;;  %v1561_v5 = vcombine.high %v1541_v55, %v1557_v57 }
 0x340   : > { %v1628_v59 = vcombine.low %v1609_v43, %v1625_v44  ;;  %v2221_v3 = vpack.c.bf16 %v1921_v58, %v1853_v60  ;;  %v1629_v6 = vcombine.high %v1609_v43, %v1625_v44 }
 0x341   : > { %v2321_v46 = vsel %vm2222_vm1, %v2220_v54, 0 }
 0x342   : > { %v2216_v4 = vpack.c.bf16 %v1628_v59, %v1560_v41  ;;  %v2368_v52 = vsel %vm2222_vm1, %v2221_v3, 0  ;;  %v2217_v7 = vpack.c.bf16 %v1629_v6, %v1561_v5 }
 0x344   : > { %8796 = vmatmul.mubr.msk.bf16.vlgmr.msra.gmra.mrb[4].mxu1 %vm2222_vm1, %v2214_v32 }
 0x345   : > { %8800 = vmatpush3.bf16.xpose.msra.mxu1 %v2274_v21  ;;  %8801 = vmatprep.mubr.msk.bf16.mxu1 %vm9912_vm0, %v9911_v0 }
 0x346   : > { %8805 = vmatprep.subr.bf16.mxu1 %v9911_v0 }
 0x34c   : > { %8802 = vmatmul.mubr.msk.bf16.vlgmr.msra.gmra.mrb[8].mxu1 %vm2222_vm1, %v2215_v45 }
 0x34d   : > { %8806 = vmatpush3.bf16.xpose.msra.mxu1 %v2321_v46  ;;  %8807 = vmatprep.mubr.msk.bf16.mxu1 %vm9912_vm0, %v9911_v0 }
 0x34e   : > { %8811 = vmatprep.subr.bf16.mxu1 %v9911_v0 }
 0x354   : > { %8808 = vmatmul.mubr.msk.bf16.vlgmr.msra.gmra.mrb[12].mxu1 %vm2222_vm1, %v2216_v4 }
 0x355   : > { %8812 = vmatpush3.bf16.xpose.msra.mxu1 %v2368_v52  ;;  %8813 = vmatprep.mubr.msk.bf16.mxu1 %vm9912_vm0, %v9911_v0 }
 0x356   : > { %8823 = vmatprep.subr.bf16.mxu1 %v9911_v0 }
 0x35c   : > { %8814 = vmatmul.mubr.msk.bf16.vlgmr.msra.gmra.mrb[16].mxu1 %vm2222_vm1, %v2217_v7 }
 0x35d   : > { %8825 = vmatprep.mubr.msk.bf16.mxu1 %vm9912_vm0, %v9911_v0 }
 0x417   : > { %v2263_v9 = vpop.f32.mrb[4].mxu1 }
 0x418   : > { %v2411_v11 = vmul.f32 0.17677669, %v2263_v9  ;;  %v8797_v12 = vpop.f32.mrb[5].mxu1 }
 0x419   : > { %v2266_v13 = vpop.f32.mrb[6].mxu1 }
 0x41a   : > { %v2412_v15 = vmul.f32 0.17677669, %v2266_v13  ;;  %v8798_v56 = vpop.f32.mrb[7].mxu1  ;;  %v2419_v16 = vadd.f32 %v2411_v11, %v1054_v10 }
 0x41c   : > { %v2428_v17 = vsel %vm2427_vm2, %v2419_v16, -inf  ;;  %v2420_v18 = vadd.f32 %v2412_v15, %v1055_v14 }
 0x41d   : > { %2429 = vmax.xlane.f32.xlu0 %v2428_v17 }
 0x41e   : > { %v2431_v19 = vsel %vm2427_vm2, %v2420_v18, -inf }
 0x41f   : > { %2432 = vmax.xlane.f32.xlu1 %v2431_v19  ;;  %v2310_v22 = vpop.f32.mrb[8].mxu1 }
 0x420   : > { %v2413_v63 = vmul.f32 0.17677669, %v2310_v22  ;;  %v8803_v23 = vpop.f32.mrb[9].mxu1 }
 0x421   : > { %v2313_v24 = vpop.f32.mrb[10].mxu1 }
 0x422   : > { %v2414_v25 = vmul.f32 0.17677669, %v2313_v24  ;;  %v8804_v26 = vpop.f32.mrb[11].mxu1  ;;  %v2421_v27 = vadd.f32 %v2413_v63, %v1054_v10 }
 0x424   : > { %v2434_v28 = vsel %vm2427_vm2, %v2421_v27, -inf  ;;  %v2422_v29 = vadd.f32 %v2414_v25, %v1055_v14 }
 0x425   : > { %2435 = vmax.xlane.f32.xlu0 %v2434_v28 }
 0x426   : > { %v2437_v35 = vsel %vm2427_vm2, %v2422_v29, -inf }
 0x427   : > { %v2357_v30 = vpop.f32.mrb[12].mxu1 }
 0x428   : > { %v2415_v31 = vmul.f32 0.17677669, %v2357_v30  ;;  %v8809_v32 = vpop.f32.mrb[13].mxu1 }
 0x429   : > { %2438 = vmax.xlane.f32.xlu0 %v2437_v35  ;;  %v2360_v37 = vpop.f32.mrb[14].mxu1 }
 0x42a   : > { %v2416_v38 = vmul.f32 0.17677669, %v2360_v37  ;;  %v8810_v39 = vpop.f32.mrb[15].mxu1  ;;  %v2423_v20 = vadd.f32 %v2415_v31, %v1054_v10 }
 0x42c   : > { %v2440_v21 = vsel %vm2427_vm2, %v2423_v20, -inf  ;;  %v10742_v40 = vadd.f32 %v2416_v38, %v1055_v14 }
 0x42d   : > { %2441 = vmax.xlane.f32.xlu1 %v2440_v21 }
 0x42e   : > { %v2443_v50 = vsel %vm2427_vm2, %v10742_v40, -inf }
 0x42f   : > { %2444 = vmax.xlane.f32.xlu0 %v2443_v50  ;;  %v2404_v53 = vpop.f32.mrb[16].mxu1 }
 0x430   : > { %v2417_v61 = vmul.f32 0.17677669, %v2404_v53  ;;  %v8815_v62 = vpop.f32.mrb[17].mxu1 }
 0x431   : > { %v2407_v42 = vpop.f32.mrb[18].mxu1 }
 0x432   : > { %v2418_v47 = vmul.f32 0.17677669, %v2407_v42  ;;  %v8816_v49 = vpop.f32.mrb[19].mxu1  ;;  %v2425_v54 = vadd.f32 %v2417_v61, %v1054_v10 }
 0x434   : > { %v2446_v55 = vsel %vm2427_vm2, %v2425_v54, -inf  ;;  %v2426_v57 = vadd.f32 %v2418_v47, %v1055_v14 }
 0x435   : > { %2447 = vmax.xlane.f32.xlu1 %v2446_v55 }
 0x436   : > { %v2449_v43 = vsel %vm2427_vm2, %v2426_v57, -inf }
 0x437   : > { %2450 = vmax.xlane.f32.xlu0 %v2449_v43 }
 0x446   : > { %1924 = vrot.lane.b32.xlu1 %v10573_v48, %s9914_s6 }
 0x44a   : > { %1930 = vrot.lane.b32.xlu1 %v10573_v48, %s9915_s1 }
 0x44d   : > { %1926 = vrot.lane.b32.xlu0 %v10576_v51, %s9914_s6 }
 0x44e   : > { %1932 = vrot.lane.b32.xlu1 %v10576_v51, %s9915_s1 }
 0x451   : > { %1936 = vrot.lane.b32.xlu0 %v10573_v48, %s9916_s14 }
 0x4aa   : > { %v2430_v44 = vpop.xlane.xlu0 %2429 }
 0x4ab   : > { %v2452_v45 = vsub.f32 %v2419_v16, %v2430_v44 }
 0x4ac   : > { %v2433_v46 = vpop.xlane.xlu1 %2432 }
 0x4ad   : > { %v2460_v58 = vmul.f32 1.442695, %v2452_v45  ;;  %v2453_v41 = vsub.f32 %v2420_v18, %v2433_v46 }
 0x4af   : > { %9366 = vpow2.f32 %v2460_v58  ;;  %v2462_v59 = vmul.f32 1.442695, %v2453_v41 }
 0x4b1   : > { %9368 = vpow2.f32 %v2462_v59 }
 0x4b2   : > { %v2436_v60 = vpop.xlane.xlu0 %2435 }
 0x4b3   : > { %v2454_v3 = vsub.f32 %v2421_v27, %v2436_v60 }
 0x4b5   : > { %v2464_v4 = vmul.f32 1.442695, %v2454_v3 }
 0x4b6   : > { %v2439_v52 = vpop.xlane.xlu0 %2438 }
 0x4b7   : > { %9370 = vpow2.f32 %v2464_v4  ;;  %v2455_v5 = vsub.f32 %v2422_v29, %v2439_v52 }
 0x4b9   : > { %v10758_v6 = vpop.eup %9366  ;;  %v2466_v7 = vmul.f32 1.442695, %v2455_v5 }
 0x4ba   : > { %v2442_v9 = vpop.xlane.xlu1 %2441  ;;  %v2476_v10 = vsel %vm2427_vm2, %v10758_v6, 0.0 }
 0x4bb   : > { %v10762_v11 = vpop.eup %9368  ;;  %9372 = vpow2.f32 %v2466_v7  ;;  %v2456_v12 = vsub.f32 %v2423_v20, %v2442_v9  ;;  %2477 = vadd.xlane.f32.xlu1 %v2476_v10 }
 0x4bc   : > { %v2479_v13 = vsel %vm2427_vm2, %v10762_v11, 0.0  ;;  %v2445_v15 = vpop.xlane.xlu0 %2444 }
 0x4bd   : > { %v2468_v14 = vmul.f32 1.442695, %v2456_v12  ;;  %2480 = vadd.xlane.f32.xlu0 %v2479_v13  ;;  %v2457_v32 = vsub.f32 %v10742_v40, %v2445_v15 }
 0x4bf   : > { %9374 = vpow2.f32 %v2468_v14  ;;  %v2470_v35 = vmul.f32 1.442695, %v2457_v32 }
 0x4c1   : > { %v10766_v56 = vpop.eup %9370 }
 0x4c2   : > { %v2448_v16 = vpop.xlane.xlu1 %2447  ;;  %v2482_v17 = vsel %vm2427_vm2, %v10766_v56, 0.0 }
 0x4c3   : > { %v2458_v18 = vsub.f32 %v2425_v54, %v2448_v16  ;;  %2483 = vadd.xlane.f32.xlu1 %v2482_v17 }
 0x4c4   : > { %v2451_v19 = vpop.xlane.xlu0 %2450 }
 0x4c5   : > { %v10770_v22 = vpop.eup %9372  ;;  %v2472_v63 = vmul.f32 1.442695, %v2458_v18  ;;  %v2459_v23 = vsub.f32 %v2426_v57, %v2451_v19 }
 0x4c6   : > { %v2485_v24 = vsel %vm2427_vm2, %v10770_v22, 0.0  ;;  %v1925_v20 = vpop.permute.xlu1 %1924 }
 0x4c7   : > { %9376 = vpow2.f32 %v2472_v63  ;;  %v2474_v25 = vmul.f32 1.442695, %v2459_v23  ;;  %2486 = vadd.xlane.f32.xlu0 %v2485_v24 }
 0x4c8   : > { %v1927_v39 = vpop.permute.xlu0 %1926 }
 0x4c9   : > { %v10774_v26 = vpop.eup %9374  ;;  %9378 = vpow2.f32 %v2474_v25 }
 0x4ca   : > { %v2488_v27 = vsel %vm2427_vm2, %v10774_v26, 0.0  ;;  %9380 = vpow2.f32 %v2470_v35  ;;  %v1931_v50 = vpop.permute.xlu1 %1930 }
 0x4cb   : > { %2489 = vadd.xlane.f32.xlu0 %v2488_v27  ;;  %v1942_v62 = vcombine.low %v10573_v48, %v1931_v50  ;;  %v1943_v42 = vcombine.high %v10573_v48, %v1931_v50 }
 0x4cc   : > { %v1937_v21 = vpop.permute.xlu0 %1936 }
 0x4cd   : > { %v1958_v53 = vcombine.low %v1925_v20, %v1937_v21  ;;  %v1959_v61 = vcombine.high %v1925_v20, %v1937_v21  ;;  %v1950_v54 = vrot.slane %v1942_v62, %v10600_v2  ;;  %v1957_v55 = vrot.slane %v1943_v42, %v10600_v2 }
 0x4ce   : > { %v1933_v49 = vpop.permute.xlu1 %1932 }
 0x4cf   : > { %v1966_v40 = vrot.slane %v1958_v53, %v10600_v2  ;;  %v1973_v47 = vrot.slane %v1959_v61, %v10600_v2  ;;  %v2010_v4 = vcombine.low %v10576_v51, %v1933_v49  ;;  %v2011_v52 = vcombine.high %v10576_v51, %v1933_v49 }
 0x4d1   : > { %v10778_v28 = vpop.eup %9376  ;;  %v1974_v57 = vcombine.low %v1950_v54, %v1966_v40  ;;  %v1975_v43 = vcombine.high %v1950_v54, %v1966_v40  ;;  %v1990_v44 = vcombine.low %v1957_v55, %v1973_v47  ;;  %v1991_v45 = vcombine.high %v1957_v55, %v1973_v47 }
 0x4d2   : > { %v2494_v29 = vsel %vm2427_vm2, %v10778_v28, 0.0  ;;  %v2018_v16 = vrot.slane %v2010_v4, %v10600_v2  ;;  %v2025_v17 = vrot.slane %v2011_v52, %v10600_v2 }
 0x4d3   : > { %v10782_v30 = vpop.eup %9378  ;;  %2495 = vadd.xlane.f32.xlu0 %v2494_v29  ;;  %v1982_v58 = vrot.slane %v1974_v57, %v10603_v8  ;;  %v1989_v41 = vrot.slane %v1975_v43, %v10603_v8  ;;  %v1998_v48 = vrot.slane %v1990_v44, %v10603_v8  ;;  %v2005_v59 = vrot.slane %v1991_v45, %v10603_v8 }
 0x4d4   : > { %1938 = vrot.lane.b32.xlu1 %v10576_v51, %s9916_s14  ;;  %v2497_v31 = vsel %vm2427_vm2, %v10782_v30, 0.0  ;;  %v10789_v37 = vpop.eup %9380 }
 0x4d5   : > { %v2491_v38 = vsel %vm2427_vm2, %v10789_v37, 0.0  ;;  %v2078_v5 = vcombine.low %v1982_v58, %v1989_v41  ;;  %v8173_v7 = vcombine.high %v1982_v58, %v1989_v41  ;;  %v2094_v9 = vcombine.low %v1998_v48, %v2005_v59 }
 0x4d6   : > { %v8174_v10 = vcombine.high %v1998_v48, %v2005_v59 }
 0x4d7   : > { %2498 = vadd.xlane.f32.xlu0 %v2497_v31  ;;  %v2085_v18 = vrot.slane %v2078_v5, %v10600_v2  ;;  %v2093_v63 = vrot.slane %v8173_v7, %v10600_v2  ;;  %v2101_v23 = vrot.slane %v2094_v9, %v10600_v2 }
 0x4d8   : > { %v2109_v24 = vrot.slane %v8174_v10, %v10600_v2 }
 0x4d9   : > { %v2110_v21 = vcombine.low %v2085_v18, %v2093_v63  ;;  %v2111_v45 = vcombine.high %v2085_v18, %v2093_v63 }
 0x4da   : > { %v2126_v50 = vcombine.low %v2101_v23, %v2109_v24 }
 0x4db   : > { %v2118_v43 = vrot.slane %v2110_v21, %v10603_v8 }
 0x4dc   : > { %v2134_v44 = vrot.slane %v2126_v50, %v10603_v8 }
 0x4de   : > { %v2142_v10 = vcombine.low %v2118_v43, %v2134_v44 }
 0x4f8   : > { %2492 = vadd.xlane.f32.xlu1 %v2491_v38 }
 0x548   : > { %v2478_v46 = vpop.xlane.xlu1 %2477 }
 0x549   : > { %9382 = vrcp.f32 %v2478_v46  ;;  %v2127_v46 = vcombine.high %v2101_v23, %v2109_v24 }
 0x54a   : > { %v2481_v3 = vpop.xlane.xlu0 %2480 }
 0x54b   : > { %9384 = vrcp.f32 %v2481_v3 }
 0x550   : > { %v2484_v60 = vpop.xlane.xlu1 %2483 }
 0x553   : > { %v9383_v55 = vpop.eup %9382 }
 0x554   : > { %v1939_v12 = vpop.permute.xlu1 %1938  ;;  %v2487_v15 = vpop.xlane.xlu0 %2486 }
 0x555   : > { %v2026_v13 = vcombine.low %v1927_v39, %v1939_v12  ;;  %v2027_v14 = vcombine.high %v1927_v39, %v1939_v12  ;;  %9386 = vrcp.f32 %v2487_v15  ;;  %v9385_v58 = vpop.eup %9384  ;;  %v2125_v12 = vrot.slane %v2111_v45, %v10603_v8 }
 0x556   : > { %9388 = vrcp.f32 %v2484_v60  ;;  %v2509_v18 = vmul.f32 %v9385_v58, %v10762_v11 }
 0x557   : > { %v2034_v19 = vrot.slane %v2026_v13, %v10600_v2  ;;  %v2041_v51 = vrot.slane %v2027_v14, %v10600_v2  ;;  %v2141_v13 = vrot.slane %v2127_v46, %v10603_v8 }
 0x558   : > { %v10817_v20 = vpop.xlane.xlu0 %2489 }
 0x559   : > { %v2042_v25 = vcombine.low %v2018_v16, %v2034_v19  ;;  %v2043_v27 = vcombine.high %v2018_v16, %v2034_v19  ;;  %v2058_v29 = vcombine.low %v2025_v17, %v2041_v51  ;;  %v2059_v31 = vcombine.high %v2025_v17, %v2041_v51 }
 0x55a   : > { %v2143_v16 = vcombine.high %v2118_v43, %v2134_v44 }
 0x55b   : > { %v2050_v32 = vrot.slane %v2042_v25, %v10603_v8  ;;  %v2057_v35 = vrot.slane %v2043_v27, %v10603_v8  ;;  %v2066_v38 = vrot.slane %v2058_v29, %v10603_v8  ;;  %v2073_v39 = vrot.slane %v2059_v31, %v10603_v8 }
 0x55c   : > { %v2508_v25 = vmul.f32 %v9383_v55, %v10758_v6  ;;  %v2144_v29 = vcombine.low %v2125_v12, %v2141_v13  ;;  %v2145_v31 = vcombine.high %v2125_v12, %v2141_v13 }
 0x55d   : > { %v2146_v53 = vcombine.low %v2050_v32, %v2057_v35  ;;  %v8175_v61 = vcombine.high %v2050_v32, %v2057_v35  ;;  %v2162_v62 = vcombine.low %v2066_v38, %v2073_v39  ;;  %v8176_v42 = vcombine.high %v2066_v38, %v2073_v39 }
 0x55e   : > { %v2516_v32 = vpack.c.bf16 %v2509_v18, %v2508_v25 }
 0x55f   : > { %v2153_v40 = vrot.slane %v2146_v53, %v10600_v2  ;;  %v2161_v47 = vrot.slane %v8175_v61, %v10600_v2  ;;  %v2169_v49 = vrot.slane %v2162_v62, %v10600_v2  ;;  %v2177_v54 = vrot.slane %v8176_v42, %v10600_v2  ;;  %v9387_v60 = vpop.eup %9386 }
 0x560   : > { %v2496_v57 = vpop.xlane.xlu0 %2495  ;;  %v9389_v7 = vpop.eup %9388  ;;  %v2511_v19 = vmul.f32 %v9387_v60, %v10770_v22 }
 0x561   : > { %v2178_v41 = vcombine.low %v2153_v40, %v2161_v47  ;;  %v2194_v48 = vcombine.low %v2169_v49, %v2177_v54  ;;  %v2179_v59 = vcombine.high %v2153_v40, %v2161_v47  ;;  %v2195_v3 = vcombine.high %v2169_v49, %v2177_v54  ;;  %v9192_v47 = vld [vmem:[#allocation13 + $0x18] sm:$0xff]  }
 0x562   : > { %9390 = vrcp.f32 %v2496_v57  ;;  %v2510_v27 = vmul.f32 %v9389_v7, %v10766_v56 }
 0x563   : > { %v2186_v4 = vrot.slane %v2178_v41, %v10603_v8  ;;  %v2202_v52 = vrot.slane %v2194_v48, %v10603_v8  ;;  %v2193_v5 = vrot.slane %v2179_v59, %v10603_v8  ;;  %v2209_v14 = vrot.slane %v2195_v3, %v10603_v8 }
 0x564   : > { %v2499_v9 = vpop.xlane.xlu0 %2498  ;;  %v2517_v35 = vpack.c.bf16 %v2511_v19, %v2510_v27 }
 0x565   : > { %9392 = vrcp.f32 %v2499_v9  ;;  %v2210_v15 = vcombine.low %v2186_v4, %v2202_v52  ;;  %v2211_v17 = vcombine.high %v2186_v4, %v2202_v52  ;;  %v2212_v23 = vcombine.low %v2193_v5, %v2209_v14 }
 0x566   : > { %v2213_v24 = vcombine.high %v2193_v5, %v2209_v14  ;;  %9394 = vrcp.f32 %v10817_v20  ;;  %v9191_v20 = vld [vmem:[#allocation13 + $0x10] sm:$0xff]  }
 0x567   : > { %v2520_v51 = vpack.c.bf16 %v2210_v15, %v2142_v10  ;;  %v2521_v63 = vpack.c.bf16 %v2211_v17, %v2143_v16  ;;  %v2522_v11 = vpack.c.bf16 %v2212_v23, %v2144_v29 }
 0x568   : > { %v2523_v22 = vpack.c.bf16 %v2213_v24, %v2145_v31 }
 0x569   : > { %8818 = vmatpush3.bf16.msra.mxu0 %v2520_v51  ;;  %8824 = vmatpush3.bf16.msra.mxu1 %v2521_v63 }
 0x56a   : > { %8829 = vmatprep.subr.bf16.mxu0 %v9911_v0  ;;  %8835 = vmatprep.subr.bf16.mxu1 %v9911_v0 }
 0x56c   : > { %8820 = vmatmul.mubr.msk.bf16.vlgmr.msra.gmra.mrb[4].mxu0 %vm2427_vm2, %v2516_v32  ;;  %8826 = vmatmul.mubr.msk.bf16.vlgmr.msra.gmra.mrb[20].mxu1 %vm2427_vm2, %v2517_v35  ;;  %v9391_v38 = vpop.eup %9390 }
 0x56d   : > { %8830 = vmatpush3.bf16.msra.mxu0 %v2522_v11  ;;  %8836 = vmatpush3.bf16.msra.mxu1 %v2523_v22  ;;  %v2514_v56 = vmul.f32 %v9391_v38, %v10778_v28  ;;  %v9189_v28 = vld [vmem:[#allocation13] sm:$0xff]  }
 0x56e   : > { %8837 = vmatprep.mubr.msk.bf16.mxu1 %vm9912_vm0, %v9911_v0  ;;  %8831 = vmatprep.mubr.msk.bf16.mxu0 %vm9912_vm0, %v9911_v0 }
 0x56f   : > { %v9393_v6 = vpop.eup %9392  ;;  %8841 = vmatprep.subr.bf16.mxu0 %v9911_v0  ;;  %8861 = vmatprep.subr.bf16.mxu1 %v9911_v0 }
 0x570   : > { %v2515_v39 = vmul.f32 %v9393_v6, %v10782_v30  ;;  %v9395_v53 = vpop.eup %9394  ;;  %v9190_v30 = vld [vmem:[#allocation13 + $0x8] sm:$0xff]  }
 0x571   : > { %v2512_v62 = vmul.f32 %v9395_v53, %v10774_v26  ;;  %v9193_v26 = vld [vmem:[#allocation13 + $0x20] sm:$0xff]  }
 0x572   : > { %v2519_v21 = vpack.c.bf16 %v2515_v39, %v2514_v56 }
 0x574   : > { %8838 = vmatmul.mubr.msk.bf16.vlgmr.msra.gmra.mrb[24].mxu1 %vm2427_vm2, %v2519_v21 }
 0x575   : > { %8877 = vmatprep.mubr.msk.bf16.mxu1 %vm9912_vm0, %v9911_v0 }
 0x585   : > { %v2493_v50 = vpop.xlane.xlu1 %2492 }
 0x586   : > { %9396 = vrcp.f32 %v2493_v50 }
 0x590   : > { %v9397_v61 = vpop.eup %9396 }
 0x591   : > { %v2513_v42 = vmul.f32 %v9397_v61, %v10789_v37  ;;  %v9194_v37 = vld [vmem:[#allocation13 + $0x28] sm:$0xff]  }
 0x593   : > { %v2518_v40 = vpack.c.bf16 %v2513_v42, %v2512_v62 }
 0x595   : > { %8832 = vmatmul.mubr.msk.bf16.vlgmr.msra.gmra.mrb[8].mxu0 %vm2427_vm2, %v2518_v40 }
 0x596   : > { %8857 = vmatprep.mubr.msk.bf16.mxu0 %vm9912_vm0, %v9911_v0  ;;  %8842 = vmatpush3.bf16.msra.mxu0 %v9189_v28 }
 0x597   : > { %8843 = vmatprep.subr.bf16.mxu0 %v9911_v0 }
 0x59a   : > { %8844 = vmatpush3.bf16.msra.mxu0 %v9190_v30 }
 0x59b   : > { %8845 = vmatprep.subr.bf16.mxu0 %v9911_v0 }
 0x59e   : > { %8846 = vmatpush3.bf16.msra.mxu0 %v9191_v20 }
 0x59f   : > { %8847 = vmatprep.subr.bf16.mxu0 %v9911_v0 }
 0x5a2   : > { %8848 = vmatpush3.bf16.msra.mxu0 %v9192_v47 }
 0x5a3   : > { %8849 = vmatprep.subr.bf16.mxu0 %v9911_v0 }
 0x5a6   : > { %8850 = vmatpush3.bf16.msra.mxu0 %v9193_v26 }
 0x5a7   : > { %8851 = vmatprep.subr.bf16.mxu0 %v9911_v0 }
 0x5aa   : > { %8852 = vmatpush3.bf16.msra.mxu0 %v9194_v37 }
 0x5ab   : > { %8853 = vmatprep.subr.bf16.mxu0 %v9911_v0 }
 0x63f   : > { %v2561_v49 = vpop.f32.mrb[4].mxu0  ;;  %v2605_v54 = vpop.f32.mrb[20].mxu1 }
 0x640   : > { %v8821_v55 = vpop.f32.mrb[5].mxu0  ;;  %v8827_v57 = vpop.f32.mrb[21].mxu1 }
 0x641   : > { %v2564_v43 = vpop.f32.mrb[6].mxu0  ;;  %v2608_v44 = vpop.f32.mrb[22].mxu1 }
 0x642   : > { %v8822_v45 = vpop.f32.mrb[7].mxu0  ;;  %v8828_v46 = vpop.f32.mrb[23].mxu1 }
 0x643   : > { %v9195_v46 = vld [vmem:[#allocation13 + $0x30] sm:$0xff]  }
 0x644   : > { %8854 = vmatpush3.bf16.msra.mxu0 %v9195_v46  ;;  %v9199_v46 = vld [vmem:[#allocation16 + $0x4] ss:$8 sps:$4 sm:$0xff]  }
 0x645   : > { %8855 = vmatprep.subr.bf16.mxu0 %v9911_v0 }
 0x647   : > { %v2693_v58 = vpop.f32.mrb[24].mxu1 }
 0x648   : > { %v2716_v41 = vcombine.low %v2605_v54, %v2693_v58  ;;  %v2717_v48 = vcombine.high %v2605_v54, %v2693_v58  ;;  %v8839_v59 = vpop.f32.mrb[25].mxu1 }
 0x649   : > { %v2696_v60 = vpop.f32.mrb[26].mxu1 }
 0x64a   : > { %v2784_v3 = vcombine.low %v2608_v44, %v2696_v60  ;;  %v2785_v4 = vcombine.high %v2608_v44, %v2696_v60  ;;  %v8840_v52 = vpop.f32.mrb[27].mxu1  ;;  %v2724_v12 = vrot.slane %v2716_v41, %v10600_v2  ;;  %v2731_v13 = vrot.slane %v2717_v48, %v10600_v2 }
 0x64c   : > { %v2792_v25 = vrot.slane %v2784_v3, %v10600_v2  ;;  %v2799_v27 = vrot.slane %v2785_v4, %v10600_v2 }
 0x668   : > { %v2649_v5 = vpop.f32.mrb[8].mxu0 }
 0x669   : > { %v2700_v7 = vcombine.low %v2561_v49, %v2649_v5  ;;  %v2701_v9 = vcombine.high %v2561_v49, %v2649_v5  ;;  %v8833_v10 = vpop.f32.mrb[9].mxu0 }
 0x66a   : > { %v2652_v14 = vpop.f32.mrb[10].mxu0 }
 0x66b   : > { %v2708_v15 = vrot.slane %v2700_v7, %v10600_v2  ;;  %v2715_v16 = vrot.slane %v2701_v9, %v10600_v2  ;;  %v2768_v17 = vcombine.low %v2564_v43, %v2652_v14  ;;  %v2769_v18 = vcombine.high %v2564_v43, %v2652_v14  ;;  %v8834_v19 = vpop.f32.mrb[11].mxu0 }
 0x66d   : > { %v2732_v51 = vcombine.low %v2708_v15, %v2724_v12  ;;  %v2733_v63 = vcombine.high %v2708_v15, %v2724_v12  ;;  %v2748_v23 = vcombine.low %v2715_v16, %v2731_v13  ;;  %v2749_v24 = vcombine.high %v2715_v16, %v2731_v13 }
 0x66e   : > { %v2776_v29 = vrot.slane %v2768_v17, %v10600_v2  ;;  %v2783_v31 = vrot.slane %v2769_v18, %v10600_v2 }
 0x66f   : > { %v2740_v32 = vrot.slane %v2732_v51, %v10603_v8  ;;  %v2747_v35 = vrot.slane %v2733_v63, %v10603_v8  ;;  %v2756_v11 = vrot.slane %v2748_v23, %v10603_v8  ;;  %v2763_v22 = vrot.slane %v2749_v24, %v10603_v8  ;;  %v9196_v51 = vld [vmem:[#allocation13 + $0x38] sm:$0xff]  }
 0x670   : > { %v2800_v38 = vcombine.low %v2776_v29, %v2792_v25  ;;  %v2801_v6 = vcombine.high %v2776_v29, %v2792_v25  ;;  %v2816_v56 = vcombine.low %v2783_v31, %v2799_v27  ;;  %v2817_v39 = vcombine.high %v2783_v31, %v2799_v27  ;;  %8856 = vmatpush3.bf16.msra.mxu0 %v9196_v51 }
 0x671   : > { %v2836_v21 = vcombine.low %v2740_v32, %v2747_v35  ;;  %v8185_v50 = vcombine.high %v2740_v32, %v2747_v35  ;;  %v2852_v53 = vcombine.low %v2756_v11, %v2763_v22  ;;  %v8186_v61 = vcombine.high %v2756_v11, %v2763_v22  ;;  %3387 = vmatprep.subr.bf16.mxu0 %v9199_v46 }
 0x672   : > { %v2808_v62 = vrot.slane %v2800_v38, %v10603_v8  ;;  %v2815_v42 = vrot.slane %v2801_v6, %v10603_v8  ;;  %v2824_v40 = vrot.slane %v2816_v56, %v10603_v8  ;;  %v2831_v28 = vrot.slane %v2817_v39, %v10603_v8 }
 0x673   : > { %v2843_v30 = vrot.slane %v2836_v21, %v10600_v2  ;;  %v2851_v20 = vrot.slane %v8185_v50, %v10600_v2  ;;  %v2859_v47 = vrot.slane %v2852_v53, %v10600_v2  ;;  %v2867_v26 = vrot.slane %v8186_v61, %v10600_v2 }
 0x674   : > { %v2904_v37 = vcombine.low %v2808_v62, %v2815_v42  ;;  %v8187_v49 = vcombine.high %v2808_v62, %v2815_v42  ;;  %v2920_v54 = vcombine.low %v2824_v40, %v2831_v28  ;;  %v8188_v55 = vcombine.high %v2824_v40, %v2831_v28 }
 0x675   : > { %v2869_v57 = vcombine.high %v2843_v30, %v2851_v20  ;;  %v2885_v43 = vcombine.high %v2859_v47, %v2867_v26  ;;  %v2868_v44 = vcombine.low %v2843_v30, %v2851_v20  ;;  %v2884_v45 = vcombine.low %v2859_v47, %v2867_v26  ;;  %v8189_v30 = vld [vmem:[%s11540_s2] ss:$0 sm:$0xff]  ;;  %s9786_s2 = scalar_lea.vmem %s11333_s9, 256 }
 0x676   : > { %v2911_v58 = vrot.slane %v2904_v37, %v10600_v2  ;;  %v2919_v41 = vrot.slane %v8187_v49, %v10600_v2  ;;  %v2927_v48 = vrot.slane %v2920_v54, %v10600_v2  ;;  %v2935_v59 = vrot.slane %v8188_v55, %v10600_v2  ;;  %v9442_v55 = vld [vmem:[%s10495_s12] sm:$0xff]  ;;  %p9787_p5 = scmp.ne.s32.totalorder %s11333_s9, %s9786_s2 }
 0x677   : > { %v2883_v60 = vrot.slane %v2869_v57, %v10603_v8  ;;  %v2899_v3 = vrot.slane %v2885_v43, %v10603_v8  ;;  %v2876_v4 = vrot.slane %v2868_v44, %v10603_v8  ;;  %v2892_v52 = vrot.slane %v2884_v45, %v10603_v8  ;;  %v9443_v43 = vld [vmem:[%s10495_s12 + $0x8] sm:$0xff] }
 0x678   : > { %v2937_v5 = vcombine.high %v2911_v58, %v2919_v41  ;;  %v2953_v7 = vcombine.high %v2927_v48, %v2935_v59  ;;  %v2936_v9 = vcombine.low %v2911_v58, %v2919_v41  ;;  %v2952_v10 = vcombine.low %v2927_v48, %v2935_v59  ;;  %v9197_v45 = vld [vmem:[#allocation16] ss:$8 sps:$4 sm:$0xff]   ;;  %v9200_v58 = vld [vmem:[#allocation16 + $0x10] ss:$8 sps:$4 sm:$0xff]   ;;  %v9202_v41 = vld [vmem:[#allocation16 + $0x14] ss:$8 sps:$4 sm:$0xff]   ;;  %p9788_p12 = pnand %p9787_p5, %p11555_p1 }
 0x679   : > { %v2902_v12 = vcombine.low %v2883_v60, %v2899_v3  ;;  %v2900_v13 = vcombine.low %v2876_v4, %v2892_v52  ;;  %v2901_v14 = vcombine.high %v2876_v4, %v2892_v52  ;;  %v2903_v15 = vcombine.high %v2883_v60, %v2899_v3  ;;  %v9205_v48 = vld [vmem:[#allocation16 + $0x24] ss:$8 sps:$4 sm:$0xff]   ;;  %v9203_v59 = vld [vmem:[#allocation16 + $0x20] ss:$8 sps:$4 sm:$0xff]   ;;  %v9208_v60 = vld [vmem:[#allocation16 + $0x34] ss:$8 sps:$4 sm:$0xff]  }
 0x67a   : > { %v2951_v16 = vrot.slane %v2937_v5, %v10603_v8  ;;  %v2967_v17 = vrot.slane %v2953_v7, %v10603_v8  ;;  %v2944_v18 = vrot.slane %v2936_v9, %v10603_v8  ;;  %v2960_v19 = vrot.slane %v2952_v10, %v10603_v8  ;;  %v9222_v3 = vld [vmem:[#allocation14] sm:$0xff]   ;;  %v9206_v4 = vld [vmem:[#allocation16 + $0x30] ss:$8 sps:$4 sm:$0xff]   ;;  %v9223_v52 = vld [vmem:[#allocation14 + $0x8] sm:$0xff]   ;;  %p9789_p0 = pneg %p9788_p12 }
 0x67b   : > { %8862 = vmatpush3.bf16.msra.mxu1 %v9222_v3  ;;  %v9211_v5 = vld [vmem:[#allocation16 + $0x44] ss:$8 sps:$4 sm:$0xff]   ;;  %v9209_v7 = vld [vmem:[#allocation16 + $0x40] ss:$8 sps:$4 sm:$0xff]   ;;  %v9214_v9 = vld [vmem:[#allocation16 + $0x54] ss:$8 sps:$4 sm:$0xff]  }
 0x67c   : > { %v2970_v63 = vcombine.low %v2951_v16, %v2967_v17  ;;  %v2969_v23 = vcombine.high %v2944_v18, %v2960_v19  ;;  %v2968_v24 = vcombine.low %v2944_v18, %v2960_v19  ;;  %v2971_v25 = vcombine.high %v2951_v16, %v2967_v17  ;;  %8863 = vmatprep.subr.bf16.mxu1 %v9911_v0  ;;  %v9212_v10 = vld [vmem:[#allocation16 + $0x50] ss:$8 sps:$4 sm:$0xff]   ;;  %v9221_v16 = vld [vmem:[%s10508_s28] sm:$0xff]  }
 0x67e   : > { %v9132_v27 = vpack.i.bf16 %v2970_v63, %v2902_v12  ;;  %v9127_v29 = vpack.i.bf16 %v2969_v23, %v2901_v14  ;;  %v9137_v31 = vpack.i.bf16 %v2971_v25, %v2903_v15  ;;  %v9217_v12 = vld [vmem:[#allocation16 + $0x64] ss:$8 sps:$4 sm:$0xff]   ;;  %v9220_v14 = vld [vmem:[#allocation16 + $0x74] ss:$8 sps:$4 sm:$0xff]   ;;  %v9218_v15 = vld [vmem:[#allocation16 + $0x70] ss:$8 sps:$4 sm:$0xff]  }
 0x67f   : > { %8864 = vmatpush3.bf16.msra.mxu1 %v9223_v52 }
 0x680   : > { %9133 = vrot.lane.b32.xlu0 %v9132_v27, %s9915_s1  ;;  %9128 = vrot.lane.b32.xlu1 %v9127_v29, %s9916_s14  ;;  %v9224_v27 = vld [vmem:[#allocation14 + $0x10] sm:$0xff]   ;;  %v9225_v29 = vld [vmem:[#allocation14 + $0x18] sm:$0xff]  }
 0x681   : > { %8865 = vmatprep.subr.bf16.mxu1 %v9911_v0 }
 0x683   : > { %8866 = vmatpush3.bf16.msra.mxu1 %v9224_v27 }
 0x684   : > { %9138 = vrot.lane.b32.xlu1 %v9137_v31, %s9914_s6  ;;  %8867 = vmatprep.subr.bf16.mxu1 %v9911_v0  ;;  %v9226_v31 = vld [vmem:[#allocation14 + $0x20] sm:$0xff]  }
 0x687   : > { %8868 = vmatpush3.bf16.msra.mxu1 %v9225_v29 }
 0x688   : > { %8869 = vmatprep.subr.bf16.mxu1 %v9911_v0 }
 0x68b   : > { %8870 = vmatpush3.bf16.msra.mxu1 %v9226_v31 }
 0x68c   : > { %8871 = vmatprep.subr.bf16.mxu1 %v9911_v0 }
 0x6f2   : > { %v9134_v32 = vpop.permute.xlu0 %9133  ;;  %v9129_v35 = vpop.permute.xlu1 %9128 }
 0x6f3   : > { %v9131_v11 = vunpack.i.h.bf16 %v9129_v35  ;;  %v9130_v22 = vunpack.i.l.bf16 %v9129_v35  ;;  %v9136_v38 = vunpack.i.h.bf16 %v9134_v32  ;;  %v9135_v6 = vunpack.i.l.bf16 %v9134_v32  ;;  %v9227_v32 = vld [vmem:[#allocation14 + $0x28] sm:$0xff]   ;;  %v9228_v35 = vld [vmem:[#allocation14 + $0x30] sm:$0xff]  }
 0x6f4   : > { %8872 = vmatpush3.bf16.msra.mxu1 %v9227_v32 }
 0x6f5   : > { %v2996_v56 = vsel %vm2222_vm1, %v2900_v13, %v9130_v22  ;;  %v2997_v39 = vsel %vm2222_vm1, %v2968_v24, %v9131_v11  ;;  %v9215_v13 = vld [vmem:[#allocation16 + $0x60] ss:$8 sps:$4 sm:$0xff]   ;;  %8873 = vmatprep.subr.bf16.mxu1 %v9911_v0  ;;  %v9229_v11 = vld [vmem:[#allocation14 + $0x38] sm:$0xff]  }
 0x6f6   : > { %v9139_v21 = vpop.permute.xlu1 %9138  ;;  %v2999_v61 = vsel %vm2998_vm3, %v2996_v56, %v9135_v6  ;;  %v3000_v62 = vsel %vm2998_vm3, %v2997_v39, %v9136_v38  ;;  %v3176_v22 = vld [vmem:[%s11541_s15] sm:$0x3]  ;;  %s9792_s15 = scalar_lea.vmem %s9791_s19, 512 }
 0x6f7   : > { %v9141_v50 = vunpack.i.h.bf16 %v9139_v21  ;;  %v9140_v53 = vunpack.i.l.bf16 %v9139_v21  ;;  %v3294_v38 = vrot.slane %v3176_v22, %v10556_v34  ;;  %v3298_v6 = vrot.slane %v3176_v22, %v10562_v36  ;;  %p9794_p3 = scmp.lt.s32.totalorder %s9792_s15, %s9786_s2 }
 0x6f8   : > { %8874 = vmatpush3.bf16.msra.mxu1 %v9228_v35 }
 0x6f9   : > { %v3002_v42 = vsel %vm3001_vm4, %v2999_v61, %v9140_v53  ;;  %v3003_v40 = vsel %vm3001_vm4, %v3000_v62, %v9141_v50  ;;  %8875 = vmatprep.subr.bf16.mxu1 %v9911_v0  ;;  %p9795_p13 = por %p9794_p3, %p9793_p11 }
 0x6fa   : > { %v3004_v28 = vpack.c.bf16 %v3003_v40, %v3002_v42 }
 0x6fb   : > { %p9796_p2 = pnand %p9795_p13, %p9789_p0 }
 0x6fc   : > { %8858 = vmatmul.mubr.bf16.vlgmr.msra.gmra.mrb[12].mxu0 %v3004_v28  ;;  %8876 = vmatpush3.bf16.msra.mxu1 %v9229_v11 }
 0x6fd   : > { %3419 = vmatprep.mubr.bf16.mxu0 %v9913_v1  ;;  %3388 = vmatpush1.bf16.msra.mxu0 %v9197_v45 }
 0x6fe   : > { %3389 = vmatprep.subr.bf16.mxu0 %v9202_v41  ;;  %8881 = vmatprep.subr.bf16.mxu1 %v9911_v0 }
 0x701   : > { %3390 = vmatpush1.bf16.msra.mxu0 %v9200_v58 }
 0x702   : > { %3391 = vmatprep.subr.bf16.mxu0 %v9205_v48 }
 0x705   : > { %3392 = vmatpush1.bf16.msra.mxu0 %v9203_v59 }
 0x706   : > { %3393 = vmatprep.subr.bf16.mxu0 %v9208_v60 }
 0x709   : > { %3394 = vmatpush1.bf16.msra.mxu0 %v9206_v4 }
 0x70a   : > { %3395 = vmatprep.subr.bf16.mxu0 %v9211_v5 }
 0x70d   : > { %3396 = vmatpush1.bf16.msra.mxu0 %v9209_v7 }
 0x70e   : > { %3397 = vmatprep.subr.bf16.mxu0 %v9214_v9 }
 0x711   : > { %3398 = vmatpush1.bf16.msra.mxu0 %v9212_v10 }
 0x712   : > { %3399 = vmatprep.subr.bf16.mxu0 %v9217_v12 }
 0x715   : > { %3400 = vmatpush1.bf16.msra.mxu0 %v9215_v13 }
 0x716   : > { %3401 = vmatprep.subr.bf16.mxu0 %v9220_v14 }
 0x719   : > { %3402 = vmatpush1.bf16.msra.mxu0 %v9218_v15 }
 0x71a   : > { %8905 = vmatprep.subr.bf16.mxu0 %v9911_v0 }
 0x71c   : > { %3420 = vmatmul.mubr.bf16.vlgmr.msra.gmra.mrb[16].mxu0 %v9221_v16 }
 0x71d   : > { %8907 = vmatprep.mubr.msk.bf16.mxu0 %vm9912_vm0, %v9911_v0 }
 0x7cf   : > { %v3093_v20 = vpop.f32.mrb[12].mxu0 }
 0x7d0   : > { %v3094_v47 = vadd.f32 %v8189_v30, %v3093_v20  ;;  %v8859_v26 = vpop.f32.mrb[13].mxu0 }
 0x7d1   : > { %v3096_v37 = vpop.f32.mrb[14].mxu0 }
 0x7d2   : > { %v3097_v49 = vadd.f32 %v8189_v30, %v3096_v37  ;;  %v8860_v54 = vpop.f32.mrb[15].mxu0  ;;  %v3100_v57 = vadd.f32 %v9442_v55, %v3094_v47 }
 0x7d4   : > { %3104 = vadd.xlane.f32.xlu1 %v3100_v57  ;;  %v3101_v44 = vadd.f32 %v9443_v43, %v3097_v49  ;;  %v8198_v49 = vld [vmem:[%s11542_s30] ss:$0 sm:$0xff]  ;;  %s11549_s30 = sld [smem:[#allocation58_spill]] }
 0x7d6   : > { %3106 = vadd.xlane.f32.xlu0 %v3101_v44 }
 0x7ef   : > { %v3421_v56 = vpop.f32.mrb[16].mxu0 }
 0x7f0   : > { %v3422_v39 = vadd.f32 %v3421_v56, %v3294_v38  ;;  %v3423_v21 = vpop.f32.mrb[17].mxu0 }
 0x7f1   : > { %v10927_v50 = vadd.f32 %v3423_v21, %v3298_v6  ;;  %v3425_v53 = vpop.f32.mrb[18].mxu0 }
 0x7f2   : > { %v3426_v61 = vadd.f32 %v3425_v53, %v3294_v38  ;;  %v3427_v62 = vpop.f32.mrb[19].mxu0 }
 0x7f3   : > { %v10930_v42 = vadd.f32 %v3427_v62, %v3298_v6 }
 0x861   : > { %v3105_v17 = vpop.xlane.xlu1 %3104 }
 0x862   : > { %v3109_v18 = vmul.f32 0.0078125, %v3105_v17 }
 0x863   : > { %v3107_v19 = vpop.xlane.xlu0 %3106 }
 0x864   : > { %v3111_v51 = vsub.f32 %v3100_v57, %v3109_v18  ;;  %v3110_v63 = vmul.f32 0.0078125, %v3107_v19 }
 0x866   : > { %v3112_v23 = vsub.f32 %v3101_v44, %v3110_v63  ;;  %v3113_v24 = vmul.f32 %v3111_v51, %v3111_v51  ;;  %v8199_v44 = vld [vmem:[%s11543_s24] ss:$0 sm:$0xff] }
 0x868   : > { %3115 = vadd.xlane.f32.xlu0 %v3113_v24  ;;  %v3114_v25 = vmul.f32 %v3112_v23, %v3112_v23 }
 0x86a   : > { %3117 = vadd.xlane.f32.xlu1 %v3114_v25 }
 0x87b   : > { %3726 = vrot.lane.b32.xlu1 %v3426_v61, %s9914_s6 }
 0x87e   : > { %3724 = vrot.lane.b32.xlu0 %v3422_v39, %s9914_s6 }
 0x87f   : > { %3730 = vrot.lane.b32.xlu1 %v3422_v39, %s9915_s1 }
 0x882   : > { %3732 = vrot.lane.b32.xlu0 %v3426_v61, %s9915_s1 }
 0x883   : > { %3736 = vrot.lane.b32.xlu1 %v3422_v39, %s9916_s14 }
 0x886   : > { %3738 = vrot.lane.b32.xlu0 %v3426_v61, %s9916_s14 }
 0x8f5   : > { %v3116_v40 = vpop.xlane.xlu0 %3115 }
 0x8f6   : > { %v3119_v28 = vmul.f32 0.0078125, %v3116_v40 }
 0x8f7   : > { %v3118_v30 = vpop.xlane.xlu1 %3117 }
 0x8f8   : > { %v3121_v20 = vadd.f32 1e-05, %v3119_v28  ;;  %v3120_v47 = vmul.f32 0.0078125, %v3118_v30 }
 0x8f9   : > { %v3725_v48 = vpop.permute.xlu0 %3724 }
 0x8fa   : > { %9398 = vrsqrt.f32 %v3121_v20  ;;  %v3122_v26 = vadd.f32 1e-05, %v3120_v47 }
 0x8fb   : > { %v3727_v59 = vpop.permute.xlu1 %3726 }
 0x8fc   : > { %9400 = vrsqrt.f32 %v3122_v26 }
 0x8fd   : > { %v3733_v60 = vpop.permute.xlu0 %3732 }
 0x8fe   : > { %v3810_v3 = vcombine.low %v3426_v61, %v3733_v60  ;;  %v3811_v52 = vcombine.high %v3426_v61, %v3733_v60 }
 0x8ff   : > { %v3731_v4 = vpop.permute.xlu1 %3730 }
 0x900   : > { %v3742_v5 = vcombine.low %v3422_v39, %v3731_v4  ;;  %v3743_v7 = vcombine.high %v3422_v39, %v3731_v4  ;;  %v3818_v10 = vrot.slane %v3810_v3, %v10600_v2  ;;  %v3825_v16 = vrot.slane %v3811_v52, %v10600_v2 }
 0x901   : > { %v3739_v9 = vpop.permute.xlu0 %3738 }
 0x902   : > { %v3826_v12 = vcombine.low %v3727_v59, %v3739_v9  ;;  %v3827_v13 = vcombine.high %v3727_v59, %v3739_v9  ;;  %v3750_v14 = vrot.slane %v3742_v5, %v10600_v2  ;;  %v3757_v15 = vrot.slane %v3743_v7, %v10600_v2 }
 0x903   : > { %v3737_v17 = vpop.permute.xlu1 %3736 }
 0x904   : > { %v9399_v37 = vpop.eup %9398  ;;  %v3758_v18 = vcombine.low %v3725_v48, %v3737_v17  ;;  %v3759_v19 = vcombine.high %v3725_v48, %v3737_v17  ;;  %v3841_v63 = vrot.slane %v3827_v13, %v10600_v2 }
 0x905   : > { %v3125_v54 = vmul.f32 %v9399_v37, %v3111_v51  ;;  %v3834_v51 = vrot.slane %v3826_v12, %v10600_v2 }
 0x906   : > { %v9401_v55 = vpop.eup %9400  ;;  %v3773_v24 = vrot.slane %v3759_v19, %v10600_v2  ;;  %v3858_v29 = vcombine.low %v3825_v16, %v3841_v63  ;;  %v3859_v31 = vcombine.high %v3825_v16, %v3841_v63 }
 0x907   : > { %v3126_v57 = vmul.f32 %v9401_v55, %v3112_v23  ;;  %v3133_v43 = vmul.f32 %v8198_v49, %v3125_v54  ;;  %v3766_v23 = vrot.slane %v3758_v18, %v10600_v2  ;;  %v3842_v25 = vcombine.low %v3818_v10, %v3834_v51 }
 0x908   : > { %v3843_v27 = vcombine.high %v3818_v10, %v3834_v51  ;;  %v3790_v11 = vcombine.low %v3757_v15, %v3773_v24  ;;  %v3791_v22 = vcombine.high %v3757_v15, %v3773_v24  ;;  %v3866_v56 = vrot.slane %v3858_v29, %v10603_v8 }
 0x909   : > { %v3134_v45 = vmul.f32 %v8198_v49, %v3126_v57  ;;  %v10943_v46 = vadd.f32 %v8199_v44, %v3133_v43  ;;  %v3774_v32 = vcombine.low %v3750_v14, %v3766_v23  ;;  %v3775_v35 = vcombine.high %v3750_v14, %v3766_v23 }
 0x90a   : > { %v3850_v38 = vrot.slane %v3842_v25, %v10603_v8  ;;  %v3857_v6 = vrot.slane %v3843_v27, %v10603_v8  ;;  %v3873_v39 = vrot.slane %v3859_v31, %v10603_v8  ;;  %v3798_v61 = vrot.slane %v3790_v11, %v10603_v8 }
 0x90b   : > { %v10945_v58 = vadd.f32 %v8199_v44, %v3134_v45  ;;  %v3782_v21 = vrot.slane %v3774_v32, %v10603_v8  ;;  %v3789_v53 = vrot.slane %v3775_v35, %v10603_v8  ;;  %v3805_v62 = vrot.slane %v3791_v22, %v10603_v8 }
 0x90c   : > { %v3946_v40 = vcombine.low %v3850_v38, %v3857_v6  ;;  %v8232_v28 = vcombine.high %v3850_v38, %v3857_v6  ;;  %v3962_v30 = vcombine.low %v3866_v56, %v3873_v39  ;;  %v8233_v20 = vcombine.high %v3866_v56, %v3873_v39  ;;  %v8200_v38 = vld [vmem:[%s11544_s17] ss:$0 sm:$0xff] }
 0x90d   : > { %v3194_v41 = vpack.c.bf16 %v10945_v58, %v10943_v46  ;;  %v3878_v47 = vcombine.low %v3782_v21, %v3789_v53  ;;  %v8230_v26 = vcombine.high %v3782_v21, %v3789_v53  ;;  %v3894_v37 = vcombine.low %v3798_v61, %v3805_v62 }
 0x90e   : > { %v8231_v49 = vcombine.high %v3798_v61, %v3805_v62  ;;  %v3953_v54 = vrot.slane %v3946_v40, %v10600_v2  ;;  %v3961_v55 = vrot.slane %v8232_v28, %v10600_v2  ;;  %v3969_v57 = vrot.slane %v3962_v30, %v10600_v2 }
 0x90f   : > { %8878 = vmatmul.mubr.bf16.vlgmr.msra.gmra.mrb[28].mxu1 %v3194_v41  ;;  %v3977_v43 = vrot.slane %v8233_v20, %v10600_v2  ;;  %v3885_v44 = vrot.slane %v3878_v47, %v10600_v2  ;;  %v3893_v45 = vrot.slane %v8230_v26, %v10600_v2  ;;  %v3901_v41 = vrot.slane %v3894_v37, %v10600_v2 }
 0x910   : > { %8883 = vmatprep.mubr.msk.bf16.mxu1 %vm9912_vm0, %v9911_v0  ;;  %v3909_v48 = vrot.slane %v8231_v49, %v10600_v2  ;;  %v3978_v3 = vcombine.low %v3953_v54, %v3961_v55  ;;  %v3979_v7 = vcombine.high %v3953_v54, %v3961_v55 }
 0x911   : > { %v3910_v59 = vcombine.low %v3885_v44, %v3893_v45  ;;  %v3994_v4 = vcombine.low %v3969_v57, %v3977_v43  ;;  %v3911_v52 = vcombine.high %v3885_v44, %v3893_v45  ;;  %v3995_v9 = vcombine.high %v3969_v57, %v3977_v43 }
 0x912   : > { %v3926_v60 = vcombine.low %v3901_v41, %v3909_v48  ;;  %v3927_v5 = vcombine.high %v3901_v41, %v3909_v48  ;;  %v3986_v13 = vrot.slane %v3978_v3, %v10603_v8  ;;  %v3993_v17 = vrot.slane %v3979_v7, %v10603_v8 }
 0x913   : > { %v3918_v10 = vrot.slane %v3910_v59, %v10603_v8  ;;  %v4002_v14 = vrot.slane %v3994_v4, %v10603_v8  ;;  %v3925_v15 = vrot.slane %v3911_v52, %v10603_v8  ;;  %v4009_v18 = vrot.slane %v3995_v9, %v10603_v8 }
 0x914   : > { %v3934_v12 = vrot.slane %v3926_v60, %v10603_v8  ;;  %v3941_v16 = vrot.slane %v3927_v5, %v10603_v8 }
 0x915   : > { %v4010_v51 = vcombine.low %v3986_v13, %v4002_v14  ;;  %v4011_v23 = vcombine.high %v3986_v13, %v4002_v14  ;;  %v4012_v25 = vcombine.low %v3993_v17, %v4009_v18  ;;  %v4013_v29 = vcombine.high %v3993_v17, %v4009_v18 }
 0x916   : > { %v3942_v19 = vcombine.low %v3918_v10, %v3934_v12  ;;  %v3943_v63 = vcombine.high %v3918_v10, %v3934_v12  ;;  %v3944_v24 = vcombine.low %v3925_v15, %v3941_v16  ;;  %v3945_v27 = vcombine.high %v3925_v15, %v3941_v16 }
 0x918   : > { %v4310_v31 = vpack.c.bf16 %v4010_v51, %v3942_v19  ;;  %v10983_v32 = vpack.c.bf16 %v4011_v23, %v3943_v63  ;;  %v10985_v35 = vpack.c.bf16 %v4012_v25, %v3944_v24  ;;  %v10987_v11 = vpack.c.bf16 %v4013_v29, %v3945_v27 }
 0x91a   : > { %v4318_v22 = vsel %vm2222_vm1, %v4310_v31, 0 }
 0x91b   : > { %8882 = vmatpush3.bf16.xpose.msra.mxu1 %v4318_v22 }
 0x91c   : > { %8887 = vmatprep.subr.bf16.mxu1 %v9911_v0 }
 0x9e2   : > { %v3283_v6 = vpop.f32.mrb[28].mxu1 }
 0x9e3   : > { %v3284_v56 = vadd.f32 %v8200_v38, %v3283_v6  ;;  %v8879_v39 = vpop.f32.mrb[29].mxu1 }
 0x9e4   : > { %v3286_v21 = vpop.f32.mrb[30].mxu1 }
 0x9e5   : > { %v3287_v53 = vadd.f32 %v8200_v38, %v3286_v21  ;;  %v8880_v61 = vpop.f32.mrb[31].mxu1  ;;  %3432 = vrot.lane.b32.xlu1 %v3284_v56, %s9914_s6 }
 0x9e7   : > { %3434 = vrot.lane.b32.xlu0 %v3287_v53, %s9914_s6 }
 0x9e9   : > { %3438 = vrot.lane.b32.xlu1 %v3284_v56, %s9915_s1 }
 0x9eb   : > { %3440 = vrot.lane.b32.xlu0 %v3287_v53, %s9915_s1 }
 0x9ed   : > { %3444 = vrot.lane.b32.xlu1 %v3284_v56, %s9916_s14 }
 0x9ef   : > { %3446 = vrot.lane.b32.xlu0 %v3287_v53, %s9916_s14 }
 0xa57   : > { %v3433_v62 = vpop.permute.xlu1 %3432 }
 0xa59   : > { %v3435_v40 = vpop.permute.xlu0 %3434 }
 0xa5b   : > { %v3439_v28 = vpop.permute.xlu1 %3438 }
 0xa5c   : > { %v3450_v30 = vcombine.low %v3284_v56, %v3439_v28  ;;  %v3451_v20 = vcombine.high %v3284_v56, %v3439_v28 }
 0xa5d   : > { %v3441_v47 = vpop.permute.xlu0 %3440 }
 0xa5e   : > { %v3458_v54 = vrot.slane %v3450_v30, %v10600_v2  ;;  %v3465_v55 = vrot.slane %v3451_v20, %v10600_v2  ;;  %v3518_v57 = vcombine.low %v3287_v53, %v3441_v47  ;;  %v3519_v43 = vcombine.high %v3287_v53, %v3441_v47 }
 0xa5f   : > { %v3445_v26 = vpop.permute.xlu1 %3444 }
 0xa60   : > { %v3466_v37 = vcombine.low %v3433_v62, %v3445_v26  ;;  %v3467_v49 = vcombine.high %v3433_v62, %v3445_v26  ;;  %v3526_v5 = vrot.slane %v3518_v57, %v10600_v2  ;;  %v3533_v7 = vrot.slane %v3519_v43, %v10600_v2 }
 0xa61   : > { %v3447_v44 = vpop.permute.xlu0 %3446 }
 0xa62   : > { %v3474_v45 = vrot.slane %v3466_v37, %v10600_v2  ;;  %v3481_v41 = vrot.slane %v3467_v49, %v10600_v2  ;;  %v3534_v48 = vcombine.low %v3435_v40, %v3447_v44  ;;  %v3535_v59 = vcombine.high %v3435_v40, %v3447_v44 }
 0xa64   : > { %v3482_v60 = vcombine.low %v3458_v54, %v3474_v45  ;;  %v3483_v3 = vcombine.high %v3458_v54, %v3474_v45  ;;  %v3498_v4 = vcombine.low %v3465_v55, %v3481_v41  ;;  %v3499_v52 = vcombine.high %v3465_v55, %v3481_v41 }
 0xa65   : > { %v3542_v9 = vrot.slane %v3534_v48, %v10600_v2  ;;  %v3549_v10 = vrot.slane %v3535_v59, %v10600_v2  ;;  %v4365_v41 = vsel %vm2222_vm1, %v10983_v32, 0 }
 0xa66   : > { %v3490_v12 = vrot.slane %v3482_v60, %v10603_v8  ;;  %v3497_v13 = vrot.slane %v3483_v3, %v10603_v8  ;;  %v3506_v14 = vrot.slane %v3498_v4, %v10603_v8  ;;  %v3513_v15 = vrot.slane %v3499_v52, %v10603_v8 }
 0xa67   : > { %v3550_v16 = vcombine.low %v3526_v5, %v3542_v9  ;;  %v3551_v17 = vcombine.high %v3526_v5, %v3542_v9  ;;  %v3566_v18 = vcombine.low %v3533_v7, %v3549_v10  ;;  %v3567_v19 = vcombine.high %v3533_v7, %v3549_v10 }
 0xa68   : > { %v3586_v51 = vcombine.low %v3490_v12, %v3497_v13  ;;  %v8226_v63 = vcombine.high %v3490_v12, %v3497_v13  ;;  %v3602_v23 = vcombine.low %v3506_v14, %v3513_v15  ;;  %v8227_v24 = vcombine.high %v3506_v14, %v3513_v15 }
 0xa69   : > { %v3558_v25 = vrot.slane %v3550_v16, %v10603_v8  ;;  %v3565_v27 = vrot.slane %v3551_v17, %v10603_v8  ;;  %v3574_v29 = vrot.slane %v3566_v18, %v10603_v8  ;;  %v3581_v31 = vrot.slane %v3567_v19, %v10603_v8 }
 0xa6a   : > { %v3593_v22 = vrot.slane %v3586_v51, %v10600_v2  ;;  %v3601_v38 = vrot.slane %v8226_v63, %v10600_v2  ;;  %v3609_v6 = vrot.slane %v3602_v23, %v10600_v2  ;;  %v3617_v56 = vrot.slane %v8227_v24, %v10600_v2 }
 0xa6b   : > { %v3654_v39 = vcombine.low %v3558_v25, %v3565_v27  ;;  %v8228_v21 = vcombine.high %v3558_v25, %v3565_v27  ;;  %v3670_v53 = vcombine.low %v3574_v29, %v3581_v31  ;;  %v8229_v61 = vcombine.high %v3574_v29, %v3581_v31 }
 0xa6c   : > { %v3618_v62 = vcombine.low %v3593_v22, %v3601_v38  ;;  %v3634_v40 = vcombine.low %v3609_v6, %v3617_v56  ;;  %v3619_v3 = vcombine.high %v3593_v22, %v3601_v38  ;;  %v3635_v4 = vcombine.high %v3609_v6, %v3617_v56 }
 0xa6d   : > { %v3661_v28 = vrot.slane %v3654_v39, %v10600_v2  ;;  %v3669_v30 = vrot.slane %v8228_v21, %v10600_v2  ;;  %v3677_v20 = vrot.slane %v3670_v53, %v10600_v2  ;;  %v3685_v47 = vrot.slane %v8229_v61, %v10600_v2 }
 0xa6e   : > { %v3626_v26 = vrot.slane %v3618_v62, %v10603_v8  ;;  %v3642_v37 = vrot.slane %v3634_v40, %v10603_v8  ;;  %v3633_v10 = vrot.slane %v3619_v3, %v10603_v8  ;;  %v3649_v32 = vrot.slane %v3635_v4, %v10603_v8 }
 0xa6f   : > { %v3686_v49 = vcombine.low %v3661_v28, %v3669_v30  ;;  %v3702_v54 = vcombine.low %v3677_v20, %v3685_v47  ;;  %v3687_v48 = vcombine.high %v3661_v28, %v3669_v30  ;;  %v3703_v59 = vcombine.high %v3677_v20, %v3685_v47 }
 0xa70   : > { %v3650_v43 = vcombine.low %v3626_v26, %v3642_v37  ;;  %v3651_v52 = vcombine.high %v3626_v26, %v3642_v37  ;;  %v4412_v12 = vsel %vm2222_vm1, %v10985_v35, 0  ;;  %v3652_v14 = vcombine.low %v3633_v10, %v3649_v32 }
 0xa71   : > { %v3694_v55 = vrot.slane %v3686_v49, %v10603_v8  ;;  %v3710_v57 = vrot.slane %v3702_v54, %v10603_v8  ;;  %v3701_v5 = vrot.slane %v3687_v48, %v10603_v8  ;;  %v3717_v7 = vrot.slane %v3703_v59, %v10603_v8 }
 0xa72   : > { %v4459_v16 = vsel %vm2222_vm1, %v10987_v11, 0  ;;  %v3653_v35 = vcombine.high %v3633_v10, %v3649_v32 }
 0xa73   : > { %v3718_v44 = vcombine.low %v3694_v55, %v3710_v57  ;;  %v3719_v60 = vcombine.high %v3694_v55, %v3710_v57  ;;  %v3720_v13 = vcombine.low %v3701_v5, %v3717_v7  ;;  %v3721_v17 = vcombine.high %v3701_v5, %v3717_v7 }
 0xa75   : > { %v4306_v45 = vpack.c.bf16 %v3718_v44, %v3650_v43  ;;  %v4307_v9 = vpack.c.bf16 %v3719_v60, %v3651_v52  ;;  %v4308_v15 = vpack.c.bf16 %v3720_v13, %v3652_v14  ;;  %v4309_v18 = vpack.c.bf16 %v3721_v17, %v3653_v35 }
 0xa77   : > { %8884 = vmatmul.mubr.msk.bf16.vlgmr.msra.gmra.mrb[32].mxu1 %vm2222_vm1, %v4306_v45 }
 0xa78   : > { %8888 = vmatpush3.bf16.xpose.msra.mxu1 %v4365_v41  ;;  %8889 = vmatprep.mubr.msk.bf16.mxu1 %vm9912_vm0, %v9911_v0 }
 0xa79   : > { %8893 = vmatprep.subr.bf16.mxu1 %v9911_v0 }
 0xa7f   : > { %8890 = vmatmul.mubr.msk.bf16.vlgmr.msra.gmra.mrb[36].mxu1 %vm2222_vm1, %v4307_v9 }
 0xa80   : > { %8894 = vmatpush3.bf16.xpose.msra.mxu1 %v4412_v12  ;;  %8895 = vmatprep.mubr.msk.bf16.mxu1 %vm9912_vm0, %v9911_v0 }
 0xa81   : > { %8899 = vmatprep.subr.bf16.mxu1 %v9911_v0 }
 0xa87   : > { %8896 = vmatmul.mubr.msk.bf16.vlgmr.msra.gmra.mrb[40].mxu1 %vm2222_vm1, %v4308_v15 }
 0xa88   : > { %8900 = vmatpush3.bf16.xpose.msra.mxu1 %v4459_v16  ;;  %8901 = vmatprep.mubr.msk.bf16.mxu1 %vm9912_vm0, %v9911_v0 }
 0xa89   : > { %8911 = vmatprep.subr.bf16.mxu1 %v9911_v0 }
 0xa8f   : > { %8902 = vmatmul.mubr.msk.bf16.vlgmr.msra.gmra.mrb[44].mxu1 %vm2222_vm1, %v4309_v18 }
 0xa90   : > { %8913 = vmatprep.mubr.msk.bf16.mxu1 %vm9912_vm0, %v9911_v0 }
 0xb4a   : > { %v4354_v19 = vpop.f32.mrb[32].mxu1 }
 0xb4b   : > { %v4502_v51 = vmul.f32 0.17677669, %v4354_v19  ;;  %v8885_v63 = vpop.f32.mrb[33].mxu1 }
 0xb4c   : > { %v4357_v23 = vpop.f32.mrb[34].mxu1 }
 0xb4d   : > { %v4503_v24 = vmul.f32 0.17677669, %v4357_v23  ;;  %v8886_v11 = vpop.f32.mrb[35].mxu1  ;;  %v4510_v25 = vsel %vm2427_vm2, %v4502_v51, -inf }
 0xb4e   : > { %4511 = vmax.xlane.f32.xlu1 %v4510_v25 }
 0xb4f   : > { %v4513_v27 = vsel %vm2427_vm2, %v4503_v24, -inf }
 0xb50   : > { %4514 = vmax.xlane.f32.xlu0 %v4513_v27 }
 0xb52   : > { %v4401_v29 = vpop.f32.mrb[36].mxu1 }
 0xb53   : > { %v4504_v31 = vmul.f32 0.17677669, %v4401_v29  ;;  %v8891_v22 = vpop.f32.mrb[37].mxu1 }
 0xb54   : > { %v4404_v38 = vpop.f32.mrb[38].mxu1 }
 0xb55   : > { %v4505_v6 = vmul.f32 0.17677669, %v4404_v38  ;;  %v8892_v56 = vpop.f32.mrb[39].mxu1  ;;  %v4516_v39 = vsel %vm2427_vm2, %v4504_v31, -inf }
 0xb56   : > { %4517 = vmax.xlane.f32.xlu0 %v4516_v39 }
 0xb57   : > { %v4519_v21 = vsel %vm2427_vm2, %v4505_v6, -inf }
 0xb58   : > { %4520 = vmax.xlane.f32.xlu1 %v4519_v21 }
 0xb5a   : > { %v4448_v53 = vpop.f32.mrb[40].mxu1 }
 0xb5b   : > { %v4506_v61 = vmul.f32 0.17677669, %v4448_v53  ;;  %v8897_v62 = vpop.f32.mrb[41].mxu1 }
 0xb5c   : > { %v4451_v40 = vpop.f32.mrb[42].mxu1 }
 0xb5d   : > { %v4507_v28 = vmul.f32 0.17677669, %v4451_v40  ;;  %v8898_v30 = vpop.f32.mrb[43].mxu1  ;;  %v4522_v20 = vsel %vm2427_vm2, %v4506_v61, -inf }
 0xb5e   : > { %4523 = vmax.xlane.f32.xlu0 %v4522_v20 }
 0xb5f   : > { %v4525_v47 = vsel %vm2427_vm2, %v4507_v28, -inf }
 0xb60   : > { %4526 = vmax.xlane.f32.xlu1 %v4525_v47 }
 0xb62   : > { %v4495_v26 = vpop.f32.mrb[44].mxu1 }
 0xb63   : > { %v4508_v37 = vmul.f32 0.17677669, %v4495_v26  ;;  %v8903_v49 = vpop.f32.mrb[45].mxu1 }
 0xb64   : > { %v4498_v54 = vpop.f32.mrb[46].mxu1 }
 0xb65   : > { %v4509_v55 = vmul.f32 0.17677669, %v4498_v54  ;;  %v8904_v57 = vpop.f32.mrb[47].mxu1  ;;  %v4528_v43 = vsel %vm2427_vm2, %v4508_v37, -inf }
 0xb66   : > { %4529 = vmax.xlane.f32.xlu0 %v4528_v43 }
 0xb67   : > { %v4531_v44 = vsel %vm2427_vm2, %v4509_v55, -inf }
 0xb68   : > { %4532 = vmax.xlane.f32.xlu1 %v4531_v44 }
 0xb79   : > { %4018 = vrot.lane.b32.xlu1 %v10930_v42, %s9914_s6 }
 0xb7c   : > { %4016 = vrot.lane.b32.xlu0 %v10927_v50, %s9914_s6 }
 0xb7d   : > { %4022 = vrot.lane.b32.xlu1 %v10927_v50, %s9915_s1 }
 0xb80   : > { %4024 = vrot.lane.b32.xlu0 %v10930_v42, %s9915_s1 }
 0xb81   : > { %4028 = vrot.lane.b32.xlu1 %v10927_v50, %s9916_s14 }
 0xb84   : > { %4030 = vrot.lane.b32.xlu0 %v10930_v42, %s9916_s14 }
 0xbdb   : > { %v4512_v45 = vpop.xlane.xlu1 %4511 }
 0xbdc   : > { %v4534_v41 = vsub.f32 %v4502_v51, %v4512_v45 }
 0xbdd   : > { %v4515_v48 = vpop.xlane.xlu0 %4514 }
 0xbde   : > { %v4542_v59 = vmul.f32 1.442695, %v4534_v41  ;;  %v4535_v60 = vsub.f32 %v4503_v24, %v4515_v48 }
 0xbe0   : > { %9402 = vpow2.f32 %v4542_v59  ;;  %v4544_v3 = vmul.f32 1.442695, %v4535_v60 }
 0xbe2   : > { %9404 = vpow2.f32 %v4544_v3 }
 0xbe3   : > { %v4518_v4 = vpop.xlane.xlu0 %4517 }
 0xbe4   : > { %v4536_v52 = vsub.f32 %v4504_v31, %v4518_v4 }
 0xbe5   : > { %v4521_v5 = vpop.xlane.xlu1 %4520 }
 0xbe6   : > { %v4546_v7 = vmul.f32 1.442695, %v4536_v52  ;;  %v4537_v9 = vsub.f32 %v4505_v6, %v4521_v5 }
 0xbe8   : > { %9406 = vpow2.f32 %v4546_v7  ;;  %v4548_v10 = vmul.f32 1.442695, %v4537_v9 }
 0xbea   : > { %v11073_v32 = vpop.eup %9402  ;;  %9408 = vpow2.f32 %v4548_v10 }
 0xbeb   : > { %v4524_v12 = vpop.xlane.xlu0 %4523  ;;  %v4558_v13 = vsel %vm2427_vm2, %v11073_v32, 0.0 }
 0xbec   : > { %v11077_v14 = vpop.eup %9404  ;;  %v4538_v15 = vsub.f32 %v4506_v61, %v4524_v12  ;;  %4559 = vadd.xlane.f32.xlu0 %v4558_v13 }
 0xbed   : > { %v4527_v16 = vpop.xlane.xlu1 %4526  ;;  %v4561_v17 = vsel %vm2427_vm2, %v11077_v14, 0.0 }
 0xbee   : > { %v4550_v35 = vmul.f32 1.442695, %v4538_v15  ;;  %v4539_v18 = vsub.f32 %v4507_v28, %v4527_v16  ;;  %4562 = vadd.xlane.f32.xlu1 %v4561_v17 }
 0xbf0   : > { %9410 = vpow2.f32 %v4550_v35  ;;  %v4552_v19 = vmul.f32 1.442695, %v4539_v18 }
 0xbf2   : > { %v11081_v51 = vpop.eup %9406  ;;  %9412 = vpow2.f32 %v4552_v19 }
 0xbf3   : > { %v4530_v63 = vpop.xlane.xlu0 %4529  ;;  %v4564_v23 = vsel %vm2427_vm2, %v11081_v51, 0.0 }
 0xbf4   : > { %v11085_v24 = vpop.eup %9408  ;;  %v4540_v11 = vsub.f32 %v4508_v37, %v4530_v63  ;;  %4565 = vadd.xlane.f32.xlu0 %v4564_v23 }
 0xbf5   : > { %v4533_v25 = vpop.xlane.xlu1 %4532  ;;  %v4567_v27 = vsel %vm2427_vm2, %v11085_v24, 0.0 }
 0xbf6   : > { %v4554_v29 = vmul.f32 1.442695, %v4540_v11  ;;  %v4541_v31 = vsub.f32 %v4509_v55, %v4533_v25  ;;  %4568 = vadd.xlane.f32.xlu1 %v4567_v27 }
 0xbf7   : > { %v4017_v22 = vpop.permute.xlu0 %4016 }
 0xbf8   : > { %9414 = vpow2.f32 %v4554_v29  ;;  %v4556_v38 = vmul.f32 1.442695, %v4541_v31 }
 0xbf9   : > { %v4019_v6 = vpop.permute.xlu1 %4018 }
 0xbfa   : > { %v11089_v56 = vpop.eup %9410  ;;  %9416 = vpow2.f32 %v4556_v38 }
 0xbfb   : > { %v4025_v39 = vpop.permute.xlu0 %4024  ;;  %v4570_v21 = vsel %vm2427_vm2, %v11089_v56, 0.0 }
 0xbfc   : > { %v11093_v53 = vpop.eup %9412  ;;  %4571 = vadd.xlane.f32.xlu1 %v4570_v21  ;;  %v4102_v61 = vcombine.low %v10930_v42, %v4025_v39  ;;  %v4103_v62 = vcombine.high %v10930_v42, %v4025_v39 }
 0xbfd   : > { %v4023_v40 = vpop.permute.xlu1 %4022  ;;  %v4573_v28 = vsel %vm2427_vm2, %v11093_v53, 0.0 }
 0xbfe   : > { %4574 = vadd.xlane.f32.xlu0 %v4573_v28  ;;  %v4034_v30 = vcombine.low %v10927_v50, %v4023_v40  ;;  %v4110_v37 = vrot.slane %v4102_v61, %v10600_v2  ;;  %v4117_v49 = vrot.slane %v4103_v62, %v10600_v2  ;;  %v4035_v54 = vcombine.high %v10927_v50, %v4023_v40 }
 0xbff   : > { %v4031_v20 = vpop.permute.xlu0 %4030 }
 0xc00   : > { %v4118_v47 = vcombine.low %v4019_v6, %v4031_v20  ;;  %v4119_v26 = vcombine.high %v4019_v6, %v4031_v20  ;;  %v4042_v41 = vrot.slane %v4034_v30, %v10600_v2  ;;  %v4049_v52 = vrot.slane %v4035_v54, %v10600_v2 }
 0xc01   : > { %v4029_v55 = vpop.permute.xlu1 %4028 }
 0xc02   : > { %v11103_v57 = vpop.eup %9414  ;;  %v4126_v42 = vrot.slane %v4118_v47, %v10600_v2  ;;  %v4133_v43 = vrot.slane %v4119_v26, %v10600_v2  ;;  %v4050_v44 = vcombine.low %v4017_v22, %v4029_v55  ;;  %v4051_v45 = vcombine.high %v4017_v22, %v4029_v55 }
 0xc03   : > { %v4576_v48 = vsel %vm2427_vm2, %v11103_v57, 0.0 }
 0xc04   : > { %v11110_v59 = vpop.eup %9416  ;;  %v4134_v60 = vcombine.low %v4110_v37, %v4126_v42  ;;  %v4135_v3 = vcombine.high %v4110_v37, %v4126_v42  ;;  %v4150_v4 = vcombine.low %v4117_v49, %v4133_v43  ;;  %v4151_v50 = vcombine.high %v4117_v49, %v4133_v43  ;;  %4577 = vadd.xlane.f32.xlu0 %v4576_v48 }
 0xc05   : > { %v4058_v5 = vrot.slane %v4050_v44, %v10600_v2  ;;  %v4065_v7 = vrot.slane %v4051_v45, %v10600_v2  ;;  %v4579_v9 = vsel %vm2427_vm2, %v11110_v59, 0.0 }
 0xc06   : > { %v4142_v10 = vrot.slane %v4134_v60, %v10603_v8  ;;  %v4149_v12 = vrot.slane %v4135_v3, %v10603_v8  ;;  %v4158_v13 = vrot.slane %v4150_v4, %v10603_v8  ;;  %v4165_v15 = vrot.slane %v4151_v50, %v10603_v8  ;;  %4580 = vadd.xlane.f32.xlu1 %v4579_v9 }
 0xc07   : > { %v4066_v16 = vcombine.low %v4042_v41, %v4058_v5  ;;  %v4067_v17 = vcombine.high %v4042_v41, %v4058_v5  ;;  %v4082_v35 = vcombine.low %v4049_v52, %v4065_v7  ;;  %v4083_v18 = vcombine.high %v4049_v52, %v4065_v7 }
 0xc08   : > { %v4238_v19 = vcombine.low %v4142_v10, %v4149_v12  ;;  %v8236_v63 = vcombine.high %v4142_v10, %v4149_v12  ;;  %v4254_v23 = vcombine.low %v4158_v13, %v4165_v15  ;;  %v8237_v11 = vcombine.high %v4158_v13, %v4165_v15 }
 0xc09   : > { %v4074_v25 = vrot.slane %v4066_v16, %v10603_v8  ;;  %v4081_v27 = vrot.slane %v4067_v17, %v10603_v8  ;;  %v4090_v29 = vrot.slane %v4082_v35, %v10603_v8  ;;  %v4097_v31 = vrot.slane %v4083_v18, %v10603_v8 }
 0xc0a   : > { %v4245_v22 = vrot.slane %v4238_v19, %v10600_v2  ;;  %v4253_v38 = vrot.slane %v8236_v63, %v10600_v2  ;;  %v4261_v6 = vrot.slane %v4254_v23, %v10600_v2  ;;  %v4269_v39 = vrot.slane %v8237_v11, %v10600_v2 }
 0xc0b   : > { %v4170_v21 = vcombine.low %v4074_v25, %v4081_v27  ;;  %v8234_v61 = vcombine.high %v4074_v25, %v4081_v27  ;;  %v4186_v62 = vcombine.low %v4090_v29, %v4097_v31  ;;  %v8235_v40 = vcombine.high %v4090_v29, %v4097_v31 }
 0xc0c   : > { %v4270_v28 = vcombine.low %v4245_v22, %v4253_v38  ;;  %v4286_v30 = vcombine.low %v4261_v6, %v4269_v39  ;;  %v4271_v20 = vcombine.high %v4245_v22, %v4253_v38  ;;  %v4287_v47 = vcombine.high %v4261_v6, %v4269_v39 }
 0xc0d   : > { %v4177_v26 = vrot.slane %v4170_v21, %v10600_v2  ;;  %v4185_v37 = vrot.slane %v8234_v61, %v10600_v2  ;;  %v4193_v49 = vrot.slane %v4186_v62, %v10600_v2  ;;  %v4201_v54 = vrot.slane %v8235_v40, %v10600_v2 }
 0xc0e   : > { %v4278_v55 = vrot.slane %v4270_v28, %v10603_v8  ;;  %v4294_v42 = vrot.slane %v4286_v30, %v10603_v8  ;;  %v4285_v43 = vrot.slane %v4271_v20, %v10603_v8  ;;  %v4301_v44 = vrot.slane %v4287_v47, %v10603_v8 }
 0xc0f   : > { %v4202_v45 = vcombine.low %v4177_v26, %v4185_v37  ;;  %v4218_v41 = vcombine.low %v4193_v49, %v4201_v54  ;;  %v4203_v48 = vcombine.high %v4177_v26, %v4185_v37  ;;  %v4219_v60 = vcombine.high %v4193_v49, %v4201_v54 }
 0xc10   : > { %v4304_v3 = vcombine.low %v4285_v43, %v4301_v44  ;;  %v4305_v4 = vcombine.high %v4285_v43, %v4301_v44  ;;  %v4302_v9 = vcombine.low %v4278_v55, %v4294_v42  ;;  %v4303_v10 = vcombine.high %v4278_v55, %v4294_v42  ;;  %v9232_v42 = vld [vmem:[#allocation17 + $0x10] sm:$0xff]   ;;  %v9233_v43 = vld [vmem:[#allocation17 + $0x18] sm:$0xff]  }
 0xc11   : > { %v4210_v50 = vrot.slane %v4202_v45, %v10603_v8  ;;  %v4226_v52 = vrot.slane %v4218_v41, %v10603_v8  ;;  %v4217_v5 = vrot.slane %v4203_v48, %v10603_v8  ;;  %v4233_v7 = vrot.slane %v4219_v60, %v10603_v8 }
 0xc13   : > { %v4234_v12 = vcombine.low %v4210_v50, %v4226_v52  ;;  %v4235_v13 = vcombine.high %v4210_v50, %v4226_v52  ;;  %v4236_v15 = vcombine.low %v4217_v5, %v4233_v7  ;;  %v4237_v16 = vcombine.high %v4217_v5, %v4233_v7 }
 0xc15   : > { %v4602_v17 = vpack.c.bf16 %v4302_v9, %v4234_v12  ;;  %v4603_v35 = vpack.c.bf16 %v4303_v10, %v4235_v13  ;;  %v4604_v18 = vpack.c.bf16 %v4304_v3, %v4236_v15  ;;  %v4605_v19 = vpack.c.bf16 %v4305_v4, %v4237_v16 }
 0xc17   : > { %8906 = vmatpush3.bf16.msra.mxu0 %v4602_v17  ;;  %8912 = vmatpush3.bf16.msra.mxu1 %v4603_v35 }
 0xc18   : > { %8917 = vmatprep.subr.bf16.mxu0 %v9911_v0  ;;  %8923 = vmatprep.subr.bf16.mxu1 %v9911_v0 }
 0xc79   : > { %v4560_v63 = vpop.xlane.xlu0 %4559 }
 0xc7a   : > { %9418 = vrcp.f32 %v4560_v63 }
 0xc7b   : > { %v4563_v23 = vpop.xlane.xlu1 %4562 }
 0xc7c   : > { %9420 = vrcp.f32 %v4563_v23 }
 0xc81   : > { %v4566_v11 = vpop.xlane.xlu0 %4565 }
 0xc82   : > { %9422 = vrcp.f32 %v4566_v11 }
 0xc83   : > { %v4569_v25 = vpop.xlane.xlu1 %4568 }
 0xc84   : > { %v9419_v27 = vpop.eup %9418  ;;  %9424 = vrcp.f32 %v4569_v25 }
 0xc85   : > { %v4590_v31 = vmul.f32 %v9419_v27, %v11073_v32 }
 0xc86   : > { %v9421_v29 = vpop.eup %9420 }
 0xc87   : > { %v4591_v22 = vmul.f32 %v9421_v29, %v11077_v14 }
 0xc89   : > { %v4572_v38 = vpop.xlane.xlu1 %4571  ;;  %v4598_v6 = vpack.c.bf16 %v4591_v22, %v4590_v31 }
 0xc8a   : > { %9426 = vrcp.f32 %v4572_v38 }
 0xc8b   : > { %v4575_v39 = vpop.xlane.xlu0 %4574  ;;  %8908 = vmatmul.mubr.msk.bf16.vlgmr.msra.gmra.mrb[20].mxu0 %vm2427_vm2, %v4598_v6 }
 0xc8c   : > { %v9423_v21 = vpop.eup %9422  ;;  %9428 = vrcp.f32 %v4575_v39  ;;  %8918 = vmatpush3.bf16.msra.mxu0 %v4604_v18  ;;  %8919 = vmatprep.mubr.msk.bf16.mxu0 %vm9912_vm0, %v9911_v0 }
 0xc8d   : > { %8929 = vmatprep.subr.bf16.mxu0 %v9911_v0  ;;  %v4592_v62 = vmul.f32 %v9423_v21, %v11081_v51 }
 0xc8e   : > { %v9425_v61 = vpop.eup %9424 }
 0xc8f   : > { %v4593_v32 = vmul.f32 %v9425_v61, %v11085_v24 }
 0xc91   : > { %v4578_v14 = vpop.xlane.xlu0 %4577  ;;  %v4599_v40 = vpack.c.bf16 %v4593_v32, %v4592_v62 }
 0xc92   : > { %9430 = vrcp.f32 %v4578_v14 }
 0xc93   : > { %8914 = vmatmul.mubr.msk.bf16.vlgmr.msra.gmra.mrb[48].mxu1 %vm2427_vm2, %v4599_v40  ;;  %v4581_v28 = vpop.xlane.xlu1 %4580 }
 0xc94   : > { %v9427_v30 = vpop.eup %9426  ;;  %8924 = vmatpush3.bf16.msra.mxu1 %v4605_v19  ;;  %9432 = vrcp.f32 %v4581_v28  ;;  %8925 = vmatprep.mubr.msk.bf16.mxu1 %vm9912_vm0, %v9911_v0 }
 0xc95   : > { %v4594_v47 = vmul.f32 %v9427_v30, %v11089_v56  ;;  %v9230_v56 = vld [vmem:[#allocation17] sm:$0xff]  }
 0xc96   : > { %v9429_v20 = vpop.eup %9428 }
 0xc97   : > { %v4595_v26 = vmul.f32 %v9429_v20, %v11093_v53  ;;  %v9231_v53 = vld [vmem:[#allocation17 + $0x8] sm:$0xff]  }
 0xc99   : > { %v4600_v51 = vpack.c.bf16 %v4595_v26, %v4594_v47 }
 0xc9b   : > { %8920 = vmatmul.mubr.msk.bf16.vlgmr.msra.gmra.mrb[24].mxu0 %vm2427_vm2, %v4600_v51 }
 0xc9c   : > { %v9431_v24 = vpop.eup %9430  ;;  %8945 = vmatprep.mubr.msk.bf16.mxu0 %vm9912_vm0, %v9911_v0  ;;  %8930 = vmatpush3.bf16.msra.mxu0 %v9230_v56 }
 0xc9d   : > { %v4596_v49 = vmul.f32 %v9431_v24, %v11103_v57  ;;  %8931 = vmatprep.subr.bf16.mxu0 %v9911_v0  ;;  %v9234_v57 = vld [vmem:[#allocation17 + $0x20] sm:$0xff]  }
 0xc9e   : > { %v9433_v37 = vpop.eup %9432 }
 0xc9f   : > { %v4597_v54 = vmul.f32 %v9433_v37, %v11110_v59  ;;  %v9235_v59 = vld [vmem:[#allocation17 + $0x28] sm:$0xff]  }
 0xca0   : > { %8932 = vmatpush3.bf16.msra.mxu0 %v9231_v53 }
 0xca1   : > { %v4601_v55 = vpack.c.bf16 %v4597_v54, %v4596_v49  ;;  %8933 = vmatprep.subr.bf16.mxu0 %v9911_v0 }
 0xca3   : > { %8926 = vmatmul.mubr.msk.bf16.vlgmr.msra.gmra.mrb[52].mxu1 %vm2427_vm2, %v4601_v55 }
 0xca4   : > { %6107 = vmatprep.mubr.bf16.mxu1 %v9913_v1  ;;  %8934 = vmatpush3.bf16.msra.mxu0 %v9232_v42 }
 0xca5   : > { %8935 = vmatprep.subr.bf16.mxu0 %v9911_v0 }
 0xca8   : > { %8936 = vmatpush3.bf16.msra.mxu0 %v9233_v43 }
 0xca9   : > { %8937 = vmatprep.subr.bf16.mxu0 %v9911_v0 }
 0xcac   : > { %8938 = vmatpush3.bf16.msra.mxu0 %v9234_v57 }
 0xcad   : > { %8939 = vmatprep.subr.bf16.mxu0 %v9911_v0 }
 0xcb0   : > { %8940 = vmatpush3.bf16.msra.mxu0 %v9235_v59 }
 0xcb1   : > { %8941 = vmatprep.subr.bf16.mxu0 %v9911_v0 }
 0xd5e   : > { %v4643_v44 = vpop.f32.mrb[20].mxu0 }
 0xd5f   : > { %v8909_v45 = vpop.f32.mrb[21].mxu0 }
 0xd60   : > { %v4646_v41 = vpop.f32.mrb[22].mxu0 }
 0xd61   : > { %v8910_v48 = vpop.f32.mrb[23].mxu0 }
 0xd66   : > { %v4687_v60 = vpop.f32.mrb[48].mxu1 }
 0xd67   : > { %v8915_v3 = vpop.f32.mrb[49].mxu1 }
 0xd68   : > { %v4690_v4 = vpop.f32.mrb[50].mxu1 }
 0xd69   : > { %v8916_v50 = vpop.f32.mrb[51].mxu1 }
 0xd6e   : > { %v4731_v52 = vpop.f32.mrb[24].mxu0 }
 0xd6f   : > { %v4782_v5 = vcombine.low %v4643_v44, %v4731_v52  ;;  %v4783_v7 = vcombine.high %v4643_v44, %v4731_v52  ;;  %v8921_v9 = vpop.f32.mrb[25].mxu0 }
 0xd70   : > { %v4734_v10 = vpop.f32.mrb[26].mxu0 }
 0xd71   : > { %v4850_v12 = vcombine.low %v4646_v41, %v4734_v10  ;;  %v4851_v13 = vcombine.high %v4646_v41, %v4734_v10  ;;  %v8922_v15 = vpop.f32.mrb[27].mxu0  ;;  %v4790_v19 = vrot.slane %v4782_v5, %v10600_v2  ;;  %v4797_v63 = vrot.slane %v4783_v7, %v10600_v2  ;;  %v9236_v5 = vld [vmem:[#allocation17 + $0x30] sm:$0xff]  }
 0xd72   : > { %8942 = vmatpush3.bf16.msra.mxu0 %v9236_v5 }
 0xd73   : > { %v4858_v21 = vrot.slane %v4850_v12, %v10600_v2  ;;  %v4865_v61 = vrot.slane %v4851_v13, %v10600_v2  ;;  %8943 = vmatprep.subr.bf16.mxu0 %v9911_v0 }
 0xd76   : > { %v4775_v16 = vpop.f32.mrb[52].mxu1 }
 0xd77   : > { %v4798_v17 = vcombine.low %v4687_v60, %v4775_v16  ;;  %v4799_v35 = vcombine.high %v4687_v60, %v4775_v16  ;;  %v8927_v18 = vpop.f32.mrb[53].mxu1 }
 0xd78   : > { %v4778_v23 = vpop.f32.mrb[54].mxu1 }
 0xd79   : > { %v4806_v11 = vrot.slane %v4798_v17, %v10600_v2  ;;  %v4813_v25 = vrot.slane %v4799_v35, %v10600_v2  ;;  %v4866_v27 = vcombine.low %v4690_v4, %v4778_v23  ;;  %v4867_v29 = vcombine.high %v4690_v4, %v4778_v23  ;;  %v8928_v31 = vpop.f32.mrb[55].mxu1 }
 0xd7b   : > { %v4814_v22 = vcombine.low %v4790_v19, %v4806_v11  ;;  %v4815_v38 = vcombine.high %v4790_v19, %v4806_v11  ;;  %v4830_v6 = vcombine.low %v4797_v63, %v4813_v25  ;;  %v4831_v39 = vcombine.high %v4797_v63, %v4813_v25 }
 0xd7c   : > { %v4874_v62 = vrot.slane %v4866_v27, %v10600_v2  ;;  %v4881_v32 = vrot.slane %v4867_v29, %v10600_v2 }
 0xd7d   : > { %v4822_v14 = vrot.slane %v4814_v22, %v10603_v8  ;;  %v4829_v40 = vrot.slane %v4815_v38, %v10603_v8  ;;  %v4838_v28 = vrot.slane %v4830_v6, %v10603_v8  ;;  %v4845_v30 = vrot.slane %v4831_v39, %v10603_v8  ;;  %v9237_v38 = vld [vmem:[#allocation17 + $0x38] sm:$0xff]  }
 0xd7e   : > { %v4882_v20 = vcombine.low %v4858_v21, %v4874_v62  ;;  %v4883_v47 = vcombine.high %v4858_v21, %v4874_v62  ;;  %v4898_v26 = vcombine.low %v4865_v61, %v4881_v32  ;;  %v4899_v51 = vcombine.high %v4865_v61, %v4881_v32  ;;  %8944 = vmatpush3.bf16.msra.mxu0 %v9237_v38 }
 0xd7f   : > { %v4918_v24 = vcombine.low %v4822_v14, %v4829_v40  ;;  %v8246_v37 = vcombine.high %v4822_v14, %v4829_v40  ;;  %v4934_v49 = vcombine.low %v4838_v28, %v4845_v30  ;;  %v8247_v54 = vcombine.high %v4838_v28, %v4845_v30 }
 0xd80   : > { %v4890_v55 = vrot.slane %v4882_v20, %v10603_v8  ;;  %v4897_v56 = vrot.slane %v4883_v47, %v10603_v8  ;;  %v4906_v53 = vrot.slane %v4898_v26, %v10603_v8  ;;  %v4913_v42 = vrot.slane %v4899_v51, %v10603_v8 }
 0xd81   : > { %v4925_v43 = vrot.slane %v4918_v24, %v10600_v2  ;;  %v4933_v57 = vrot.slane %v8246_v37, %v10600_v2  ;;  %v4941_v59 = vrot.slane %v4934_v49, %v10600_v2  ;;  %v4949_v44 = vrot.slane %v8247_v54, %v10600_v2 }
 0xd82   : > { %v4986_v45 = vcombine.low %v4890_v55, %v4897_v56  ;;  %v8248_v41 = vcombine.high %v4890_v55, %v4897_v56  ;;  %v5002_v48 = vcombine.low %v4906_v53, %v4913_v42  ;;  %v8249_v60 = vcombine.high %v4906_v53, %v4913_v42  ;;  %v8250_v42 = vld [vmem:[%s11545_s20] ss:$0 sm:$0xff]  ;;  %s8528_s20 = sshll.u32 %s11550_s0, 8 }
 0xd83   : > { %v4951_v3 = vcombine.high %v4925_v43, %v4933_v57  ;;  %v4967_v4 = vcombine.high %v4941_v59, %v4949_v44  ;;  %v4950_v50 = vcombine.low %v4925_v43, %v4933_v57  ;;  %v4966_v52 = vcombine.low %v4941_v59, %v4949_v44 }
 0xd84   : > { %v4993_v7 = vrot.slane %v4986_v45, %v10600_v2  ;;  %v5001_v9 = vrot.slane %v8248_v41, %v10600_v2  ;;  %v5009_v10 = vrot.slane %v5002_v48, %v10600_v2  ;;  %v5017_v12 = vrot.slane %v8249_v60, %v10600_v2 }
 0xd85   : > { %v4965_v13 = vrot.slane %v4951_v3, %v10603_v8  ;;  %v4981_v15 = vrot.slane %v4967_v4, %v10603_v8  ;;  %v4958_v16 = vrot.slane %v4950_v50, %v10603_v8  ;;  %v4974_v17 = vrot.slane %v4966_v52, %v10603_v8  ;;  %v5222_v3 = vld [vmem:[#allocation19] sm:$0xff]  ;;  %v5223_v50 = vld [vmem:[#allocation19 + $0x8] sm:$0xff] }
 0xd86   : > { %v5019_v35 = vcombine.high %v4993_v7, %v5001_v9  ;;  %v5035_v18 = vcombine.high %v5009_v10, %v5017_v12  ;;  %v5018_v19 = vcombine.low %v4993_v7, %v5001_v9  ;;  %v5034_v63 = vcombine.low %v5009_v10, %v5017_v12  ;;  %v5230_v4 = vld [vmem:[#allocation19 + $0x40] sm:$0xff]  ;;  %v5231_v7 = vld [vmem:[#allocation19 + $0x48] sm:$0xff] }
 0xd87   : > { %v4984_v23 = vcombine.low %v4965_v13, %v4981_v15  ;;  %v4982_v11 = vcombine.low %v4958_v16, %v4974_v17  ;;  %v4983_v25 = vcombine.high %v4958_v16, %v4974_v17  ;;  %v4985_v27 = vcombine.high %v4965_v13, %v4981_v15  ;;  %v5238_v9 = vld [vmem:[#allocation19 + $0x80] sm:$0xff]  ;;  %v5239_v16 = vld [vmem:[#allocation19 + $0x88] sm:$0xff] }
 0xd88   : > { %v5033_v2 = vrot.slane %v5019_v35, %v10603_v8  ;;  %v5049_v29 = vrot.slane %v5035_v18, %v10603_v8  ;;  %v5026_v31 = vrot.slane %v5018_v19, %v10603_v8  ;;  %v5042_v22 = vrot.slane %v5034_v63, %v10603_v8  ;;  %v5246_v10 = vld [vmem:[#allocation19 + $0xc0] sm:$0xff]  ;;  %v5247_v17 = vld [vmem:[#allocation19 + $0xc8] sm:$0xff] }
 0xd89   : > { %v8261_v52 = vcombine.low %v5222_v3, %v5230_v4  ;;  %v8262_v5 = vcombine.high %v5222_v3, %v5230_v4  ;;  %v8263_v12 = vcombine.low %v5223_v50, %v5231_v7  ;;  %v8264_v13 = vcombine.high %v5223_v50, %v5231_v7  ;;  %v5327_v3 = vld [vmem:[#allocation19 + $0x348] sm:$0xff]  ;;  %v5342_v7 = vld [vmem:[#allocation19 + $0x3c0] sm:$0xff] }
 0xd8a   : > { %v5052_v6 = vcombine.low %v5033_v2, %v5049_v29  ;;  %v5051_v39 = vcombine.high %v5026_v31, %v5042_v22  ;;  %v5050_v21 = vcombine.low %v5026_v31, %v5042_v22  ;;  %v5053_v61 = vcombine.high %v5033_v2, %v5049_v29  ;;  %v5254_v29 = vld [vmem:[#allocation19 + $0x100] sm:$0xff]  ;;  %v5255_v22 = vld [vmem:[#allocation19 + $0x108] sm:$0xff] }
 0xd8b   : > { %v8278_v15 = vcombine.high %v5238_v9, %v5246_v10  ;;  %6075 = vmatprep.subr.bf16.mxu1 %v8262_v5  ;;  %v8280_v35 = vcombine.high %v5239_v16, %v5247_v17  ;;  %6118 = vmatprep.subr.bf16.mxu0 %v8264_v13  ;;  %v5262_v31 = vld [vmem:[#allocation19 + $0x140] sm:$0xff]  ;;  %v5343_v13 = vld [vmem:[#allocation19 + $0x3c8] sm:$0xff] }
 0xd8c   : > { %v9147_v62 = vpack.i.bf16 %v5052_v6, %v4984_v23  ;;  %v9142_v0 = vpack.i.bf16 %v5051_v39, %v4983_v25  ;;  %v9152_v32 = vpack.i.bf16 %v5053_v61, %v4985_v27  ;;  %6076 = vmatpush1.bf16.msra.mxu1 %v8261_v52  ;;  %v8294_v38 = vcombine.high %v5254_v29, %v5262_v31  ;;  %v5263_v6 = vld [vmem:[#allocation19 + $0x148] sm:$0xff]  ;;  %v5334_v5 = vld [vmem:[#allocation19 + $0x380] sm:$0xff] }
 0xd8d   : > { %6077 = vmatprep.subr.bf16.mxu1 %v8278_v15  ;;  %v8293_v39 = vcombine.low %v5254_v29, %v5262_v31  ;;  %v8296_v61 = vcombine.high %v5255_v22, %v5263_v6  ;;  %v5224_v15 = vld [vmem:[#allocation19 + $0x10] sm:$0xff] }
 0xd8e   : > { %9148 = vrot.lane.b32.xlu1 %v9147_v62, %s9915_s1  ;;  %9143 = vrot.lane.b32.xlu0 %v9142_v0, %s9916_s14  ;;  %v5270_v62 = vld [vmem:[#allocation19 + $0x180] sm:$0xff]  ;;  %s11554_s14 = sld [smem:[#allocation65_spill]] }
 0xd8f   : > { %v5278_v0 = vld [vmem:[#allocation19 + $0x1c0] sm:$0xff] }
 0xd92   : > { %9153 = vrot.lane.b32.xlu1 %v9152_v32, %s9914_s6  ;;  %v5271_v32 = vld [vmem:[#allocation19 + $0x188] sm:$0xff]  ;;  %s11546_s6 = sld [smem:[#allocation61_spill]] }
 0xe00   : > { %v9149_v14 = vpop.permute.xlu1 %9148  ;;  %v9144_v40 = vpop.permute.xlu0 %9143 }
 0xe01   : > { %v9146_v28 = vunpack.i.h.bf16 %v9144_v40  ;;  %v9145_v30 = vunpack.i.l.bf16 %v9144_v40  ;;  %v9151_v8 = vunpack.i.h.bf16 %v9149_v14  ;;  %v9150_v20 = vunpack.i.l.bf16 %v9149_v14  ;;  %v5279_v40 = vld [vmem:[#allocation19 + $0x1c8] sm:$0xff] }
 0xe02   : > { %v8310_v14 = vcombine.high %v5270_v62, %v5278_v0 }
 0xe03   : > { %v5078_v47 = vsel %vm2222_vm1, %v4982_v11, %v9145_v30  ;;  %v5079_v26 = vsel %vm2222_vm1, %v5050_v21, %v9146_v28  ;;  %v8295_v21 = vcombine.low %v5255_v22, %v5263_v6  ;;  %v8309_v28 = vcombine.low %v5270_v62, %v5278_v0 }
 0xe04   : > { %v9154_v51 = vpop.permute.xlu1 %9153  ;;  %v5080_v49 = vsel %vm2998_vm3, %v5078_v47, %v9150_v20  ;;  %v5081_v54 = vsel %vm2998_vm3, %v5079_v26, %v9151_v8  ;;  %v8311_v30 = vcombine.low %v5271_v32, %v5279_v40  ;;  %v8312_v8 = vcombine.high %v5271_v32, %v5279_v40  ;;  %v5286_v20 = vld [vmem:[#allocation19 + $0x200] sm:$0xff]  ;;  %v5287_v26 = vld [vmem:[#allocation19 + $0x208] sm:$0xff]  ;;  %v5240_v40 = vld [vmem:[#allocation19 + $0x90] sm:$0xff] }
 0xe05   : > { %v9156_v24 = vunpack.i.h.bf16 %v9154_v51  ;;  %v9155_v37 = vunpack.i.l.bf16 %v9154_v51  ;;  %v5294_v47 = vld [vmem:[#allocation19 + $0x240] sm:$0xff] }
 0xe06   : > { %v8326_v51 = vcombine.high %v5286_v20, %v5294_v47  ;;  %v8260_v32 = vld [vmem:[%s11547_s29] ss:$0 sm:$0xff]  ;;  %s11331_s29 = scalar_lea.hbm %s11554_s14, %s8528_s20 }
 0xe07   : > { %v5082_v55 = vsel %vm3001_vm4, %v5080_v49, %v9155_v37  ;;  %v5083_v56 = vsel %vm3001_vm4, %v5081_v54, %v9156_v24  ;;  %v5295_v24 = vld [vmem:[#allocation19 + $0x248] sm:$0xff]  ;;  %v8325_v37 = vcombine.low %v5286_v20, %v5294_v47 }
 0xe08   : > { %v5084_v53 = vpack.c.bf16 %v5083_v56, %v5082_v55  ;;  %v8327_v49 = vcombine.low %v5287_v26, %v5295_v24  ;;  %v8328_v54 = vcombine.high %v5287_v26, %v5295_v24  ;;  %v5302_v55 = vld [vmem:[#allocation19 + $0x280] sm:$0xff]  ;;  %v5264_v24 = vld [vmem:[#allocation19 + $0x150] sm:$0xff] }
 0xe09   : > { %v5310_v56 = vld [vmem:[#allocation19 + $0x2c0] sm:$0xff] }
 0xe0a   : > { %8946 = vmatmul.mubr.bf16.vlgmr.msra.gmra.mrb[28].mxu0 %v5084_v53  ;;  %v5303_v53 = vld [vmem:[#allocation19 + $0x288] sm:$0xff] }
 0xe0b   : > { %6150 = vmatprep.mubr.bf16.mxu0 %v9913_v1  ;;  %6119 = vmatpush1.bf16.msra.mxu0 %v8263_v12  ;;  %v8374_v12 = vcombine.high %v5334_v5, %v5342_v7 }
 0xe0c   : > { %6120 = vmatprep.subr.bf16.mxu0 %v8280_v35 }
 0xedd   : > { %v5173_v43 = vpop.f32.mrb[28].mxu0 }
 0xede   : > { %v5174_v57 = vadd.f32 %v8250_v42, %v5173_v43  ;;  %v8947_v59 = vpop.f32.mrb[29].mxu0  ;;  %v5311_v43 = vld [vmem:[#allocation19 + $0x2c8] sm:$0xff] }
 0xedf   : > { %v5176_v44 = vpop.f32.mrb[30].mxu0  ;;  %v8343_v59 = vcombine.low %v5303_v53, %v5311_v43 }
 0xee0   : > { %v5177_v45 = vadd.f32 %v8250_v42, %v5176_v44  ;;  %v8948_v41 = vpop.f32.mrb[31].mxu0  ;;  %v5180_v48 = vadd.f32 %v5174_v57, %v10943_v46  ;;  %v8277_v46 = vcombine.low %v5238_v9, %v5246_v10  ;;  %v8342_v42 = vcombine.high %v5302_v55, %v5310_v56  ;;  %v5335_v9 = vld [vmem:[#allocation19 + $0x388] sm:$0xff] }
 0xee1   : > { %v8341_v57 = vcombine.low %v5302_v55, %v5310_v56  ;;  %v8344_v44 = vcombine.high %v5303_v53, %v5311_v43  ;;  %v5326_v41 = vld [vmem:[#allocation19 + $0x340] sm:$0xff]  ;;  %v8373_v10 = vcombine.low %v5334_v5, %v5342_v7  ;;  %v8376_v35 = vcombine.high %v5335_v9, %v5343_v13  ;;  %v5280_v43 = vld [vmem:[#allocation19 + $0x1d0] sm:$0xff] }
 0xee2   : > { %5184 = vadd.xlane.f32.xlu0 %v5180_v48  ;;  %v5181_v60 = vadd.f32 %v5177_v45, %v10945_v58  ;;  %v8279_v58 = vcombine.low %v5239_v16, %v5247_v17  ;;  %6078 = vmatpush1.bf16.msra.mxu1 %v8277_v46  ;;  %v5318_v45 = vld [vmem:[#allocation19 + $0x300] sm:$0xff]  ;;  %v5232_v16 = vld [vmem:[#allocation19 + $0x50] sm:$0xff]  ;;  %v8375_v17 = vcombine.low %v5335_v9, %v5343_v13  ;;  %v5305_v13 = vld [vmem:[#allocation19 + $0x298] sm:$0xff] }
 0xee3   : > { %6079 = vmatprep.subr.bf16.mxu1 %v8294_v38  ;;  %v8357_v4 = vcombine.low %v5318_v45, %v5326_v41  ;;  %v8265_v46 = vcombine.low %v5224_v15, %v5232_v16 }
 0xee4   : > { %5186 = vadd.xlane.f32.xlu1 %v5181_v60  ;;  %6121 = vmatpush1.bf16.msra.mxu0 %v8279_v58  ;;  %v8266_v58 = vcombine.high %v5224_v15, %v5232_v16  ;;  %v5313_v15 = vld [vmem:[#allocation19 + $0x2d8] sm:$0xff] }
 0xee5   : > { %6122 = vmatprep.subr.bf16.mxu0 %v8296_v61 }
 0xee6   : > { %6080 = vmatpush1.bf16.msra.mxu1 %v8293_v39 }
 0xee7   : > { %6081 = vmatprep.subr.bf16.mxu1 %v8310_v14 }
 0xee8   : > { %6123 = vmatpush1.bf16.msra.mxu0 %v8295_v21  ;;  %v8259_v21 = vld [vmem:[%s11546_s6] ss:$0 sm:$0xff] }
 0xee9   : > { %6124 = vmatprep.subr.bf16.mxu0 %v8312_v8  ;;  %v5249_v8 = vld [vmem:[#allocation19 + $0xd8] sm:$0xff] }
 0xeea   : > { %6082 = vmatpush1.bf16.msra.mxu1 %v8309_v28  ;;  %v5248_v28 = vld [vmem:[#allocation19 + $0xd0] sm:$0xff] }
 0xeeb   : > { %6083 = vmatprep.subr.bf16.mxu1 %v8326_v51  ;;  %v8282_v26 = vcombine.high %v5240_v40, %v5248_v28 }
 0xeec   : > { %6125 = vmatpush1.bf16.msra.mxu0 %v8311_v30  ;;  %v5241_v30 = vld [vmem:[#allocation19 + $0x98] sm:$0xff] }
 0xeed   : > { %6126 = vmatprep.subr.bf16.mxu0 %v8328_v54  ;;  %v8284_v51 = vcombine.high %v5241_v30, %v5249_v8  ;;  %v8281_v54 = vcombine.low %v5240_v40, %v5248_v28  ;;  %v8283_v55 = vcombine.low %v5241_v30, %v5249_v8  ;;  %v5235_v40 = vld [vmem:[#allocation19 + $0x68] sm:$0xff] }
 0xeee   : > { %6084 = vmatpush1.bf16.msra.mxu1 %v8325_v37  ;;  %v5257_v37 = vld [vmem:[#allocation19 + $0x118] sm:$0xff] }
 0xeef   : > { %6085 = vmatprep.subr.bf16.mxu1 %v8342_v42  ;;  %v5272_v42 = vld [vmem:[#allocation19 + $0x190] sm:$0xff] }
 0xef0   : > { %6127 = vmatpush1.bf16.msra.mxu0 %v8327_v49  ;;  %v5265_v49 = vld [vmem:[#allocation19 + $0x158] sm:$0xff] }
 0xef1   : > { %6128 = vmatprep.subr.bf16.mxu0 %v8344_v44  ;;  %v8300_v53 = vcombine.high %v5257_v37, %v5265_v49 }
 0xef2   : > { %6086 = vmatpush1.bf16.msra.mxu1 %v8341_v57  ;;  %v5273_v57 = vld [vmem:[#allocation19 + $0x198] sm:$0xff] }
 0xef4   : > { %6129 = vmatpush1.bf16.msra.mxu0 %v8343_v59  ;;  %v5281_v59 = vld [vmem:[#allocation19 + $0x1d8] sm:$0xff] }
 0xef5   : > { %v8315_v5 = vcombine.low %v5273_v57, %v5281_v59 }
 0xf6f   : > { %v5185_v18 = vpop.xlane.xlu0 %5184 }
 0xf70   : > { %v5188_v19 = vmul.f32 0.0078125, %v5185_v18  ;;  %v5225_v18 = vld [vmem:[#allocation19 + $0x18] sm:$0xff] }
 0xf71   : > { %v5187_v63 = vpop.xlane.xlu1 %5186 }
 0xf72   : > { %v11217_v23 = vsub.f32 %v5180_v48, %v5188_v19  ;;  %v5189_v11 = vmul.f32 0.0078125, %v5187_v63  ;;  %v5319_v48 = vld [vmem:[#allocation19 + $0x308] sm:$0xff]  ;;  %v5233_v19 = vld [vmem:[#allocation19 + $0x58] sm:$0xff] }
 0xf73   : > { %v8359_v50 = vcombine.low %v5319_v48, %v5327_v3  ;;  %v8360_v52 = vcombine.high %v5319_v48, %v5327_v3  ;;  %v8267_v63 = vcombine.low %v5225_v18, %v5233_v19  ;;  %v8316_v48 = vcombine.high %v5273_v57, %v5281_v59  ;;  %v5296_v3 = vld [vmem:[#allocation19 + $0x250] sm:$0xff]  ;;  %v5267_v57 = vld [vmem:[#allocation19 + $0x168] sm:$0xff] }
 0xf74   : > { %v11219_v25 = vsub.f32 %v5181_v60, %v5189_v11  ;;  %v5192_v27 = vmul.f32 %v11217_v23, %v11217_v23  ;;  %v8358_v60 = vcombine.high %v5318_v45, %v5326_v41  ;;  %v8268_v11 = vcombine.high %v5225_v18, %v5233_v19  ;;  %v5328_v18 = vld [vmem:[#allocation19 + $0x350] sm:$0xff]  ;;  %v5321_v19 = vld [vmem:[#allocation19 + $0x318] sm:$0xff] }
 0xf75   : > { %6130 = vmatprep.subr.bf16.mxu0 %v8360_v52  ;;  %v8299_v45 = vcombine.low %v5257_v37, %v5265_v49  ;;  %v8314_v41 = vcombine.high %v5272_v42, %v5280_v43  ;;  %v8313_v52 = vcombine.low %v5272_v42, %v5280_v43  ;;  %v5251_v37 = vld [vmem:[#allocation19 + $0xe8] sm:$0xff]  ;;  %v5266_v42 = vld [vmem:[#allocation19 + $0x160] sm:$0xff] }
 0xf76   : > { %5194 = vadd.xlane.f32.xlu0 %v5192_v27  ;;  %v5193_v2 = vmul.f32 %v11219_v25, %v11219_v25  ;;  %6087 = vmatprep.subr.bf16.mxu1 %v8358_v60  ;;  %v5288_v60 = vld [vmem:[#allocation19 + $0x210] sm:$0xff]  ;;  %v5259_v43 = vld [vmem:[#allocation19 + $0x128] sm:$0xff] }
 0xf77   : > { %6088 = vmatpush1.bf16.msra.mxu1 %v8357_v4  ;;  %6131 = vmatpush1.bf16.msra.mxu0 %v8359_v50  ;;  %v5289_v4 = vld [vmem:[#allocation19 + $0x218] sm:$0xff]  ;;  %v8330_v7 = vcombine.high %v5288_v60, %v5296_v3  ;;  %v8329_v16 = vcombine.low %v5288_v60, %v5296_v3  ;;  %v5282_v60 = vld [vmem:[#allocation19 + $0x1e0] sm:$0xff]  ;;  %v5275_v3 = vld [vmem:[#allocation19 + $0x1a8] sm:$0xff] }
 0xf78   : > { %6089 = vmatprep.subr.bf16.mxu1 %v8374_v12  ;;  %6132 = vmatprep.subr.bf16.mxu0 %v8376_v35  ;;  %v5297_v50 = vld [vmem:[#allocation19 + $0x258] sm:$0xff]  ;;  %v5312_v12 = vld [vmem:[#allocation19 + $0x2d0] sm:$0xff] }
 0xf79   : > { %v8332_v9 = vcombine.high %v5289_v4, %v5297_v50 }
 0xf7a   : > { %5196 = vadd.xlane.f32.xlu0 %v5193_v2 }
 0xf7b   : > { %6090 = vmatpush1.bf16.msra.mxu1 %v8373_v10  ;;  %6133 = vmatpush1.bf16.msra.mxu0 %v8375_v17  ;;  %v5304_v10 = vld [vmem:[#allocation19 + $0x290] sm:$0xff]  ;;  %v8331_v17 = vcombine.low %v5289_v4, %v5297_v50  ;;  %v5283_v4 = vld [vmem:[#allocation19 + $0x1e8] sm:$0xff] }
 0xf7c   : > { %6161 = vmatprep.subr.bf16.mxu1 %v8266_v58  ;;  %6204 = vmatprep.subr.bf16.mxu0 %v8268_v11  ;;  %v8346_v35 = vcombine.high %v5304_v10, %v5312_v12  ;;  %v5320_v58 = vld [vmem:[#allocation19 + $0x310] sm:$0xff]  ;;  %v8345_v11 = vcombine.low %v5304_v10, %v5312_v12  ;;  %v5298_v10 = vld [vmem:[#allocation19 + $0x260] sm:$0xff]  ;;  %v5291_v12 = vld [vmem:[#allocation19 + $0x228] sm:$0xff] }
0x1003   : > { %v5195_v27 = vpop.xlane.xlu0 %5194 }
0x1004   : > { %v5198_v2 = vmul.f32 0.0078125, %v5195_v27  ;;  %v8347_v27 = vcombine.low %v5305_v13, %v5313_v15 }
0x1006   : > { %v5200_v29 = vadd.f32 1e-05, %v5198_v2  ;;  %v8362_v2 = vcombine.high %v5320_v58, %v5328_v18 }
0x1007   : > { %v5197_v31 = vpop.xlane.xlu0 %5196 }
0x1008   : > { %9434 = vrsqrt.f32 %v5200_v29  ;;  %v5199_v22 = vmul.f32 0.0078125, %v5197_v31  ;;  %v5336_v31 = vld [vmem:[#allocation19 + $0x390] sm:$0xff] }
0x100a   : > { %v5201_v38 = vadd.f32 1e-05, %v5199_v22  ;;  %v5344_v22 = vld [vmem:[#allocation19 + $0x3d0] sm:$0xff] }
0x100b   : > { %v8377_v28 = vcombine.low %v5336_v31, %v5344_v22 }
0x100c   : > { %9436 = vrsqrt.f32 %v5201_v38  ;;  %v5337_v38 = vld [vmem:[#allocation19 + $0x398] sm:$0xff] }
0x1012   : > { %v9435_v6 = vpop.eup %9434 }
0x1013   : > { %v5204_v39 = vmul.f32 %v9435_v6, %v11217_v23  ;;  %v5345_v6 = vld [vmem:[#allocation19 + $0x3d8] sm:$0xff] }
0x1014   : > { %v8379_v30 = vcombine.low %v5337_v38, %v5345_v6 }
0x1015   : > { %v5212_v62 = vmul.f32 %v8259_v21, %v5204_v39  ;;  %v8361_v39 = vcombine.low %v5320_v58, %v5328_v18  ;;  %v5314_v58 = vld [vmem:[#allocation19 + $0x2e0] sm:$0xff]  ;;  %v5307_v18 = vld [vmem:[#allocation19 + $0x2a8] sm:$0xff] }
0x1016   : > { %v9437_v61 = vpop.eup %9436 }
0x1017   : > { %v5205_v0 = vmul.f32 %v9437_v61, %v11219_v25  ;;  %v11233_v20 = vadd.f32 %v8260_v32, %v5212_v62  ;;  %v5256_v25 = vld [vmem:[#allocation19 + $0x110] sm:$0xff]  ;;  %v8378_v61 = vcombine.high %v5336_v31, %v5344_v22  ;;  %v8380_v62 = vcombine.high %v5337_v38, %v5345_v6  ;;  %v5330_v31 = vld [vmem:[#allocation19 + $0x360] sm:$0xff]  ;;  %v5323_v22 = vld [vmem:[#allocation19 + $0x328] sm:$0xff] }
0x1018   : > { %v8298_v56 = vcombine.high %v5256_v25, %v5264_v24  ;;  %v8297_v44 = vcombine.low %v5256_v25, %v5264_v24  ;;  %v5250_v25 = vld [vmem:[#allocation19 + $0xe0] sm:$0xff]  ;;  %v5243_v24 = vld [vmem:[#allocation19 + $0xa8] sm:$0xff] }
0x1019   : > { %v5213_v14 = vmul.f32 %v8259_v21, %v5205_v0  ;;  %v5226_v0 = vld [vmem:[#allocation19 + $0x20] sm:$0xff]  ;;  %v5331_v38 = vld [vmem:[#allocation19 + $0x368] sm:$0xff] }
0x101b   : > { %v11235_v23 = vadd.f32 %v8260_v32, %v5213_v14  ;;  %v5234_v32 = vld [vmem:[#allocation19 + $0x60] sm:$0xff]  ;;  %v5227_v14 = vld [vmem:[#allocation19 + $0x28] sm:$0xff] }
0x101c   : > { %v8270_v8 = vcombine.high %v5226_v0, %v5234_v32  ;;  %v8269_v49 = vcombine.low %v5226_v0, %v5234_v32  ;;  %v5346_v0 = vld [vmem:[#allocation19 + $0x3e0] sm:$0xff]  ;;  %v5339_v32 = vld [vmem:[#allocation19 + $0x3a8] sm:$0xff] }
0x101d   : > { %v11239_v47 = vpack.c.bf16 %v11235_v23, %v11233_v20 }
0x101f   : > { %6108 = vmatmul.mubr.bf16.vlgmr.msra.gmra.mrb[56].mxu1 %v11239_v47  ;;  %6151 = vmatmul.mubr.bf16.vlgmr.msra.gmra.mrb[32].mxu0 %v11239_v47 }
0x1020   : > { %6162 = vmatpush1.bf16.msra.mxu1 %v8265_v46  ;;  %6205 = vmatpush1.bf16.msra.mxu0 %v8267_v63  ;;  %v8348_v46 = vcombine.high %v5305_v13, %v5313_v15  ;;  %v5329_v63 = vld [vmem:[#allocation19 + $0x358] sm:$0xff]  ;;  %v5299_v13 = vld [vmem:[#allocation19 + $0x268] sm:$0xff] }
0x1021   : > { %6163 = vmatprep.subr.bf16.mxu1 %v8282_v26  ;;  %6206 = vmatprep.subr.bf16.mxu0 %v8284_v51  ;;  %v8364_v29 = vcombine.high %v5321_v19, %v5329_v63  ;;  %v8363_v21 = vcombine.low %v5321_v19, %v5329_v63  ;;  %v8272_v26 = vcombine.high %v5227_v14, %v5235_v40  ;;  %v5242_v51 = vld [vmem:[#allocation19 + $0xa0] sm:$0xff]  ;;  %v5315_v19 = vld [vmem:[#allocation19 + $0x2e8] sm:$0xff] }
0x1022   : > { %6193 = vmatprep.mubr.bf16.mxu1 %v9913_v1  ;;  %6236 = vmatprep.mubr.bf16.mxu0 %v9913_v1  ;;  %v8285_v59 = vcombine.low %v5242_v51, %v5250_v25 }
0x1024   : > { %6164 = vmatpush1.bf16.msra.mxu1 %v8281_v54  ;;  %6207 = vmatpush1.bf16.msra.mxu0 %v8283_v55  ;;  %v8271_v54 = vcombine.low %v5227_v14, %v5235_v40  ;;  %v8286_v55 = vcombine.high %v5242_v51, %v5250_v25  ;;  %v5347_v14 = vld [vmem:[#allocation19 + $0x3e8] sm:$0xff]  ;;  %v5236_v51 = vld [vmem:[#allocation19 + $0x70] sm:$0xff]  ;;  %v5229_v25 = vld [vmem:[#allocation19 + $0x38] sm:$0xff] }
0x1025   : > { %6165 = vmatprep.subr.bf16.mxu1 %v8298_v56  ;;  %6208 = vmatprep.subr.bf16.mxu0 %v8300_v53  ;;  %v8288_v56 = vcombine.high %v5243_v24, %v5251_v37  ;;  %v5258_v53 = vld [vmem:[#allocation19 + $0x120] sm:$0xff] }
0x1026   : > { %v8301_v50 = vcombine.low %v5258_v53, %v5266_v42 }
0x1028   : > { %6166 = vmatpush1.bf16.msra.mxu1 %v8297_v44  ;;  %6209 = vmatpush1.bf16.msra.mxu0 %v8299_v45  ;;  %v8287_v44 = vcombine.low %v5243_v24, %v5251_v37  ;;  %v8302_v45 = vcombine.high %v5258_v53, %v5266_v42  ;;  %v5237_v24 = vld [vmem:[#allocation19 + $0x78] sm:$0xff]  ;;  %v5252_v53 = vld [vmem:[#allocation19 + $0xf0] sm:$0xff] }
0x1029   : > { %6167 = vmatprep.subr.bf16.mxu1 %v8314_v41  ;;  %6210 = vmatprep.subr.bf16.mxu0 %v8316_v48  ;;  %v8304_v41 = vcombine.high %v5259_v43, %v5267_v57  ;;  %v5274_v48 = vld [vmem:[#allocation19 + $0x1a0] sm:$0xff]  ;;  %v5245_v42 = vld [vmem:[#allocation19 + $0xb8] sm:$0xff] }
0x102a   : > { %v8317_v15 = vcombine.low %v5274_v48, %v5282_v60 }
0x102c   : > { %6168 = vmatpush1.bf16.msra.mxu1 %v8313_v52  ;;  %6211 = vmatpush1.bf16.msra.mxu0 %v8315_v5  ;;  %v8303_v52 = vcombine.low %v5259_v43, %v5267_v57  ;;  %v8318_v5 = vcombine.high %v5274_v48, %v5282_v60  ;;  %v5253_v43 = vld [vmem:[#allocation19 + $0xf8] sm:$0xff]  ;;  %v5268_v48 = vld [vmem:[#allocation19 + $0x170] sm:$0xff] }
0x102d   : > { %6169 = vmatprep.subr.bf16.mxu1 %v8330_v7  ;;  %6212 = vmatprep.subr.bf16.mxu0 %v8332_v9  ;;  %v8320_v7 = vcombine.high %v5275_v3, %v5283_v4  ;;  %v5290_v9 = vld [vmem:[#allocation19 + $0x220] sm:$0xff]  ;;  %v5261_v60 = vld [vmem:[#allocation19 + $0x138] sm:$0xff] }
0x102e   : > { %v8333_v63 = vcombine.low %v5290_v9, %v5298_v10 }
0x1030   : > { %6170 = vmatpush1.bf16.msra.mxu1 %v8329_v16  ;;  %6213 = vmatpush1.bf16.msra.mxu0 %v8331_v17  ;;  %v8319_v16 = vcombine.low %v5275_v3, %v5283_v4  ;;  %v8334_v17 = vcombine.high %v5290_v9, %v5298_v10  ;;  %v5269_v3 = vld [vmem:[#allocation19 + $0x178] sm:$0xff]  ;;  %v5284_v9 = vld [vmem:[#allocation19 + $0x1f0] sm:$0xff] }
0x1031   : > { %6171 = vmatprep.subr.bf16.mxu1 %v8346_v35  ;;  %6214 = vmatprep.subr.bf16.mxu0 %v8348_v46  ;;  %v8336_v35 = vcombine.high %v5291_v12, %v5299_v13  ;;  %v5306_v46 = vld [vmem:[#allocation19 + $0x2a0] sm:$0xff]  ;;  %v5277_v10 = vld [vmem:[#allocation19 + $0x1b8] sm:$0xff] }
0x1032   : > { %v8349_v6 = vcombine.low %v5306_v46, %v5314_v58 }
0x1034   : > { %6172 = vmatpush1.bf16.msra.mxu1 %v8345_v11  ;;  %6215 = vmatpush1.bf16.msra.mxu0 %v8347_v27  ;;  %v8335_v11 = vcombine.low %v5291_v12, %v5299_v13  ;;  %v8350_v27 = vcombine.high %v5306_v46, %v5314_v58  ;;  %v5285_v12 = vld [vmem:[#allocation19 + $0x1f8] sm:$0xff]  ;;  %v5300_v46 = vld [vmem:[#allocation19 + $0x270] sm:$0xff] }
0x1035   : > { %6173 = vmatprep.subr.bf16.mxu1 %v8362_v2  ;;  %6216 = vmatprep.subr.bf16.mxu0 %v8364_v29  ;;  %v8352_v2 = vcombine.high %v5307_v18, %v5315_v19  ;;  %v5322_v29 = vld [vmem:[#allocation19 + $0x320] sm:$0xff]  ;;  %v5293_v58 = vld [vmem:[#allocation19 + $0x238] sm:$0xff] }
0x1036   : > { %v8365_v40 = vcombine.low %v5322_v29, %v5330_v31 }
0x1038   : > { %6174 = vmatpush1.bf16.msra.mxu1 %v8361_v39  ;;  %6217 = vmatpush1.bf16.msra.mxu0 %v8363_v21  ;;  %v8351_v39 = vcombine.low %v5307_v18, %v5315_v19  ;;  %v8366_v21 = vcombine.high %v5322_v29, %v5330_v31  ;;  %v5301_v18 = vld [vmem:[#allocation19 + $0x278] sm:$0xff] }
0x1039   : > { %6175 = vmatprep.subr.bf16.mxu1 %v8378_v61  ;;  %6218 = vmatprep.subr.bf16.mxu0 %v8380_v62  ;;  %v8368_v61 = vcombine.high %v5323_v22, %v5331_v38  ;;  %v5338_v62 = vld [vmem:[#allocation19 + $0x3a0] sm:$0xff]  ;;  %v5309_v29 = vld [vmem:[#allocation19 + $0x2b8] sm:$0xff] }
0x103a   : > { %v8381_v37 = vcombine.low %v5338_v62, %v5346_v0  ;;  %v5317_v31 = vld [vmem:[#allocation19 + $0x2f8] sm:$0xff] }
0x103c   : > { %6176 = vmatpush1.bf16.msra.mxu1 %v8377_v28  ;;  %6219 = vmatpush1.bf16.msra.mxu0 %v8379_v30  ;;  %v8367_v28 = vcombine.low %v5323_v22, %v5331_v38  ;;  %v8382_v30 = vcombine.high %v5338_v62, %v5346_v0  ;;  %v8339_v38 = vcombine.low %v5293_v58, %v5301_v18  ;;  %v5325_v62 = vld [vmem:[#allocation19 + $0x338] sm:$0xff] }
0x103d   : > { %6247 = vmatprep.subr.bf16.mxu1 %v8270_v8  ;;  %6290 = vmatprep.subr.bf16.mxu0 %v8272_v26  ;;  %v8384_v8 = vcombine.high %v5339_v32, %v5347_v14  ;;  %v5228_v26 = vld [vmem:[#allocation19 + $0x30] sm:$0xff]  ;;  %v5333_v0 = vld [vmem:[#allocation19 + $0x378] sm:$0xff] }
0x103e   : > { %v8273_v57 = vcombine.low %v5228_v26, %v5236_v51 }
0x103f   : > { %6194 = vmatmul.mubr.bf16.vlgmr.msra.gmra.mrb[60].mxu1 %v11239_v47  ;;  %6237 = vmatmul.mubr.bf16.vlgmr.msra.gmra.mrb[36].mxu0 %v11239_v47 }
0x1040   : > { %6248 = vmatpush1.bf16.msra.mxu1 %v8269_v49  ;;  %6291 = vmatpush1.bf16.msra.mxu0 %v8271_v54  ;;  %v8383_v49 = vcombine.low %v5339_v32, %v5347_v14  ;;  %v8274_v54 = vcombine.high %v5228_v26, %v5236_v51  ;;  %v8355_v14 = vcombine.low %v5309_v29, %v5317_v31  ;;  %v5341_v26 = vld [vmem:[#allocation19 + $0x3b8] sm:$0xff] }
0x1041   : > { %6249 = vmatprep.subr.bf16.mxu1 %v8286_v55  ;;  %6292 = vmatprep.subr.bf16.mxu0 %v8288_v56  ;;  %v8276_v55 = vcombine.high %v5229_v25, %v5237_v24  ;;  %v5244_v56 = vld [vmem:[#allocation19 + $0xb0] sm:$0xff]  ;;  %v5349_v51 = vld [vmem:[#allocation19 + $0x3f8] sm:$0xff] }
0x1042   : > { %6279 = vmatprep.mubr.bf16.mxu1 %v9913_v1  ;;  %6322 = vmatprep.mubr.bf16.mxu0 %v9913_v1  ;;  %v8289_v4 = vcombine.low %v5244_v56, %v5252_v53 }
0x1044   : > { %6250 = vmatpush1.bf16.msra.mxu1 %v8285_v59  ;;  %6293 = vmatpush1.bf16.msra.mxu0 %v8287_v44  ;;  %v8275_v59 = vcombine.low %v5229_v25, %v5237_v24  ;;  %v8290_v44 = vcombine.high %v5244_v56, %v5252_v53  ;;  %v8371_v24 = vcombine.low %v5325_v62, %v5333_v0  ;;  %v9238_v56 = vld [vmem:[#allocation20 + $0x40] sm:$0xff]  }
0x1045   : > { %6251 = vmatprep.subr.bf16.mxu1 %v8302_v45  ;;  %6294 = vmatprep.subr.bf16.mxu0 %v8304_v41  ;;  %v8292_v45 = vcombine.high %v5245_v42, %v5253_v43  ;;  %v5260_v41 = vld [vmem:[#allocation19 + $0x130] sm:$0xff]  ;;  %v9239_v53 = vld [vmem:[#allocation20 + $0xc0] sm:$0xff]  }
0x1046   : > { %v8305_v13 = vcombine.low %v5260_v41, %v5268_v48 }
0x1048   : > { %6252 = vmatpush1.bf16.msra.mxu1 %v8301_v50  ;;  %6295 = vmatpush1.bf16.msra.mxu0 %v8303_v52  ;;  %v8291_v50 = vcombine.low %v5245_v42, %v5253_v43  ;;  %v8306_v52 = vcombine.high %v5260_v41, %v5268_v48  ;;  %v9240_v42 = vld [vmem:[#allocation20] sm:$0xff]   ;;  %v9246_v41 = vld [vmem:[#allocation20 + $0x50] sm:$0xff]  }
0x1049   : > { %6253 = vmatprep.subr.bf16.mxu1 %v8318_v5  ;;  %6296 = vmatprep.subr.bf16.mxu0 %v8320_v7  ;;  %v8308_v5 = vcombine.high %v5261_v60, %v5269_v3  ;;  %v5276_v7 = vld [vmem:[#allocation19 + $0x1b0] sm:$0xff]  ;;  %v9241_v43 = vld [vmem:[#allocation20 + $0x80] sm:$0xff]  }
0x104a   : > { %v8321_v19 = vcombine.low %v5276_v7, %v5284_v9  ;;  %v9247_v48 = vld [vmem:[#allocation20 + $0xd0] sm:$0xff]  }
0x104c   : > { %6254 = vmatpush1.bf16.msra.mxu1 %v8317_v15  ;;  %6297 = vmatpush1.bf16.msra.mxu0 %v8319_v16  ;;  %v8307_v15 = vcombine.low %v5261_v60, %v5269_v3  ;;  %v8322_v16 = vcombine.high %v5276_v7, %v5284_v9  ;;  %v9248_v60 = vld [vmem:[#allocation20 + $0x10] sm:$0xff]   ;;  %v9255_v7 = vld [vmem:[#allocation20 + $0xe0] sm:$0xff]  }
0x104d   : > { %6255 = vmatprep.subr.bf16.mxu1 %v8334_v17  ;;  %6298 = vmatprep.subr.bf16.mxu0 %v8336_v35  ;;  %v8324_v17 = vcombine.high %v5277_v10, %v5285_v12  ;;  %v5292_v35 = vld [vmem:[#allocation19 + $0x230] sm:$0xff]  ;;  %v9256_v9 = vld [vmem:[#allocation20 + $0x20] sm:$0xff]  }
0x104e   : > { %v8337_v22 = vcombine.low %v5292_v35, %v5300_v46  ;;  %v9249_v3 = vld [vmem:[#allocation20 + $0x90] sm:$0xff]  }
0x1050   : > { %6256 = vmatpush1.bf16.msra.mxu1 %v8333_v63  ;;  %6299 = vmatpush1.bf16.msra.mxu0 %v8335_v11  ;;  %v8323_v63 = vcombine.low %v5277_v10, %v5285_v12  ;;  %v8338_v11 = vcombine.high %v5292_v35, %v5300_v46  ;;  %v9257_v10 = vld [vmem:[#allocation20 + $0xa0] sm:$0xff]   ;;  %v9258_v12 = vld [vmem:[#allocation20 + $0x68] sm:$0xff]   ;;  %v9263_v35 = vld [vmem:[#allocation20 + $0xf0] sm:$0xff]  }
0x1051   : > { %6257 = vmatprep.subr.bf16.mxu1 %v8350_v27  ;;  %6300 = vmatprep.subr.bf16.mxu0 %v8352_v2  ;;  %v5308_v27 = vld [vmem:[#allocation19 + $0x2b0] sm:$0xff] }
0x1052   : > { %v5316_v2 = vld [vmem:[#allocation19 + $0x2f0] sm:$0xff] }
0x1053   : > { %v8353_v32 = vcombine.low %v5308_v27, %v5316_v2  ;;  %v9264_v46 = vld [vmem:[#allocation20 + $0x30] sm:$0xff]  }
0x1054   : > { %6258 = vmatpush1.bf16.msra.mxu1 %v8349_v6  ;;  %6301 = vmatpush1.bf16.msra.mxu0 %v8351_v39  ;;  %v8354_v6 = vcombine.high %v5308_v27, %v5316_v2  ;;  %v8356_v39 = vcombine.high %v5309_v29, %v5317_v31  ;;  %v9271_v27 = vld [vmem:[#allocation20 + $0x1c0] sm:$0xff]   ;;  %v5365_v2 = vsub.s32 2, %v10553_v33  ;;  %v5369_v31 = vsub.s32 3, %v10553_v33 }
0x1055   : > { %6259 = vmatprep.subr.bf16.mxu1 %v8366_v21  ;;  %6302 = vmatprep.subr.bf16.mxu0 %v8368_v61  ;;  %v5324_v21 = vld [vmem:[#allocation19 + $0x330] sm:$0xff]  ;;  %v11259_v29 = vld [vmem:[%s11548_s26] sm:$0xff] }
0x1056   : > { %v5332_v61 = vld [vmem:[#allocation19 + $0x370] sm:$0xff] }
0x1057   : > { %v8369_v25 = vcombine.low %v5324_v21, %v5332_v61 }
0x1058   : > { %6260 = vmatpush1.bf16.msra.mxu1 %v8365_v40  ;;  %6303 = vmatpush1.bf16.msra.mxu0 %v8367_v28  ;;  %v8370_v40 = vcombine.high %v5324_v21, %v5332_v61  ;;  %v8372_v28 = vcombine.high %v5325_v62, %v5333_v0 }
0x1059   : > { %6261 = vmatprep.subr.bf16.mxu1 %v8382_v30  ;;  %6304 = vmatprep.subr.bf16.mxu0 %v8384_v8  ;;  %v5340_v30 = vld [vmem:[#allocation19 + $0x3b0] sm:$0xff] }
0x105a   : > { %v5348_v8 = vld [vmem:[#allocation19 + $0x3f0] sm:$0xff] }
0x105c   : > { %6262 = vmatpush1.bf16.msra.mxu1 %v8381_v37  ;;  %6305 = vmatpush1.bf16.msra.mxu0 %v8383_v49  ;;  %v8386_v37 = vcombine.high %v5340_v30, %v5348_v8  ;;  %v8388_v49 = vcombine.high %v5341_v26, %v5349_v51 }
0x105d   : > { %6333 = vmatprep.subr.bf16.mxu1 %v8274_v54  ;;  %6376 = vmatprep.subr.bf16.mxu0 %v8276_v55  ;;  %v8385_v54 = vcombine.low %v5340_v30, %v5348_v8  ;;  %v8387_v55 = vcombine.low %v5341_v26, %v5349_v51 }
0x105f   : > { %6280 = vmatmul.mubr.bf16.vlgmr.msra.gmra.mrb[64].mxu1 %v11239_v47  ;;  %6323 = vmatmul.mubr.bf16.vlgmr.msra.gmra.mrb[40].mxu0 %v11239_v47 }
0x1060   : > { %6334 = vmatpush1.bf16.msra.mxu1 %v8273_v57  ;;  %6377 = vmatpush1.bf16.msra.mxu0 %v8275_v59  ;;  %v9242_v57 = vld [vmem:[#allocation20 + $0x48] sm:$0xff]  }
0x1061   : > { %6335 = vmatprep.subr.bf16.mxu1 %v8290_v44  ;;  %6378 = vmatprep.subr.bf16.mxu0 %v8292_v45  ;;  %v9243_v59 = vld [vmem:[#allocation20 + $0xc8] sm:$0xff]  }
0x1062   : > { %6365 = vmatprep.mubr.bf16.mxu1 %v9913_v1  ;;  %6408 = vmatprep.mubr.bf16.mxu0 %v9913_v1  ;;  %v8340_v1 = vcombine.high %v5293_v58, %v5301_v18  ;;  %v9244_v44 = vld [vmem:[#allocation20 + $0x8] sm:$0xff]   ;;  %v9265_v58 = vld [vmem:[#allocation20 + $0xb0] sm:$0xff]   ;;  %v9266_v18 = vld [vmem:[#allocation20 + $0x78] sm:$0xff]  }
0x1063   : > { %v9245_v45 = vld [vmem:[#allocation20 + $0x88] sm:$0xff]  }
0x1064   : > { %6336 = vmatpush1.bf16.msra.mxu1 %v8289_v4  ;;  %6379 = vmatpush1.bf16.msra.mxu0 %v8291_v50  ;;  %v9250_v4 = vld [vmem:[#allocation20 + $0x58] sm:$0xff]  }
0x1065   : > { %6337 = vmatprep.subr.bf16.mxu1 %v8306_v52  ;;  %6380 = vmatprep.subr.bf16.mxu0 %v8308_v5  ;;  %v9251_v50 = vld [vmem:[#allocation20 + $0xd8] sm:$0xff]   ;;  %v9254_v5 = vld [vmem:[#allocation20 + $0x60] sm:$0xff]  }
0x1066   : > { %v9252_v52 = vld [vmem:[#allocation20 + $0x18] sm:$0xff]  }
0x1068   : > { %6338 = vmatpush1.bf16.msra.mxu1 %v8305_v13  ;;  %6381 = vmatpush1.bf16.msra.mxu0 %v8307_v15  ;;  %v9259_v13 = vld [vmem:[#allocation20 + $0xe8] sm:$0xff]  }
0x1069   : > { %6339 = vmatprep.subr.bf16.mxu1 %v8322_v16  ;;  %6382 = vmatprep.subr.bf16.mxu0 %v8324_v17  ;;  %v9260_v15 = vld [vmem:[#allocation20 + $0x28] sm:$0xff]   ;;  %v9262_v17 = vld [vmem:[#allocation20 + $0x70] sm:$0xff]  }
0x106a   : > { %v9261_v16 = vld [vmem:[#allocation20 + $0xa8] sm:$0xff]  }
0x106c   : > { %6340 = vmatpush1.bf16.msra.mxu1 %v8321_v19  ;;  %6383 = vmatpush1.bf16.msra.mxu0 %v8323_v63  ;;  %v9267_v19 = vld [vmem:[#allocation20 + $0xf8] sm:$0xff]  }
0x106d   : > { %6341 = vmatprep.subr.bf16.mxu1 %v8338_v11  ;;  %6384 = vmatprep.subr.bf16.mxu0 %v8340_v1  ;;  %v9268_v63 = vld [vmem:[#allocation20 + $0x38] sm:$0xff]   ;;  %v9270_v1 = vld [vmem:[#allocation20 + $0x140] sm:$0xff]  }
0x106e   : > { %v9269_v11 = vld [vmem:[#allocation20 + $0xb8] sm:$0xff]  }
0x1070   : > { %6342 = vmatpush1.bf16.msra.mxu1 %v8337_v22  ;;  %6385 = vmatpush1.bf16.msra.mxu0 %v8339_v38  ;;  %v5358_v22 = vrot.slane %v11259_v29, %v10556_v34  ;;  %v5366_v38 = vrot.slane %v11259_v29, %v5365_v2 }
0x1071   : > { %6343 = vmatprep.subr.bf16.mxu1 %v8354_v6  ;;  %6386 = vmatprep.subr.bf16.mxu0 %v8356_v39  ;;  %v5362_v6 = vrot.slane %v11259_v29, %v10562_v36  ;;  %v5370_v39 = vrot.slane %v11259_v29, %v5369_v31 }
0x1074   : > { %6344 = vmatpush1.bf16.msra.mxu1 %v8353_v32  ;;  %6387 = vmatpush1.bf16.msra.mxu0 %v8355_v14 }
0x1075   : > { %6345 = vmatprep.subr.bf16.mxu1 %v8370_v40  ;;  %6388 = vmatprep.subr.bf16.mxu0 %v8372_v28 }
0x1078   : > { %6346 = vmatpush1.bf16.msra.mxu1 %v8369_v25  ;;  %6389 = vmatpush1.bf16.msra.mxu0 %v8371_v24 }
0x1079   : > { %6347 = vmatprep.subr.bf16.mxu1 %v8386_v37  ;;  %6390 = vmatprep.subr.bf16.mxu0 %v8388_v49 }
0x107c   : > { %6348 = vmatpush1.bf16.msra.mxu1 %v8385_v54  ;;  %6391 = vmatpush1.bf16.msra.mxu0 %v8387_v55 }
0x107d   : > { %8597 = vmatprep.subr.bf16.mxu1 %v9238_v56  ;;  %8619 = vmatprep.subr.bf16.mxu0 %v9239_v53 }
0x107f   : > { %6366 = vmatmul.mubr.bf16.vlgmr.msra.gmra.mrb[68].mxu1 %v11239_v47  ;;  %6409 = vmatmul.mubr.bf16.vlgmr.msra.gmra.mrb[44].mxu0 %v11239_v47  ;;  %v9253_v47 = vld [vmem:[#allocation20 + $0x98] sm:$0xff]  }
0x1080   : > { %8598 = vmatpush3.bf16.msra.mxu1 %v9240_v42  ;;  %8620 = vmatpush3.bf16.msra.mxu0 %v9241_v43 }
0x1081   : > { %8599 = vmatprep.subr.bf16.mxu1 %v9242_v57  ;;  %8621 = vmatprep.subr.bf16.mxu0 %v9243_v59 }
0x1084   : > { %8600 = vmatpush3.bf16.msra.mxu1 %v9244_v44  ;;  %8622 = vmatpush3.bf16.msra.mxu0 %v9245_v45 }
0x1085   : > { %8601 = vmatprep.subr.bf16.mxu1 %v9246_v41  ;;  %8623 = vmatprep.subr.bf16.mxu0 %v9247_v48 }
0x1088   : > { %8602 = vmatpush3.bf16.msra.mxu1 %v9248_v60  ;;  %8624 = vmatpush3.bf16.msra.mxu0 %v9249_v3  ;;  %v9272_v60 = vld [vmem:[#allocation20 + $0x100] sm:$0xff]  }
0x1089   : > { %8603 = vmatprep.subr.bf16.mxu1 %v9250_v4  ;;  %8625 = vmatprep.subr.bf16.mxu0 %v9251_v50  ;;  %v9273_v3 = vld [vmem:[#allocation20 + $0x180] sm:$0xff]   ;;  %v9274_v4 = vld [vmem:[#allocation20 + $0x148] sm:$0xff]  }
0x108a   : > { %v9275_v50 = vld [vmem:[#allocation20 + $0x1c8] sm:$0xff]  }
0x108c   : > { %8604 = vmatpush3.bf16.msra.mxu1 %v9252_v52  ;;  %8626 = vmatpush3.bf16.msra.mxu0 %v9253_v47  ;;  %v9276_v52 = vld [vmem:[#allocation20 + $0x108] sm:$0xff]  }
0x108d   : > { %8605 = vmatprep.subr.bf16.mxu1 %v9254_v5  ;;  %8627 = vmatprep.subr.bf16.mxu0 %v9255_v7  ;;  %v9277_v47 = vld [vmem:[#allocation20 + $0x188] sm:$0xff]   ;;  %v9278_v5 = vld [vmem:[#allocation20 + $0x150] sm:$0xff]  }
0x108e   : > { %v9279_v7 = vld [vmem:[#allocation20 + $0x1d0] sm:$0xff]  }
0x1090   : > { %8606 = vmatpush3.bf16.msra.mxu1 %v9256_v9  ;;  %8628 = vmatpush3.bf16.msra.mxu0 %v9257_v10  ;;  %v9280_v9 = vld [vmem:[#allocation20 + $0x110] sm:$0xff]  }
0x1091   : > { %8607 = vmatprep.subr.bf16.mxu1 %v9258_v12  ;;  %8629 = vmatprep.subr.bf16.mxu0 %v9259_v13  ;;  %v9281_v10 = vld [vmem:[#allocation20 + $0x190] sm:$0xff]   ;;  %v9282_v12 = vld [vmem:[#allocation20 + $0x158] sm:$0xff]  }
0x1092   : > { %v9283_v13 = vld [vmem:[#allocation20 + $0x1d8] sm:$0xff]  }
0x1094   : > { %8608 = vmatpush3.bf16.msra.mxu1 %v9260_v15  ;;  %8630 = vmatpush3.bf16.msra.mxu0 %v9261_v16  ;;  %v9284_v15 = vld [vmem:[#allocation20 + $0x118] sm:$0xff]  }
0x1095   : > { %8609 = vmatprep.subr.bf16.mxu1 %v9262_v17  ;;  %8631 = vmatprep.subr.bf16.mxu0 %v9263_v35  ;;  %v9285_v16 = vld [vmem:[#allocation20 + $0x198] sm:$0xff]   ;;  %v9286_v17 = vld [vmem:[#allocation20 + $0x160] sm:$0xff]  }
0x1096   : > { %v9287_v35 = vld [vmem:[#allocation20 + $0x1e0] sm:$0xff]  }
0x1098   : > { %8610 = vmatpush3.bf16.msra.mxu1 %v9264_v46  ;;  %8632 = vmatpush3.bf16.msra.mxu0 %v9265_v58  ;;  %v9288_v46 = vld [vmem:[#allocation20 + $0x120] sm:$0xff]  }
0x1099   : > { %8611 = vmatprep.subr.bf16.mxu1 %v9266_v18  ;;  %8633 = vmatprep.subr.bf16.mxu0 %v9267_v19  ;;  %v9289_v58 = vld [vmem:[#allocation20 + $0x1a0] sm:$0xff]   ;;  %v9290_v18 = vld [vmem:[#allocation20 + $0x168] sm:$0xff]  }
0x109a   : > { %v9291_v19 = vld [vmem:[#allocation20 + $0x1e8] sm:$0xff]  }
0x109c   : > { %8612 = vmatpush3.bf16.msra.mxu1 %v9268_v63  ;;  %8634 = vmatpush3.bf16.msra.mxu0 %v9269_v11  ;;  %v5373_v63 = vsub.s32 4, %v10553_v33  ;;  %v5381_v11 = vsub.s32 6, %v10553_v33 }
0x109d   : > { %8641 = vmatprep.subr.bf16.mxu1 %v9270_v1  ;;  %8663 = vmatprep.subr.bf16.mxu0 %v9271_v27  ;;  %v5377_v1 = vsub.s32 5, %v10553_v33  ;;  %v5385_v27 = vsub.s32 7, %v10553_v33 }
0x10f2   : > { %v6109_v21 = vpop.f32.mrb[56].mxu1  ;;  %v6152_v61 = vpop.f32.mrb[32].mxu0 }
0x10f3   : > { %v6110_v62 = vadd.f32 %v6109_v21, %v5358_v22  ;;  %v6153_v0 = vadd.f32 %v6152_v61, %v5366_v38  ;;  %v6111_v32 = vpop.f32.mrb[57].mxu1  ;;  %v6154_v14 = vpop.f32.mrb[33].mxu0  ;;  %v9294_v21 = vld [vmem:[#allocation20 + $0x170] sm:$0xff]  }
0x10f4   : > { %v6112_v40 = vadd.f32 %v6111_v32, %v5362_v6  ;;  %v6155_v28 = vadd.f32 %v6154_v14, %v5370_v39  ;;  %v6113_v30 = vpop.f32.mrb[58].mxu1  ;;  %v6156_v8 = vpop.f32.mrb[34].mxu0  ;;  %v9295_v61 = vld [vmem:[#allocation20 + $0x1f0] sm:$0xff]  }
0x10f5   : > { %v6114_v26 = vadd.f32 %v6113_v30, %v5358_v22  ;;  %v6157_v51 = vadd.f32 %v6156_v8, %v5366_v38  ;;  %v6115_v25 = vpop.f32.mrb[59].mxu1  ;;  %v6158_v24 = vpop.f32.mrb[35].mxu0  ;;  %v6419_v54 = vmax.f32 %v6110_v62, 0.0  ;;  %v6421_v55 = vmax.f32 %v6153_v0, 0.0  ;;  %v9292_v22 = vld [vmem:[#allocation20 + $0x128] sm:$0xff]  }
0x10f6   : > { %v6116_v37 = vadd.f32 %v6115_v25, %v5362_v6  ;;  %v6159_v49 = vadd.f32 %v6158_v24, %v5370_v39  ;;  %v6420_v42 = vmax.f32 %v6112_v40, 0.0  ;;  %v6422_v43 = vmax.f32 %v6155_v28, 0.0  ;;  %v9293_v38 = vld [vmem:[#allocation20 + $0x1a8] sm:$0xff]   ;;  %v9296_v40 = vld [vmem:[#allocation20 + $0x130] sm:$0xff]   ;;  %v9298_v25 = vld [vmem:[#allocation20 + $0x178] sm:$0xff]  }
0x10f7   : > { %v6435_v56 = vmax.f32 %v6114_v26, 0.0  ;;  %v6437_v53 = vmax.f32 %v6157_v51, 0.0  ;;  %v5374_v6 = vrot.slane %v11259_v29, %v5373_v63  ;;  %v5382_v39 = vrot.slane %v11259_v29, %v5381_v11  ;;  %v9297_v28 = vld [vmem:[#allocation20 + $0x1b0] sm:$0xff]   ;;  %v9299_v24 = vld [vmem:[#allocation20 + $0x1f8] sm:$0xff]  }
0x10f8   : > { %v6436_v57 = vmax.f32 %v6116_v37, 0.0  ;;  %v6438_v59 = vmax.f32 %v6159_v49, 0.0  ;;  %v5378_v62 = vrot.slane %v11259_v29, %v5377_v1  ;;  %v5386_v0 = vrot.slane %v11259_v29, %v5385_v27 }
0x10f9   : > { %v6707_v44 = vpack.c.bf16 %v6435_v56, %v6419_v54  ;;  %v6709_v45 = vpack.c.bf16 %v6437_v53, %v6421_v55 }
0x10fa   : > { %v6708_v41 = vpack.c.bf16 %v6436_v57, %v6420_v42  ;;  %v6710_v48 = vpack.c.bf16 %v6438_v59, %v6422_v43  ;;  %v9300_v59 = vld [vmem:[#allocation20 + $0x138] sm:$0xff]  }
0x10fc   : > { %7530 = vmatprep.mubr.bf16.mxu1 %v6708_v41  ;;  %7571 = vmatprep.mubr.bf16.mxu0 %v6710_v48 }
0x10fd   : > { %7531 = vmatmul.mubr.bf16.vlgmr.msra.gmra.mrb[72].mxu1 %v6707_v44  ;;  %7572 = vmatmul.mubr.bf16.vlgmr.msra.gmra.mrb[48].mxu0 %v6709_v45  ;;  %v9301_v44 = vld [vmem:[#allocation20 + $0x1b8] sm:$0xff]  }
0x10fe   : > { %8642 = vmatpush3.bf16.msra.mxu1 %v9272_v60  ;;  %8664 = vmatpush3.bf16.msra.mxu0 %v9273_v3  ;;  %v9302_v3 = vld [vmem:[#allocation20 + $0x240] sm:$0xff]  }
0x10ff   : > { %8643 = vmatprep.subr.bf16.mxu1 %v9274_v4  ;;  %8665 = vmatprep.subr.bf16.mxu0 %v9275_v50  ;;  %v9303_v4 = vld [vmem:[#allocation20 + $0x2c0] sm:$0xff]  }
0x1102   : > { %8644 = vmatpush3.bf16.msra.mxu1 %v9276_v52  ;;  %8666 = vmatpush3.bf16.msra.mxu0 %v9277_v47 }
0x1103   : > { %8645 = vmatprep.subr.bf16.mxu1 %v9278_v5  ;;  %8667 = vmatprep.subr.bf16.mxu0 %v9279_v7 }
0x1106   : > { %8646 = vmatpush3.bf16.msra.mxu1 %v9280_v9  ;;  %8668 = vmatpush3.bf16.msra.mxu0 %v9281_v10 }
0x1107   : > { %8647 = vmatprep.subr.bf16.mxu1 %v9282_v12  ;;  %8669 = vmatprep.subr.bf16.mxu0 %v9283_v13  ;;  %v9304_v13 = vld [vmem:[#allocation20 + $0x200] sm:$0xff]  }
0x110a   : > { %8648 = vmatpush3.bf16.msra.mxu1 %v9284_v15  ;;  %8670 = vmatpush3.bf16.msra.mxu0 %v9285_v16  ;;  %v9305_v15 = vld [vmem:[#allocation20 + $0x280] sm:$0xff]   ;;  %v9306_v16 = vld [vmem:[#allocation20 + $0x248] sm:$0xff]  }
0x110b   : > { %8649 = vmatprep.subr.bf16.mxu1 %v9286_v17  ;;  %8671 = vmatprep.subr.bf16.mxu0 %v9287_v35  ;;  %v9307_v17 = vld [vmem:[#allocation20 + $0x2c8] sm:$0xff]  }
0x110c   : > { %v9308_v35 = vld [vmem:[#allocation20 + $0x208] sm:$0xff]  }
0x110e   : > { %8650 = vmatpush3.bf16.msra.mxu1 %v9288_v46  ;;  %8672 = vmatpush3.bf16.msra.mxu0 %v9289_v58  ;;  %v9309_v46 = vld [vmem:[#allocation20 + $0x288] sm:$0xff]   ;;  %v9310_v58 = vld [vmem:[#allocation20 + $0x250] sm:$0xff]  }
0x110f   : > { %8651 = vmatprep.subr.bf16.mxu1 %v9290_v18  ;;  %8673 = vmatprep.subr.bf16.mxu0 %v9291_v19  ;;  %v9311_v18 = vld [vmem:[#allocation20 + $0x2d0] sm:$0xff]  }
0x1110   : > { %v9312_v19 = vld [vmem:[#allocation20 + $0x210] sm:$0xff]  }
0x1112   : > { %v6195_v32 = vpop.f32.mrb[60].mxu1  ;;  %v6238_v14 = vpop.f32.mrb[36].mxu0  ;;  %8652 = vmatpush3.bf16.msra.mxu1 %v9292_v22  ;;  %8674 = vmatpush3.bf16.msra.mxu0 %v9293_v38  ;;  %v9313_v22 = vld [vmem:[#allocation20 + $0x290] sm:$0xff]   ;;  %v9314_v38 = vld [vmem:[#allocation20 + $0x258] sm:$0xff]  }
0x1113   : > { %v6196_v30 = vadd.f32 %v6195_v32, %v5374_v6  ;;  %v6239_v8 = vadd.f32 %v6238_v14, %v5382_v39  ;;  %v6197_v26 = vpop.f32.mrb[61].mxu1  ;;  %v6240_v51 = vpop.f32.mrb[37].mxu0  ;;  %8653 = vmatprep.subr.bf16.mxu1 %v9294_v21  ;;  %8675 = vmatprep.subr.bf16.mxu0 %v9295_v61  ;;  %v9317_v21 = vld [vmem:[#allocation20 + $0x298] sm:$0xff]   ;;  %v9318_v61 = vld [vmem:[#allocation20 + $0x260] sm:$0xff]   ;;  %v9322_v14 = vld [vmem:[#allocation20 + $0x268] sm:$0xff]  }
0x1114   : > { %v6198_v37 = vadd.f32 %v6197_v26, %v5378_v62  ;;  %v6241_v49 = vadd.f32 %v6240_v51, %v5386_v0  ;;  %v6199_v54 = vpop.f32.mrb[62].mxu1  ;;  %v6242_v55 = vpop.f32.mrb[38].mxu0  ;;  %v9321_v32 = vld [vmem:[#allocation20 + $0x2a0] sm:$0xff]  }
0x1115   : > { %v6200_v56 = vadd.f32 %v6199_v54, %v5374_v6  ;;  %v6243_v29 = vadd.f32 %v6242_v55, %v5382_v39  ;;  %v6201_v53 = vpop.f32.mrb[63].mxu1  ;;  %v6244_v42 = vpop.f32.mrb[39].mxu0  ;;  %v6423_v45 = vmax.f32 %v6196_v30, 0.0  ;;  %v6425_v41 = vmax.f32 %v6239_v8, 0.0  ;;  %v9315_v6 = vld [vmem:[#allocation20 + $0x2d8] sm:$0xff]   ;;  %v9324_v30 = vld [vmem:[#allocation20 + $0x228] sm:$0xff]  }
0x1116   : > { %v6202_v43 = vadd.f32 %v6201_v53, %v5378_v62  ;;  %v6245_v57 = vadd.f32 %v6244_v42, %v5386_v0  ;;  %8654 = vmatpush3.bf16.msra.mxu1 %v9296_v40  ;;  %8676 = vmatpush3.bf16.msra.mxu0 %v9297_v28  ;;  %v6424_v50 = vmax.f32 %v6198_v37, 0.0  ;;  %v6426_v52 = vmax.f32 %v6241_v49, 0.0  ;;  %v9316_v39 = vld [vmem:[#allocation20 + $0x218] sm:$0xff]   ;;  %v9319_v62 = vld [vmem:[#allocation20 + $0x2e0] sm:$0xff]   ;;  %v9323_v40 = vld [vmem:[#allocation20 + $0x2e8] sm:$0xff]  }
0x1117   : > { %v6439_v48 = vmax.f32 %v6200_v56, 0.0  ;;  %v6441_v60 = vmax.f32 %v6243_v29, 0.0  ;;  %8655 = vmatprep.subr.bf16.mxu1 %v9298_v25  ;;  %8677 = vmatprep.subr.bf16.mxu0 %v9299_v24  ;;  %v9320_v0 = vld [vmem:[#allocation20 + $0x220] sm:$0xff]   ;;  %v11291_v28 = vld [vmem:[%s11548_s26 + $0x8] sm:$0xff]  ;;  %v9326_v25 = vld [vmem:[#allocation20 + $0x270] sm:$0xff]  }
0x1118   : > { %v6440_v47 = vmax.f32 %v6202_v43, 0.0  ;;  %v6442_v5 = vmax.f32 %v6245_v57, 0.0  ;;  %v9325_v8 = vld [vmem:[#allocation20 + $0x2a8] sm:$0xff]   ;;  %v5390_v26 = vrot.slane %v11291_v28, %v10556_v34  ;;  %v5398_v51 = vrot.slane %v11291_v28, %v5365_v2  ;;  %v9327_v24 = vld [vmem:[#allocation20 + $0x2f0] sm:$0xff]   ;;  %v9330_v2 = vld [vmem:[#allocation20 + $0x278] sm:$0xff]  }
0x1119   : > { %v6711_v7 = vpack.c.bf16 %v6439_v48, %v6423_v45  ;;  %v6713_v9 = vpack.c.bf16 %v6441_v60, %v6425_v41  ;;  %v5394_v37 = vrot.slane %v11291_v28, %v10562_v36  ;;  %v5402_v49 = vrot.slane %v11291_v28, %v5369_v31  ;;  %v9328_v56 = vld [vmem:[#allocation20 + $0x230] sm:$0xff]   ;;  %v9331_v57 = vld [vmem:[#allocation20 + $0x2f8] sm:$0xff]  }
0x111a   : > { %v6712_v10 = vpack.c.bf16 %v6440_v47, %v6424_v50  ;;  %v6714_v12 = vpack.c.bf16 %v6442_v5, %v6426_v52  ;;  %8656 = vmatpush3.bf16.msra.mxu1 %v9300_v59  ;;  %8678 = vmatpush3.bf16.msra.mxu0 %v9301_v44  ;;  %v9329_v29 = vld [vmem:[#allocation20 + $0x2b0] sm:$0xff]   ;;  %v9332_v50 = vld [vmem:[#allocation20 + $0x238] sm:$0xff]  }
0x111b   : > { %8685 = vmatprep.subr.bf16.mxu1 %v9302_v3  ;;  %8707 = vmatprep.subr.bf16.mxu0 %v9303_v4  ;;  %v9333_v52 = vld [vmem:[#allocation20 + $0x2b8] sm:$0xff]  }
0x111c   : > { %7612 = vmatprep.mubr.bf16.mxu1 %v6712_v10  ;;  %7653 = vmatprep.mubr.bf16.mxu0 %v6714_v12  ;;  %v9334_v10 = vld [vmem:[#allocation20 + $0x340] sm:$0xff]  }
0x111d   : > { %7613 = vmatmul.mubr.bf16.vlgmr.msra.gmra.mrb[76].mxu1 %v6711_v7  ;;  %7654 = vmatmul.mubr.bf16.vlgmr.msra.gmra.mrb[52].mxu0 %v6713_v9  ;;  %v9335_v12 = vld [vmem:[#allocation20 + $0x3c0] sm:$0xff]  }
0x111e   : > { %8686 = vmatpush3.bf16.msra.mxu1 %v9304_v13  ;;  %8708 = vmatpush3.bf16.msra.mxu0 %v9305_v15 }
0x111f   : > { %8687 = vmatprep.subr.bf16.mxu1 %v9306_v16  ;;  %8709 = vmatprep.subr.bf16.mxu0 %v9307_v17 }
0x1122   : > { %8688 = vmatpush3.bf16.msra.mxu1 %v9308_v35  ;;  %8710 = vmatpush3.bf16.msra.mxu0 %v9309_v46 }
0x1123   : > { %8689 = vmatprep.subr.bf16.mxu1 %v9310_v58  ;;  %8711 = vmatprep.subr.bf16.mxu0 %v9311_v18 }
0x1126   : > { %8690 = vmatpush3.bf16.msra.mxu1 %v9312_v19  ;;  %8712 = vmatpush3.bf16.msra.mxu0 %v9313_v22  ;;  %v9336_v19 = vld [vmem:[#allocation20 + $0x300] sm:$0xff]  }
0x1127   : > { %8691 = vmatprep.subr.bf16.mxu1 %v9314_v38  ;;  %8713 = vmatprep.subr.bf16.mxu0 %v9315_v6  ;;  %v9337_v22 = vld [vmem:[#allocation20 + $0x380] sm:$0xff]   ;;  %v9338_v38 = vld [vmem:[#allocation20 + $0x348] sm:$0xff]  }
0x1128   : > { %v9339_v6 = vld [vmem:[#allocation20 + $0x3c8] sm:$0xff]  }
0x112a   : > { %8692 = vmatpush3.bf16.msra.mxu1 %v9316_v39  ;;  %8714 = vmatpush3.bf16.msra.mxu0 %v9317_v21  ;;  %v9340_v39 = vld [vmem:[#allocation20 + $0x308] sm:$0xff]  }
0x112b   : > { %8693 = vmatprep.subr.bf16.mxu1 %v9318_v61  ;;  %8715 = vmatprep.subr.bf16.mxu0 %v9319_v62  ;;  %v9341_v21 = vld [vmem:[#allocation20 + $0x388] sm:$0xff]   ;;  %v9342_v61 = vld [vmem:[#allocation20 + $0x350] sm:$0xff]  }
0x112c   : > { %v9343_v62 = vld [vmem:[#allocation20 + $0x3d0] sm:$0xff]  }
0x112e   : > { %8694 = vmatpush3.bf16.msra.mxu1 %v9320_v0  ;;  %8716 = vmatpush3.bf16.msra.mxu0 %v9321_v32  ;;  %v9344_v0 = vld [vmem:[#allocation20 + $0x310] sm:$0xff]  }
0x112f   : > { %8695 = vmatprep.subr.bf16.mxu1 %v9322_v14  ;;  %8717 = vmatprep.subr.bf16.mxu0 %v9323_v40  ;;  %v9345_v32 = vld [vmem:[#allocation20 + $0x390] sm:$0xff]   ;;  %v9346_v14 = vld [vmem:[#allocation20 + $0x358] sm:$0xff]  }
0x1130   : > { %v9347_v40 = vld [vmem:[#allocation20 + $0x3d8] sm:$0xff]  }
0x1132   : > { %v6281_v54 = vpop.f32.mrb[64].mxu1  ;;  %v6324_v55 = vpop.f32.mrb[40].mxu0  ;;  %8696 = vmatpush3.bf16.msra.mxu1 %v9324_v30  ;;  %8718 = vmatpush3.bf16.msra.mxu0 %v9325_v8  ;;  %v9348_v30 = vld [vmem:[#allocation20 + $0x318] sm:$0xff]  }
0x1133   : > { %v6282_v34 = vadd.f32 %v6281_v54, %v5390_v26  ;;  %v6325_v53 = vadd.f32 %v6324_v55, %v5398_v51  ;;  %v6283_v42 = vpop.f32.mrb[65].mxu1  ;;  %v6326_v43 = vpop.f32.mrb[41].mxu0  ;;  %8697 = vmatprep.subr.bf16.mxu1 %v9326_v25  ;;  %8719 = vmatprep.subr.bf16.mxu0 %v9327_v24  ;;  %v9349_v8 = vld [vmem:[#allocation20 + $0x398] sm:$0xff]   ;;  %v9352_v25 = vld [vmem:[#allocation20 + $0x320] sm:$0xff]   ;;  %v9356_v54 = vld [vmem:[#allocation20 + $0x328] sm:$0xff]  }
0x1134   : > { %v6284_v59 = vadd.f32 %v6283_v42, %v5394_v37  ;;  %v6327_v36 = vadd.f32 %v6326_v43, %v5402_v49  ;;  %v6285_v44 = vpop.f32.mrb[66].mxu1  ;;  %v6328_v45 = vpop.f32.mrb[42].mxu0  ;;  %v9353_v24 = vld [vmem:[#allocation20 + $0x3a0] sm:$0xff]   ;;  %v9357_v55 = vld [vmem:[#allocation20 + $0x3a8] sm:$0xff]   ;;  %v5410_v42 = vrot.slane %v11291_v28, %v5377_v1  ;;  %v5418_v43 = vrot.slane %v11291_v28, %v5385_v27 }
0x1135   : > { %v6286_v41 = vadd.f32 %v6285_v44, %v5390_v26  ;;  %v6329_v31 = vadd.f32 %v6328_v45, %v5398_v51  ;;  %v6287_v48 = vpop.f32.mrb[67].mxu1  ;;  %v6330_v60 = vpop.f32.mrb[43].mxu0  ;;  %v6427_v47 = vmax.f32 %v6282_v34, 0.0  ;;  %v6429_v5 = vmax.f32 %v6325_v53, 0.0  ;;  %v9350_v26 = vld [vmem:[#allocation20 + $0x360] sm:$0xff]   ;;  %v9358_v34 = vld [vmem:[#allocation20 + $0x370] sm:$0xff]  }
0x1136   : > { %v6288_v3 = vadd.f32 %v6287_v48, %v5394_v37  ;;  %v6331_v4 = vadd.f32 %v6330_v60, %v5402_v49  ;;  %8698 = vmatpush3.bf16.msra.mxu1 %v9328_v56  ;;  %8720 = vmatpush3.bf16.msra.mxu0 %v9329_v29  ;;  %v6428_v13 = vmax.f32 %v6284_v59, 0.0  ;;  %v6430_v15 = vmax.f32 %v6327_v36, 0.0  ;;  %v9351_v51 = vld [vmem:[#allocation20 + $0x3e0] sm:$0xff]   ;;  %v9354_v37 = vld [vmem:[#allocation20 + $0x368] sm:$0xff]   ;;  %v9359_v53 = vld [vmem:[#allocation20 + $0x3f0] sm:$0xff]  }
0x1137   : > { %v6443_v7 = vmax.f32 %v6286_v41, 0.0  ;;  %v6445_v9 = vmax.f32 %v6329_v31, 0.0  ;;  %8699 = vmatprep.subr.bf16.mxu1 %v9330_v2  ;;  %8721 = vmatprep.subr.bf16.mxu0 %v9331_v57  ;;  %v9355_v49 = vld [vmem:[#allocation20 + $0x3e8] sm:$0xff]   ;;  %v5406_v56 = vrot.slane %v11291_v28, %v5373_v63  ;;  %v5414_v29 = vrot.slane %v11291_v28, %v5381_v11  ;;  %v9360_v59 = vld [vmem:[#allocation20 + $0x330] sm:$0xff]   ;;  %v9362_v41 = vld [vmem:[#allocation20 + $0x378] sm:$0xff]  }
0x1138   : > { %v6444_v16 = vmax.f32 %v6288_v3, 0.0  ;;  %v6446_v17 = vmax.f32 %v6331_v4, 0.0  ;;  %v9361_v63 = vld [vmem:[#allocation20 + $0x3b0] sm:$0xff]   ;;  %v9363_v31 = vld [vmem:[#allocation20 + $0x3f8] sm:$0xff]  }
0x1139   : > { %v6715_v35 = vpack.c.bf16 %v6443_v7, %v6427_v47  ;;  %v6717_v46 = vpack.c.bf16 %v6445_v9, %v6429_v5  ;;  %v9364_v47 = vld [vmem:[#allocation20 + $0x338] sm:$0xff]  }
0x113a   : > { %v6716_v58 = vpack.c.bf16 %v6444_v16, %v6428_v13  ;;  %v6718_v18 = vpack.c.bf16 %v6446_v17, %v6430_v15  ;;  %8700 = vmatpush3.bf16.msra.mxu1 %v9332_v50  ;;  %8722 = vmatpush3.bf16.msra.mxu0 %v9333_v52  ;;  %v9365_v5 = vld [vmem:[#allocation20 + $0x3b8] sm:$0xff]  }
0x113b   : > { %8729 = vmatprep.subr.bf16.mxu1 %v9334_v10  ;;  %8751 = vmatprep.subr.bf16.mxu0 %v9335_v12 }
0x113c   : > { %7694 = vmatprep.mubr.bf16.mxu1 %v6716_v58  ;;  %7735 = vmatprep.mubr.bf16.mxu0 %v6718_v18 }
0x113d   : > { %7695 = vmatmul.mubr.bf16.vlgmr.msra.gmra.mrb[80].mxu1 %v6715_v35  ;;  %7736 = vmatmul.mubr.bf16.vlgmr.msra.gmra.mrb[56].mxu0 %v6717_v46 }
0x113e   : > { %8730 = vmatpush3.bf16.msra.mxu1 %v9336_v19  ;;  %8752 = vmatpush3.bf16.msra.mxu0 %v9337_v22 }
0x113f   : > { %8731 = vmatprep.subr.bf16.mxu1 %v9338_v38  ;;  %8753 = vmatprep.subr.bf16.mxu0 %v9339_v6  ;;  %v8389_v38 = vld [vmem:[%s11549_s30] ss:$0 sm:$0xff] }
0x1142   : > { %8732 = vmatpush3.bf16.msra.mxu1 %v9340_v39  ;;  %8754 = vmatpush3.bf16.msra.mxu0 %v9341_v21 }
0x1143   : > { %8733 = vmatprep.subr.bf16.mxu1 %v9342_v61  ;;  %8755 = vmatprep.subr.bf16.mxu0 %v9343_v62 }
0x1146   : > { %8734 = vmatpush3.bf16.msra.mxu1 %v9344_v0  ;;  %8756 = vmatpush3.bf16.msra.mxu0 %v9345_v32 }
0x1147   : > { %8735 = vmatprep.subr.bf16.mxu1 %v9346_v14  ;;  %8757 = vmatprep.subr.bf16.mxu0 %v9347_v40 }
0x114a   : > { %8736 = vmatpush3.bf16.msra.mxu1 %v9348_v30  ;;  %8758 = vmatpush3.bf16.msra.mxu0 %v9349_v8 }
0x114b   : > { %8737 = vmatprep.subr.bf16.mxu1 %v9350_v26  ;;  %8759 = vmatprep.subr.bf16.mxu0 %v9351_v51 }
0x114e   : > { %8738 = vmatpush3.bf16.msra.mxu1 %v9352_v25  ;;  %8760 = vmatpush3.bf16.msra.mxu0 %v9353_v24 }
0x114f   : > { %8739 = vmatprep.subr.bf16.mxu1 %v9354_v37  ;;  %8761 = vmatprep.subr.bf16.mxu0 %v9355_v49 }
0x1152   : > { %v6367_v2 = vpop.f32.mrb[68].mxu1  ;;  %v6410_v57 = vpop.f32.mrb[44].mxu0  ;;  %8740 = vmatpush3.bf16.msra.mxu1 %v9356_v54  ;;  %8762 = vmatpush3.bf16.msra.mxu0 %v9357_v55 }
0x1153   : > { %v6368_v36 = vadd.f32 %v6367_v2, %v5406_v56  ;;  %v6411_v44 = vadd.f32 %v6410_v57, %v5414_v29  ;;  %v6369_v45 = vpop.f32.mrb[69].mxu1  ;;  %v6412_v11 = vpop.f32.mrb[45].mxu0  ;;  %8741 = vmatprep.subr.bf16.mxu1 %v9358_v34  ;;  %8763 = vmatprep.subr.bf16.mxu0 %v9359_v53 }
0x1154   : > { %v6370_v48 = vadd.f32 %v6369_v45, %v5410_v42  ;;  %v6413_v1 = vadd.f32 %v6412_v11, %v5418_v43  ;;  %v6371_v60 = vpop.f32.mrb[70].mxu1  ;;  %v6414_v33 = vpop.f32.mrb[46].mxu0 }
0x1155   : > { %v6372_v3 = vadd.f32 %v6371_v60, %v5406_v56  ;;  %v6415_v27 = vadd.f32 %v6414_v33, %v5414_v29  ;;  %v6373_v28 = vpop.f32.mrb[71].mxu1  ;;  %v6416_v4 = vpop.f32.mrb[47].mxu0  ;;  %v6431_v7 = vmax.f32 %v6368_v36, 0.0  ;;  %v6433_v9 = vmax.f32 %v6411_v44, 0.0 }
0x1156   : > { %v6374_v50 = vadd.f32 %v6373_v28, %v5410_v42  ;;  %v6417_v52 = vadd.f32 %v6416_v4, %v5418_v43  ;;  %8742 = vmatpush3.bf16.msra.mxu1 %v9360_v59  ;;  %8764 = vmatpush3.bf16.msra.mxu0 %v9361_v63  ;;  %v6432_v13 = vmax.f32 %v6370_v48, 0.0  ;;  %v6434_v15 = vmax.f32 %v6413_v1, 0.0 }
0x1157   : > { %v6447_v10 = vmax.f32 %v6372_v3, 0.0  ;;  %v6449_v12 = vmax.f32 %v6415_v27, 0.0  ;;  %8743 = vmatprep.subr.bf16.mxu1 %v9362_v41  ;;  %8765 = vmatprep.subr.bf16.mxu0 %v9363_v31 }
0x1158   : > { %v6448_v16 = vmax.f32 %v6374_v50, 0.0  ;;  %v6450_v17 = vmax.f32 %v6417_v52, 0.0 }
0x1159   : > { %v6719_v35 = vpack.c.bf16 %v6447_v10, %v6431_v7  ;;  %v6721_v46 = vpack.c.bf16 %v6449_v12, %v6433_v9 }
0x115a   : > { %v6720_v58 = vpack.c.bf16 %v6448_v16, %v6432_v13  ;;  %v6722_v18 = vpack.c.bf16 %v6450_v17, %v6434_v15  ;;  %8744 = vmatpush3.bf16.msra.mxu1 %v9364_v47  ;;  %8766 = vmatpush3.bf16.msra.mxu0 %v9365_v5 }
0x115c   : > { %7776 = vmatprep.mubr.bf16.mxu1 %v6720_v58  ;;  %7817 = vmatprep.mubr.bf16.mxu0 %v6722_v18 }
0x115d   : > { %7777 = vmatmul.mubr.bf16.vlgmr.msra.gmra.mrb[84].mxu1 %v6719_v35  ;;  %7818 = vmatmul.mubr.bf16.vlgmr.msra.gmra.mrb[60].mxu0 %v6721_v46 }
0x11d0   : > { %v8613_v19 = vpop.f32.mrb[72].mxu1  ;;  %v8635_v22 = vpop.f32.mrb[48].mxu0 }
0x11d1   : > { %v8614_v6 = vpop.f32.mrb[73].mxu1  ;;  %v8636_v39 = vpop.f32.mrb[49].mxu0 }
0x11d2   : > { %v8615_v21 = vadd.f32 %v8614_v6, %v8613_v19  ;;  %v8637_v61 = vadd.f32 %v8636_v39, %v8635_v22  ;;  %v8616_v62 = vpop.f32.mrb[74].mxu1  ;;  %v8638_v0 = vpop.f32.mrb[50].mxu0 }
0x11d3   : > { %v8617_v32 = vpop.f32.mrb[75].mxu1  ;;  %v8639_v14 = vpop.f32.mrb[51].mxu0 }
0x11d4   : > { %v7533_v40 = vadd.f32 %v8615_v21, %v8389_v38  ;;  %v8618_v30 = vadd.f32 %v8617_v32, %v8616_v62  ;;  %v8640_v8 = vadd.f32 %v8639_v14, %v8638_v0 }
0x11d6   : > { %v7574_v26 = vadd.f32 %v8637_v61, %v7533_v40  ;;  %v7536_v51 = vadd.f32 %v8618_v30, %v8389_v38 }
0x11d8   : > { %v7577_v25 = vadd.f32 %v8640_v8, %v7536_v51 }
0x11f0   : > { %v8657_v24 = vpop.f32.mrb[76].mxu1  ;;  %v8679_v37 = vpop.f32.mrb[52].mxu0 }
0x11f1   : > { %v8658_v49 = vpop.f32.mrb[77].mxu1  ;;  %v8680_v54 = vpop.f32.mrb[53].mxu0 }
0x11f2   : > { %v8659_v55 = vadd.f32 %v8658_v49, %v8657_v24  ;;  %v8681_v56 = vadd.f32 %v8680_v54, %v8679_v37  ;;  %v8660_v29 = vpop.f32.mrb[78].mxu1  ;;  %v8682_v34 = vpop.f32.mrb[54].mxu0  ;;  %v8518_v37 = vld [vmem:[%s11551_s11] ss:$0 sm:$0xff] }
0x11f3   : > { %v8661_v53 = vpop.f32.mrb[79].mxu1  ;;  %v8683_v42 = vpop.f32.mrb[55].mxu0 }
0x11f4   : > { %v7615_v43 = vadd.f32 %v8659_v55, %v7574_v26  ;;  %v8662_v2 = vadd.f32 %v8661_v53, %v8660_v29  ;;  %v8684_v57 = vadd.f32 %v8683_v42, %v8682_v34  ;;  %v8519_v55 = vld [vmem:[%s11552_s4] ss:$0 sm:$0xff] }
0x11f6   : > { %v7656_v59 = vadd.f32 %v8681_v56, %v7615_v43  ;;  %v7618_v63 = vadd.f32 %v8662_v2, %v7577_v25 }
0x11f8   : > { %v7659_v36 = vadd.f32 %v8684_v57, %v7618_v63 }
0x1210   : > { %v8701_v44 = vpop.f32.mrb[80].mxu1  ;;  %v8723_v45 = vpop.f32.mrb[56].mxu0 }
0x1211   : > { %v8702_v11 = vpop.f32.mrb[81].mxu1  ;;  %v8724_v41 = vpop.f32.mrb[57].mxu0 }
0x1212   : > { %v8703_v31 = vadd.f32 %v8702_v11, %v8701_v44  ;;  %v8725_v48 = vadd.f32 %v8724_v41, %v8723_v45  ;;  %v8704_v1 = vpop.f32.mrb[82].mxu1  ;;  %v8726_v60 = vpop.f32.mrb[58].mxu0 }
0x1213   : > { %v8705_v33 = vpop.f32.mrb[83].mxu1  ;;  %v8727_v3 = vpop.f32.mrb[59].mxu0 }
0x1214   : > { %v7697_v27 = vadd.f32 %v8703_v31, %v7656_v59  ;;  %v8706_v28 = vadd.f32 %v8705_v33, %v8704_v1  ;;  %v8728_v4 = vadd.f32 %v8727_v3, %v8726_v60 }
0x1216   : > { %v7738_v50 = vadd.f32 %v8725_v48, %v7697_v27  ;;  %v7700_v52 = vadd.f32 %v8706_v28, %v7659_v36 }
0x1218   : > { %v7741_v47 = vadd.f32 %v8728_v4, %v7700_v52 }
0x1230   : > { %v8745_v5 = vpop.f32.mrb[84].mxu1  ;;  %v8767_v7 = vpop.f32.mrb[60].mxu0 }
0x1231   : > { %v8746_v9 = vpop.f32.mrb[85].mxu1  ;;  %v8768_v10 = vpop.f32.mrb[61].mxu0 }
0x1232   : > { %v8747_v12 = vadd.f32 %v8746_v9, %v8745_v5  ;;  %v8769_v13 = vadd.f32 %v8768_v10, %v8767_v7  ;;  %v8748_v15 = vpop.f32.mrb[86].mxu1  ;;  %v8770_v16 = vpop.f32.mrb[62].mxu0 }
0x1233   : > { %v8749_v17 = vpop.f32.mrb[87].mxu1  ;;  %v8771_v35 = vpop.f32.mrb[63].mxu0 }
0x1234   : > { %v7779_v46 = vadd.f32 %v8747_v12, %v7738_v50  ;;  %v8750_v58 = vadd.f32 %v8749_v17, %v8748_v15  ;;  %v8772_v18 = vadd.f32 %v8771_v35, %v8770_v16 }
0x1236   : > { %v7820_v19 = vadd.f32 %v8769_v13, %v7779_v46  ;;  %v7782_v22 = vadd.f32 %v8750_v58, %v7741_v47 }
0x1238   : > { %v7823_v38 = vadd.f32 %v8772_v18, %v7782_v22  ;;  %v7826_v6 = vadd.f32 %v7820_v19, %v11233_v20 }
0x123a   : > { %7830 = vadd.xlane.f32.xlu1 %v7826_v6  ;;  %v7827_v39 = vadd.f32 %v7823_v38, %v11235_v23 }
0x123c   : > { %7832 = vadd.xlane.f32.xlu0 %v7827_v39 }
0x12c7   : > { %v7831_v21 = vpop.xlane.xlu1 %7830 }
0x12c8   : > { %v7834_v61 = vmul.f32 0.0078125, %v7831_v21 }
0x12c9   : > { %v7833_v62 = vpop.xlane.xlu0 %7832 }
0x12ca   : > { %v7836_v0 = vsub.f32 %v7826_v6, %v7834_v61  ;;  %v7835_v32 = vmul.f32 0.0078125, %v7833_v62 }
0x12cc   : > { %v7837_v14 = vsub.f32 %v7827_v39, %v7835_v32  ;;  %v7838_v40 = vmul.f32 %v7836_v0, %v7836_v0 }
0x12ce   : > { %7840 = vadd.xlane.f32.xlu1 %v7838_v40  ;;  %v7839_v30 = vmul.f32 %v7837_v14, %v7837_v14 }
0x12d0   : > { %7842 = vadd.xlane.f32.xlu0 %v7839_v30 }
0x135b   : > { %v7841_v8 = vpop.xlane.xlu1 %7840 }
0x135c   : > { %v7844_v26 = vmul.f32 0.0078125, %v7841_v8 }
0x135d   : > { %v7843_v51 = vpop.xlane.xlu0 %7842 }
0x135e   : > { %v7846_v20 = vadd.f32 1e-05, %v7844_v26  ;;  %v7845_v25 = vmul.f32 0.0078125, %v7843_v51 }
0x1360   : > { %9438 = vrsqrt.f32 %v7846_v20  ;;  %v7847_v23 = vadd.f32 1e-05, %v7845_v25 }
0x1362   : > { %9440 = vrsqrt.f32 %v7847_v23 }
0x136a   : > { %v9439_v24 = vpop.eup %9438 }
0x136b   : > { %v7850_v49 = vmul.f32 %v9439_v24, %v7836_v0 }
0x136c   : > { %v9441_v54 = vpop.eup %9440 }
0x136d   : > { %v7858_v56 = vmul.f32 %v8518_v37, %v7850_v49  ;;  %v7851_v29 = vmul.f32 %v9441_v54, %v7837_v14 }
0x136f   : > { %v7866_v34 = vadd.f32 %v8519_v55, %v7858_v56  ;;  %v7859_v53 = vmul.f32 %v8518_v37, %v7851_v29 }
0x1371   : > { %v7867_v42 = vadd.f32 %v8519_v55, %v7859_v53  ;;  %7868 = vst [vmem:[%s1043_s13] sm:$0xff] %v7866_v34 }
0x1373   : > { %7869 = vst [vmem:[%s1043_s13 + $0x8] sm:$0xff] %v7867_v42 }
0x1374   : > { %9799 = shalt.err (!%p9796_p2)
}
0x1375   : > { %s9800_s21 = scalar_lea.hbm %s11331_s29, 256  ;;  %s9804_s0 = scalar_lea.hbm %s11554_s14, 512 }
0x1376   : > { %p9801_p4 = scmp.ne.s32.totalorder %s11331_s29, %s9800_s21  ;;  %p9805_p6 = scmp.lt.u32.totalorder %s11331_s29, %s11554_s14 }
0x1377   : > { %p9806_p9 = scmp.lt.u32.totalorder %s9804_s0, %s9800_s21  ;;  %p9808_p5 = scmp.lt.u32.totalorder %s9800_s21, %s11331_s29 }
0x1378   : > { %p9802_p8 = pnand %p9801_p4, %p11555_p1 }
0x1379   : > { %p9807_p10 = por %p9806_p9, %p9805_p6 }
0x137a   : > { %p9803_p7 = pneg %p9802_p8 }
0x137b   : > { %p9809_p12 = por %p9808_p5, %p9807_p10 }
0x137d   : > { %p9810_p0 = pnand %p9809_p12, %p9803_p7 }
0x137f   : > { %9813 = shalt.err (!%p9810_p0)
}
0x1380   : > { %s9920_s11 = smov 128   ;;  %s9921_s28 = smov 8  }
0x1381   : > { %8991 = dma.vmem_to_hbm [thread:$0]  (%p11555_p1), %s11333_s9, 256, %s11331_s29, %s7871_s22, %s9920_s11, %s9920_s11, %s9921_s28  }
0x1382 PF: > { %s11556_s17 = sld [smem:[#allocation31_spill]]  ;;  %s11557_s4 = sld [smem:[#allocation40_spill]] }
0x1383   : > { %s11558_s20 = sld [smem:[#allocation34_spill]] }
0x1388   : > { %s7901_s13 = sand.u32 1, %s11556_s17   ;;  %p11559_p11 = scmp.ne.s32.totalorder %s11557_s4, 0 }
0x1389   : > { %p11560_p3 = scmp.ge.s32.totalorder %s11558_s20, 2  ;;  %s7902_s6 = scalar_lea.sflag [#allocation4], %s7901_s13 }
0x138b   : > { %p9032_p13 = pnand %p11560_p3, %p11559_p11 }
0x138d   : > { %9867 = dma.done.wait (!%p9032_p13), %s7902_s6, 256  }
0x138e   : > { %9869 = vsyncadd (!%p9032_p13), %s7902_s6, 4294967040  ;;  %s50_s4 = sadd.s32 1, %s11558_s20   ;;  %s11561_s1 = sld [smem:[#allocation32_spill]] }
0x138f   : > { %p47_p2 = scmp.ge.s32.totalorder %s50_s4, 4   ;;  %s11562_s7 = sld [smem:[#allocation39_spill]] }
0x1390   : > { %s11563_s10 = sld [smem:[#allocation36_spill]]  ;;  %s11564_s27 = smov %s9876_s3 }
0x1391   : > { %s11566_s28 = smov %s9888_s8  ;;  %49 = sbr.rel (!%p47_p2) target bundleno = 39 (0x27), region = 230 }
0x1394   : > { %s11565_s3 = smov %s11561_s1 }
0x1396   : > { %s11567_s8 = smov %s11563_s10 }
0x1398   :  { %7907 = vsyncpa [#allocation3], 1 }
0x1399   :  { %7909 = vsyncpa [#allocation3 + $0x1], 1 }
0x139a   :  { %7910 = vsyncpa [#allocation6], 1 }
0x139b   :  { %7912 = vsyncpa [#allocation6 + $0x1], 1 }
0x139c   :  { %7913 = vsyncpa [#allocation9], 1 }
0x139d   :  { %7914 = vsyncpa [#allocation12], 1 }
0x139e   :  { %7915 = vsyncpa [#allocation15], 1 }
0x139f   :  { %7916 = vsyncpa [#allocation18], 1 }
0x13a0   :  { %7917 = vsyncpa [#allocation21], 1 }
0x13a1   :  { %7918 = vsyncpa [#allocation4], 1 }
0x13a2   :  { %7920 = vsyncpa [#allocation4 + $0x1], 1 }

</bundles_post_ra>
